<compile_context>
chip_gen: v7x
topology: tpu7x:2x2x1
jax: 0.10.0
libtpu: 0.0.40
codegen_flags: <defaults>
</compile_context>

<pallas_src>
import functools

import jax
import jax.numpy as jnp
from jax.experimental import pallas as pl
from jax.experimental.pallas import tpu as pltpu

DIM = 16            # d in the reference
CONVDIM = 8
NUM_CLASSES = 4
INPUT_DIM = 12
EDGE_DIM = 6
IND2 = CONVDIM + DIM            # conv2 message-nn width (24), padded to 2*DIM


def _leaky(v):
    # nn.LeakyReLU default negative_slope = 0.01
    return jnp.where(v >= 0, v, 0.01 * v)


def _round_up(v, m):
    return (v + m - 1) // m * m


# ----------------------------------------------------------------------------
# Kernel
# ----------------------------------------------------------------------------
def stgen_kernel(
    # streamed per-tile data
    src_ref, dst_ref, ea_ref,
    # node data (resident)
    x_ref, tw_ref,
    # node encoder
    nW1, nb1, nW2, nb2,
    # edge encoder layer 1 (layer 2 is folded into c1We / c2We)
    eW1, eb1,
    # time_weights_fc: Linear(1, dim)
    tW, tb,
    # conv1 message nn (split over cat([x_j, e])) + root/bias
    c1Wx, c1We, c1b1, c1W2, c1b2, c1W3, c1b3, c1root, c1bias,
    # conv2 message nn (BN + edge-encoder folded, layer-1 padded to 32) + root/bias
    c2Wx, c2We, c2b1, c2W2, c2b2, c2W3, c2b3, c2root, c2bias,
    # final fc (split over cat([x1, x2]); BN folded)
    fcWa, fcWb, fcb,
    # output
    out_ref,
    # scratch (persist across the whole grid)
    h_ref, hw_ref, acc_ref, agg2_ref,
):
    p = pl.program_id(0)            # 0: conv1 edge pass, 1: conv2 edge pass
    t = pl.program_id(1)            # edge-tile index within the pass
    n_tiles = pl.num_programs(1)
    tile_e = ea_ref.shape[0]
    n_pad = h_ref.shape[0]

    dot = lambda a, b: jnp.dot(a, b, preferred_element_type=jnp.float32)

    # ---- first grid step: node encoder * time weights, precompute h @ c1Wx,
    #      zero the conv1 accumulator.
    @pl.when(jnp.logical_and(p == 0, t == 0))
    def _init_nodes():
        h = dot(_leaky(dot(x_ref[...], nW1[...]) + nb1[...]), nW2[...]) + nb2[...]
        h = h * (tw_ref[...] * tW[...] + tb[...])   # Linear(1, dim) == bcast mul+bias
        h_ref[...] = h
        hw_ref[...] = dot(h, c1Wx[...])             # [n_pad, 2*DIM]
        acc_ref[...] = jnp.zeros_like(acc_ref)

    # ---- start of pass 1: finalize x1 (ReLU; eval-BN folded downstream;
    #      dropout = identity), precompute x1 @ c2Wx, zero conv2 accumulator.
    @pl.when(jnp.logical_and(p == 1, t == 0))
    def _finalize_x1():
        x1 = jnp.maximum(acc_ref[...] + dot(h_ref[...], c1root[...]) + c1bias[...], 0.0)
        acc_ref[...] = x1                           # reuse agg1 storage for x1
        hw_ref[...] = dot(x1, c2Wx[...])            # [n_pad, 2*DIM] (cols 24:32 zero)
        agg2_ref[...] = jnp.zeros_like(agg2_ref)

    # ---- per-tile edge features (edge-encoder layer 1) and one-hot matrices.
    #      Padded edges carry index -1 -> all-zero one-hot row/column, so they
    #      gather zeros and scatter nothing (also: no OOB access is possible).
    u = _leaky(dot(ea_ref[...], eW1[...]) + eb1[...])                    # [tile_e, DIM]
    src = src_ref[...]                                                   # [tile_e, 1]
    dst = dst_ref[...]                                                   # [1, tile_e]
    oh_src = (jax.lax.broadcasted_iota(jnp.int32, (tile_e, n_pad), 1)
              == src).astype(jnp.float32)                                # [tile_e, n_pad]
    oh_dst_t = (jax.lax.broadcasted_iota(jnp.int32, (n_pad, tile_e), 0)
                == dst).astype(jnp.float32)                              # [n_pad, tile_e]

    # ---- pass 0: conv1 messages (gather fused into layer 1) + MXU scatter-add.
    @pl.when(p == 0)
    def _conv1_pass():
        m = _leaky(dot(oh_src, hw_ref[...]) + dot(u, c1We[...]) + c1b1[...])
        m = _leaky(dot(m, c1W2[...]) + c1b2[...])
        m = dot(m, c1W3[...]) + c1b3[...]                                # [tile_e, CONVDIM]
        acc_ref[...] = acc_ref[...] + dot(oh_dst_t, m)

    # ---- pass 1: conv2 messages + MXU scatter-add.
    @pl.when(p == 1)
    def _conv2_pass():
        m = _leaky(dot(oh_src, hw_ref[...]) + dot(u, c2We[...]) + c2b1[...])
        m = _leaky(dot(m, c2W2[...]) + c2b2[...])
        m = dot(m, c2W3[...]) + c2b3[...]                                # [tile_e, NUM_CLASSES]
        agg2_ref[...] = agg2_ref[...] + dot(oh_dst_t, m)

    # ---- very last grid step: conv2 root/bias + ReLU, fc, log_softmax.
    @pl.when(jnp.logical_and(p == 1, t == n_tiles - 1))
    def _finalize_out():
        x1 = acc_ref[...]
        x2 = jnp.maximum(agg2_ref[...] + dot(x1, c2root[...]) + c2bias[...], 0.0)
        logits = dot(x1, fcWa[...]) + dot(x2, fcWb[...]) + fcb[...]      # [n_pad, C]
        mx = jnp.max(logits, axis=1, keepdims=True)
        lse = jnp.log(jnp.sum(jnp.exp(logits - mx), axis=1, keepdims=True)) + mx
        out_ref[...] = logits - lse


# ----------------------------------------------------------------------------
# Parameters
# ----------------------------------------------------------------------------
def init_params(key, input_dim=INPUT_DIM, edge_dim=EDGE_DIM, dim=DIM,
                convdim=CONVDIM, num_classes=NUM_CLASSES):
    """Raw parameters in the same layout as the PyTorch module."""
    ks = iter(jax.random.split(key, 64))

    def lin(i, o):
        w = jax.random.normal(next(ks), (i, o), jnp.float32) / jnp.sqrt(float(i))
        b = 0.05 * jax.random.normal(next(ks), (1, o), jnp.float32)
        return w, b

    nW1, nb1 = lin(input_dim, dim); nW2, nb2 = lin(dim, dim)
    eW1, eb1 = lin(edge_dim, dim);  eW2, eb2 = lin(dim, dim)
    tW, tb = lin(1, dim)

    c1W1, c1b1 = lin(2 * dim, 2 * dim)
    c1W2, c1b2 = lin(2 * dim, 2 * dim)
    c1W3, c1b3 = lin(2 * dim, convdim)
    c1root, _ = lin(dim, convdim)
    c1bias = jnp.zeros((1, convdim), jnp.float32)

    ind2 = convdim + dim
    c2W1, c2b1 = lin(ind2, ind2)
    c2W2, c2b2 = lin(ind2, ind2)
    c2W3, c2b3 = lin(ind2, num_classes)
    c2root, _ = lin(convdim, num_classes)
    c2bias = jnp.zeros((1, num_classes), jnp.float32)

    # BatchNorm1d(convdim) eval-mode running stats folded to scale/shift
    gamma = 1.0 + 0.1 * jax.random.normal(next(ks), (convdim,), jnp.float32)
    beta = 0.1 * jax.random.normal(next(ks), (convdim,), jnp.float32)
    rmean = 0.1 * jax.random.normal(next(ks), (convdim,), jnp.float32)
    rvar = 1.0 + 0.1 * jnp.abs(jax.random.normal(next(ks), (convdim,), jnp.float32))
    scale = gamma / jnp.sqrt(rvar + 1e-5)
    shift = beta - rmean * scale
    bn_scale = scale.reshape(1, convdim)
    bn_shift = shift.reshape(1, convdim)

    fcW, fcb = lin(convdim + num_classes, num_classes)

    return (nW1, nb1, nW2, nb2, eW1, eb1, eW2, eb2, tW, tb,
            c1W1, c1b1, c1W2, c1b2, c1W3, c1b3, c1root, c1bias,
            c2W1, c2b1, c2W2, c2b2, c2W3, c2b3, c2root, c2bias,
            bn_scale, bn_shift, fcW, fcb)


def prepare_params(raw, dim=DIM, convdim=CONVDIM, num_classes=NUM_CLASSES):
    """Fold edge-encoder layer 2 + eval-BN into downstream weights.  conv2's
    first message layer is zero-padded from 24 to 32 outputs so the x1@c2Wx
    slab reuses the same full-width VMEM scratch as h@c1Wx (exact, extra lanes
    stay 0 and are killed by zero rows in c2W2).  Order matches the kernel."""
    (nW1, nb1, nW2, nb2, eW1, eb1, eW2, eb2, tW, tb,
     c1W1, c1b1, c1W2, c1b2, c1W3, c1b3, c1root, c1bias,
     c2W1, c2b1, c2W2, c2b2, c2W3, c2b3, c2root, c2bias,
     bn_scale, bn_shift, fcW, fcb) = raw

    ind2 = convdim + dim
    pad2 = 2 * dim - ind2

    # conv1 message layer 1 split over cat([x_j, e]); fold (eW2, eb2) into the
    # e-branch so encoded edge features are never materialized.
    c1Wx = c1W1[:dim]
    c1We = eW2 @ c1W1[dim:]
    c1b1f = c1b1 + eb2 @ c1W1[dim:]

    # conv2: same e-branch fold, plus fold eval-mode BN (x1 -> x1*s + sh) into
    # every consumer of x1; pad layer-1 width 24 -> 32.
    s = bn_scale.reshape(-1)                       # [convdim]
    sh = bn_shift                                  # [1, convdim]
    c2Wxp = jnp.pad(s[:, None] * c2W1[:convdim], ((0, 0), (0, pad2)))
    c2Wep = jnp.pad(eW2 @ c2W1[convdim:], ((0, 0), (0, pad2)))
    c2b1f = jnp.pad(c2b1 + eb2 @ c2W1[convdim:] + sh @ c2W1[:convdim],
                    ((0, 0), (0, pad2)))
    c2W2p = jnp.pad(c2W2, ((0, pad2), (0, 0)))
    c2rootf = s[:, None] * c2root
    c2biasf = c2bias + sh @ c2root

    # fc split over cat([x1, x2]); BN fold on the x1 branch.
    fcWa = s[:, None] * fcW[:convdim]
    fcWb = fcW[convdim:]
    fcbf = fcb + sh @ fcW[:convdim]

    return (nW1, nb1, nW2, nb2, eW1, eb1, tW, tb,
            c1Wx, c1We, c1b1f, c1W2, c1b2, c1W3, c1b3, c1root, c1bias,
            c2Wxp, c2Wep, c2b1f, c2W2p, c2b2, c2W3, c2b3, c2rootf, c2biasf,
            fcWa, fcWb, fcbf)


# ----------------------------------------------------------------------------
# Wrapper
# ----------------------------------------------------------------------------
@functools.partial(jax.jit, static_argnames=("tile_e", "num_classes"))
def stgen_forward(x, edge_index, edge_attr, time_weights, kernel_params, *,
                  tile_e=2048, num_classes=NUM_CLASSES):
    # tile_e must be a multiple of 128 (lane-dense dst block).  Larger tiles
    # amortize per-grid-step overhead; shrink if [tile_e, n_pad] one-hots push
    # past the VMEM limit on very large graphs.
    assert tile_e % 128 == 0 and tile_e >= 128
    N = x.shape[0]
    E = edge_attr.shape[0]
    n_pad = max(_round_up(N, 8), 8)
    e_pad = max(_round_up(E, tile_e), tile_e)       # >= 1 tile even if E == 0
    n_tiles = e_pad // tile_e

    xp = jnp.zeros((n_pad, x.shape[1]), jnp.float32).at[:N, :].set(x)
    twp = jnp.zeros((n_pad, 1), jnp.float32).at[:N, :].set(time_weights)
    eap = jnp.zeros((e_pad, edge_attr.shape[1]), jnp.float32).at[:E, :].set(edge_attr)
    # Padded edges get index -1 -> all-zero one-hot rows (no gather/scatter).
    srcp = jnp.full((e_pad, 1), -1, jnp.int32).at[:E, 0].set(
        edge_index[0].astype(jnp.int32))
    dstp = jnp.full((1, e_pad), -1, jnp.int32).at[0, :E].set(
        edge_index[1].astype(jnp.int32))

    def const2(shape):
        return pl.BlockSpec(shape, lambda p, t: (0, 0))

    in_specs = (
        [pl.BlockSpec((tile_e, 1), lambda p, t: (t, 0)),                 # src (col)
         pl.BlockSpec((1, tile_e), lambda p, t: (0, t)),                 # dst (row)
         pl.BlockSpec((tile_e, edge_attr.shape[1]), lambda p, t: (t, 0)),# edge attrs
         const2((n_pad, x.shape[1])),                                    # x
         const2((n_pad, 1))]                                             # time weights
        + [const2(w.shape) for w in kernel_params])                      # weights

    grid_spec = pltpu.PrefetchScalarGridSpec(
        num_scalar_prefetch=0,
        grid=(2, n_tiles),                         # (pass, edge tile)
        in_specs=in_specs,
        out_specs=pl.BlockSpec((n_pad, num_classes), lambda p, t: (0, 0)),
        scratch_shapes=[
            pltpu.VMEM((n_pad, DIM), jnp.float32),           # h
            pltpu.VMEM((n_pad, 2 * DIM), jnp.float32),       # h@c1Wx / x1@c2Wx slab
            pltpu.VMEM((n_pad, CONVDIM), jnp.float32),       # conv1 acc, reused as x1
            pltpu.VMEM((n_pad, NUM_CLASSES), jnp.float32),   # conv2 accumulator
        ])

    out = pl.pallas_call(
        stgen_kernel,
        out_shape=jax.ShapeDtypeStruct((n_pad, num_classes), jnp.float32),
        grid_spec=grid_spec,
        compiler_params=pltpu.CompilerParams(
            # Both axes carry sequential dependencies (shared scatter
            # accumulators, conv1 -> conv2), so no "parallel" axis here.
            dimension_semantics=("arbitrary", "arbitrary"),
            vmem_limit_bytes=48 * 1024 * 1024),
    )(srcp, dstp, eap, xp, twp, *kernel_params)

    return out[:N]


# ----------------------------------------------------------------------------
# Pure-JAX reference (raw, unfolded parameters; matches the PyTorch forward)
# ----------------------------------------------------------------------------
def stgen_reference(x, edge_index, edge_attr, time_weights, raw):
    (nW1, nb1, nW2, nb2, eW1, eb1, eW2, eb2, tW, tb,
     c1W1, c1b1, c1W2, c1b2, c1W3, c1b3, c1root, c1bias,
     c2W1, c2b1, c2W2, c2b2, c2W3, c2b3, c2root, c2bias,
     bn_scale, bn_shift, fcW, fcb) = raw
    N = x.shape[0]
    src, dst = edge_index[0], edge_index[1]

    h = _leaky(x @ nW1 + nb1) @ nW2 + nb2
    e = _leaky(edge_attr @ eW1 + eb1) @ eW2 + eb2
    h = h * (time_weights @ tW + tb)

    m = jnp.concatenate([h[src], e], axis=1)
    m = _leaky(m @ c1W1 + c1b1)
    m = _leaky(m @ c1W2 + c1b2)
    m = m @ c1W3 + c1b3
    agg = jnp.zeros((N, m.shape[1]), jnp.float32).at[dst].add(m)
    x1 = jnp.maximum(agg + h @ c1root + c1bias, 0.0)
    x1 = x1 * bn_scale + bn_shift            # BatchNorm1d (eval); dropout = id

    m2 = jnp.concatenate([x1[src], e], axis=1)
    m2 = _leaky(m2 @ c2W1 + c2b1)
    m2 = _leaky(m2 @ c2W2 + c2b2)
    m2 = m2 @ c2W3 + c2b3
    agg2 = jnp.zeros((N, m2.shape[1]), jnp.float32).at[dst].add(m2)
    x2 = jnp.maximum(agg2 + x1 @ c2root + c2bias, 0.0)

    logits = jnp.concatenate([x1, x2], axis=1) @ fcW + fcb
    return jax.nn.log_softmax(logits, axis=1)


# ----------------------------------------------------------------------------
if __name__ == "__main__":
    key = jax.random.PRNGKey(0)
    kx, kt, ke, ks, kd, kp = jax.random.split(key, 6)

    N, E = 32, 500
    x = jax.random.normal(kx, (N, INPUT_DIM), jnp.float32)
    time_weights = jax.random.uniform(kt, (N, 1), jnp.float32)
    edge_attr = jax.random.normal(ke, (E, EDGE_DIM), jnp.float32)
    src = jax.random.randint(ks, (E,), 0, N)
    dst = jax.random.randint(kd, (E,), 0, N)
    edge_index = jnp.stack([src, dst], axis=0)

    raw_params = init_params(kp)
    kernel_params = prepare_params(raw_params)

    # tile_e=128 -> 4 edge tiles, exercising the streamed/pipelined edge axis.
    out = stgen_forward(x, edge_index, edge_attr, time_weights, kernel_params,
                        tile_e=128)
    out = jax.block_until_ready(out)

    ref = stgen_reference(x, edge_index, edge_attr, time_weights, raw_params)
    assert out.shape == (N, NUM_CLASSES)
    err = jnp.max(jnp.abs(out - ref))
    assert jnp.allclose(out, ref, atol=1e-2, rtol=1e-2), f"max abs err {err}"

    print("KERNEL_OK")
</pallas_src>

<mosaic_0001>
module attributes {stable_mosaic.version = 11 : i64} {
  func.func @stgen_kernel(%arg0: i32, %arg1: i32, %arg2: memref<128x1xi32, #tpu.memory_space<vmem>>, %arg3: memref<1x128xi32, #tpu.memory_space<vmem>>, %arg4: memref<128x6xf32, #tpu.memory_space<vmem>>, %arg5: memref<32x12xf32, #tpu.memory_space<vmem>>, %arg6: memref<32x1xf32, #tpu.memory_space<vmem>>, %arg7: memref<12x16xf32, #tpu.memory_space<vmem>>, %arg8: memref<1x16xf32, #tpu.memory_space<vmem>>, %arg9: memref<16x16xf32, #tpu.memory_space<vmem>>, %arg10: memref<1x16xf32, #tpu.memory_space<vmem>>, %arg11: memref<6x16xf32, #tpu.memory_space<vmem>>, %arg12: memref<1x16xf32, #tpu.memory_space<vmem>>, %arg13: memref<1x16xf32, #tpu.memory_space<vmem>>, %arg14: memref<1x16xf32, #tpu.memory_space<vmem>>, %arg15: memref<16x32xf32, #tpu.memory_space<vmem>>, %arg16: memref<16x32xf32, #tpu.memory_space<vmem>>, %arg17: memref<1x32xf32, #tpu.memory_space<vmem>>, %arg18: memref<32x32xf32, #tpu.memory_space<vmem>>, %arg19: memref<1x32xf32, #tpu.memory_space<vmem>>, %arg20: memref<32x8xf32, #tpu.memory_space<vmem>>, %arg21: memref<1x8xf32, #tpu.memory_space<vmem>>, %arg22: memref<16x8xf32, #tpu.memory_space<vmem>>, %arg23: memref<1x8xf32, #tpu.memory_space<vmem>>, %arg24: memref<8x32xf32, #tpu.memory_space<vmem>>, %arg25: memref<16x32xf32, #tpu.memory_space<vmem>>, %arg26: memref<1x32xf32, #tpu.memory_space<vmem>>, %arg27: memref<32x24xf32, #tpu.memory_space<vmem>>, %arg28: memref<1x24xf32, #tpu.memory_space<vmem>>, %arg29: memref<24x4xf32, #tpu.memory_space<vmem>>, %arg30: memref<1x4xf32, #tpu.memory_space<vmem>>, %arg31: memref<8x4xf32, #tpu.memory_space<vmem>>, %arg32: memref<1x4xf32, #tpu.memory_space<vmem>>, %arg33: memref<8x4xf32, #tpu.memory_space<vmem>>, %arg34: memref<4x4xf32, #tpu.memory_space<vmem>>, %arg35: memref<1x4xf32, #tpu.memory_space<vmem>>, %arg36: memref<32x4xf32, #tpu.memory_space<vmem>>, %arg37: memref<32x16xf32, #tpu.memory_space<vmem>>, %arg38: memref<32x32xf32, #tpu.memory_space<vmem>>, %arg39: memref<32x8xf32, #tpu.memory_space<vmem>>, %arg40: memref<32x4xf32, #tpu.memory_space<vmem>>) attributes {dimension_semantics = [#tpu.dimension_semantics<arbitrary>, #tpu.dimension_semantics<arbitrary>], iteration_bounds = array<i64: 2, 4>, scalar_prefetch = 0 : i64, scratch_operands = 4 : i64, tpu.core_type = #tpu.core_type<tc>, window_params = [{transform_indices = @transform_0, window_bounds = array<i64: 128, 1>}, {transform_indices = @transform_1, window_bounds = array<i64: 1, 128>}, {transform_indices = @transform_2, window_bounds = array<i64: 128, 6>}, {pipeline_mode = #tpu.pipeline_mode<synchronous>, transform_indices = @transform_3, window_bounds = array<i64: 32, 12>}, {pipeline_mode = #tpu.pipeline_mode<synchronous>, transform_indices = @transform_4, window_bounds = array<i64: 32, 1>}, {pipeline_mode = #tpu.pipeline_mode<synchronous>, transform_indices = @transform_5, window_bounds = array<i64: 12, 16>}, {pipeline_mode = #tpu.pipeline_mode<synchronous>, transform_indices = @transform_6, window_bounds = array<i64: 1, 16>}, {pipeline_mode = #tpu.pipeline_mode<synchronous>, transform_indices = @transform_7, window_bounds = array<i64: 16, 16>}, {pipeline_mode = #tpu.pipeline_mode<synchronous>, transform_indices = @transform_8, window_bounds = array<i64: 1, 16>}, {pipeline_mode = #tpu.pipeline_mode<synchronous>, transform_indices = @transform_9, window_bounds = array<i64: 6, 16>}, {pipeline_mode = #tpu.pipeline_mode<synchronous>, transform_indices = @transform_10, window_bounds = array<i64: 1, 16>}, {pipeline_mode = #tpu.pipeline_mode<synchronous>, transform_indices = @transform_11, window_bounds = array<i64: 1, 16>}, {pipeline_mode = #tpu.pipeline_mode<synchronous>, transform_indices = @transform_12, window_bounds = array<i64: 1, 16>}, {pipeline_mode = #tpu.pipeline_mode<synchronous>, transform_indices = @transform_13, window_bounds = array<i64: 16, 32>}, {pipeline_mode = #tpu.pipeline_mode<synchronous>, transform_indices = @transform_14, window_bounds = array<i64: 16, 32>}, {pipeline_mode = #tpu.pipeline_mode<synchronous>, transform_indices = @transform_15, window_bounds = array<i64: 1, 32>}, {pipeline_mode = #tpu.pipeline_mode<synchronous>, transform_indices = @transform_16, window_bounds = array<i64: 32, 32>}, {pipeline_mode = #tpu.pipeline_mode<synchronous>, transform_indices = @transform_17, window_bounds = array<i64: 1, 32>}, {pipeline_mode = #tpu.pipeline_mode<synchronous>, transform_indices = @transform_18, window_bounds = array<i64: 32, 8>}, {pipeline_mode = #tpu.pipeline_mode<synchronous>, transform_indices = @transform_19, window_bounds = array<i64: 1, 8>}, {pipeline_mode = #tpu.pipeline_mode<synchronous>, transform_indices = @transform_20, window_bounds = array<i64: 16, 8>}, {pipeline_mode = #tpu.pipeline_mode<synchronous>, transform_indices = @transform_21, window_bounds = array<i64: 1, 8>}, {pipeline_mode = #tpu.pipeline_mode<synchronous>, transform_indices = @transform_22, window_bounds = array<i64: 8, 32>}, {pipeline_mode = #tpu.pipeline_mode<synchronous>, transform_indices = @transform_23, window_bounds = array<i64: 16, 32>}, {pipeline_mode = #tpu.pipeline_mode<synchronous>, transform_indices = @transform_24, window_bounds = array<i64: 1, 32>}, {pipeline_mode = #tpu.pipeline_mode<synchronous>, transform_indices = @transform_25, window_bounds = array<i64: 32, 24>}, {pipeline_mode = #tpu.pipeline_mode<synchronous>, transform_indices = @transform_26, window_bounds = array<i64: 1, 24>}, {pipeline_mode = #tpu.pipeline_mode<synchronous>, transform_indices = @transform_27, window_bounds = array<i64: 24, 4>}, {pipeline_mode = #tpu.pipeline_mode<synchronous>, transform_indices = @transform_28, window_bounds = array<i64: 1, 4>}, {pipeline_mode = #tpu.pipeline_mode<synchronous>, transform_indices = @transform_29, window_bounds = array<i64: 8, 4>}, {pipeline_mode = #tpu.pipeline_mode<synchronous>, transform_indices = @transform_30, window_bounds = array<i64: 1, 4>}, {pipeline_mode = #tpu.pipeline_mode<synchronous>, transform_indices = @transform_31, window_bounds = array<i64: 8, 4>}, {pipeline_mode = #tpu.pipeline_mode<synchronous>, transform_indices = @transform_32, window_bounds = array<i64: 4, 4>}, {pipeline_mode = #tpu.pipeline_mode<synchronous>, transform_indices = @transform_33, window_bounds = array<i64: 1, 4>}, {pipeline_mode = #tpu.pipeline_mode<synchronous>, transform_indices = @transform_34, window_bounds = array<i64: 32, 4>}]} {
    %c0_i32 = arith.constant 0 : i32
    %0 = arith.cmpi eq, %arg0, %c0_i32 : i32
    %c0_i32_0 = arith.constant 0 : i32
    %1 = arith.cmpi eq, %arg1, %c0_i32_0 : i32
    %2 = arith.andi %0, %1 : i1
    %3 = arith.extui %2 : i1 to i32
    %c0_i32_1 = arith.constant 0 : i32
    %4 = arith.cmpi ne, %3, %c0_i32_1 : i32
    scf.if %4 {
      %c0_21 = arith.constant 0 : index
      %c0_22 = arith.constant 0 : index
      %44 = vector.load %arg5[%c0_21, %c0_22] : memref<32x12xf32, #tpu.memory_space<vmem>>, vector<32x12xf32>
      %c0_23 = arith.constant 0 : index
      %c0_24 = arith.constant 0 : index
      %45 = vector.load %arg7[%c0_23, %c0_24] : memref<12x16xf32, #tpu.memory_space<vmem>>, vector<12x16xf32>
      %cst_25 = arith.constant dense<0.000000e+00> : vector<32x16xf32>
      %46 = tpu.matmul %44, %45, %cst_25 {dimension_numbers = #tpu.dot_dimension_numbers<[1], [0], [0], [1], [0, 0, 1, 1], [], []>} : vector<32x12xf32>, vector<12x16xf32>, vector<32x16xf32> -> vector<32x16xf32>
      %c0_26 = arith.constant 0 : index
      %c0_27 = arith.constant 0 : index
      %47 = vector.load %arg8[%c0_26, %c0_27] : memref<1x16xf32, #tpu.memory_space<vmem>>, vector<1x16xf32>
      %48 = vector.broadcast %47 : vector<1x16xf32> to vector<32x16xf32>
      %49 = arith.addf %46, %48 : vector<32x16xf32>
      %cst_28 = arith.constant 0.000000e+00 : f32
      %50 = vector.broadcast %cst_28 : f32 to vector<32x16xf32>
      %51 = arith.cmpf oge, %49, %50 : vector<32x16xf32>
      %cst_29 = arith.constant 0.00999999977 : f32
      %52 = vector.broadcast %cst_29 : f32 to vector<32x16xf32>
      %53 = arith.mulf %52, %49 : vector<32x16xf32>
      %54 = arith.select %51, %49, %53 : vector<32x16xi1>, vector<32x16xf32>
      %c0_30 = arith.constant 0 : index
      %c0_31 = arith.constant 0 : index
      %55 = vector.load %arg9[%c0_30, %c0_31] : memref<16x16xf32, #tpu.memory_space<vmem>>, vector<16x16xf32>
      %cst_32 = arith.constant dense<0.000000e+00> : vector<32x16xf32>
      %56 = tpu.matmul %54, %55, %cst_32 {dimension_numbers = #tpu.dot_dimension_numbers<[1], [0], [0], [1], [0, 0, 1, 1], [], []>} : vector<32x16xf32>, vector<16x16xf32>, vector<32x16xf32> -> vector<32x16xf32>
      %c0_33 = arith.constant 0 : index
      %c0_34 = arith.constant 0 : index
      %57 = vector.load %arg10[%c0_33, %c0_34] : memref<1x16xf32, #tpu.memory_space<vmem>>, vector<1x16xf32>
      %58 = vector.broadcast %57 : vector<1x16xf32> to vector<32x16xf32>
      %59 = arith.addf %56, %58 : vector<32x16xf32>
      %c0_35 = arith.constant 0 : index
      %c0_36 = arith.constant 0 : index
      %60 = vector.load %arg6[%c0_35, %c0_36] : memref<32x1xf32, #tpu.memory_space<vmem>>, vector<32x1xf32>
      %c0_37 = arith.constant 0 : index
      %c0_38 = arith.constant 0 : index
      %61 = vector.load %arg13[%c0_37, %c0_38] : memref<1x16xf32, #tpu.memory_space<vmem>>, vector<1x16xf32>
      %62 = vector.broadcast %60 : vector<32x1xf32> to vector<32x16xf32>
      %63 = vector.broadcast %61 : vector<1x16xf32> to vector<32x16xf32>
      %64 = arith.mulf %62, %63 : vector<32x16xf32>
      %c0_39 = arith.constant 0 : index
      %c0_40 = arith.constant 0 : index
      %65 = vector.load %arg14[%c0_39, %c0_40] : memref<1x16xf32, #tpu.memory_space<vmem>>, vector<1x16xf32>
      %66 = vector.broadcast %65 : vector<1x16xf32> to vector<32x16xf32>
      %67 = arith.addf %64, %66 : vector<32x16xf32>
      %68 = arith.mulf %59, %67 : vector<32x16xf32>
      %c0_41 = arith.constant 0 : index
      %c0_42 = arith.constant 0 : index
      %69 = vector.load %arg37[%c0_41, %c0_42] : memref<32x16xf32, #tpu.memory_space<vmem>>, vector<32x16xf32>
      tpu.vector_store %arg37[%c0_41, %c0_42], %68 {strides = array<i32>} : memref<32x16xf32, #tpu.memory_space<vmem>>, vector<32x16xf32>,
      %c0_43 = arith.constant 0 : index
      %c0_44 = arith.constant 0 : index
      %70 = vector.load %arg15[%c0_43, %c0_44] : memref<16x32xf32, #tpu.memory_space<vmem>>, vector<16x32xf32>
      %cst_45 = arith.constant dense<0.000000e+00> : vector<32x32xf32>
      %71 = tpu.matmul %68, %70, %cst_45 {dimension_numbers = #tpu.dot_dimension_numbers<[1], [0], [0], [1], [0, 0, 1, 1], [], []>} : vector<32x16xf32>, vector<16x32xf32>, vector<32x32xf32> -> vector<32x32xf32>
      %c0_46 = arith.constant 0 : index
      %c0_47 = arith.constant 0 : index
      %72 = vector.load %arg38[%c0_46, %c0_47] : memref<32x32xf32, #tpu.memory_space<vmem>>, vector<32x32xf32>
      tpu.vector_store %arg38[%c0_46, %c0_47], %71 {strides = array<i32>} : memref<32x32xf32, #tpu.memory_space<vmem>>, vector<32x32xf32>,
      %cst_48 = arith.constant 0.000000e+00 : f32
      %73 = vector.broadcast %cst_48 : f32 to vector<32x8xf32>
      %c0_49 = arith.constant 0 : index
      %c0_50 = arith.constant 0 : index
      %74 = vector.load %arg39[%c0_49, %c0_50] : memref<32x8xf32, #tpu.memory_space<vmem>>, vector<32x8xf32>
      tpu.vector_store %arg39[%c0_49, %c0_50], %73 {strides = array<i32>} : memref<32x8xf32, #tpu.memory_space<vmem>>, vector<32x8xf32>,
    } else {
    }
    %c1_i32 = arith.constant 1 : i32
    %5 = arith.cmpi eq, %arg0, %c1_i32 : i32
    %c0_i32_2 = arith.constant 0 : i32
    %6 = arith.cmpi eq, %arg1, %c0_i32_2 : i32
    %7 = arith.andi %5, %6 : i1
    %8 = arith.extui %7 : i1 to i32
    %c0_i32_3 = arith.constant 0 : i32
    %9 = arith.cmpi ne, %8, %c0_i32_3 : i32
    scf.if %9 {
      %c0_21 = arith.constant 0 : index
      %c0_22 = arith.constant 0 : index
      %44 = vector.load %arg39[%c0_21, %c0_22] : memref<32x8xf32, #tpu.memory_space<vmem>>, vector<32x8xf32>
      %c0_23 = arith.constant 0 : index
      %c0_24 = arith.constant 0 : index
      %45 = vector.load %arg37[%c0_23, %c0_24] : memref<32x16xf32, #tpu.memory_space<vmem>>, vector<32x16xf32>
      %c0_25 = arith.constant 0 : index
      %c0_26 = arith.constant 0 : index
      %46 = vector.load %arg22[%c0_25, %c0_26] : memref<16x8xf32, #tpu.memory_space<vmem>>, vector<16x8xf32>
      %cst_27 = arith.constant dense<0.000000e+00> : vector<32x8xf32>
      %47 = tpu.matmul %45, %46, %cst_27 {dimension_numbers = #tpu.dot_dimension_numbers<[1], [0], [0], [1], [0, 0, 1, 1], [], []>} : vector<32x16xf32>, vector<16x8xf32>, vector<32x8xf32> -> vector<32x8xf32>
      %48 = arith.addf %44, %47 : vector<32x8xf32>
      %c0_28 = arith.constant 0 : index
      %c0_29 = arith.constant 0 : index
      %49 = vector.load %arg23[%c0_28, %c0_29] : memref<1x8xf32, #tpu.memory_space<vmem>>, vector<1x8xf32>
      %50 = vector.broadcast %49 : vector<1x8xf32> to vector<32x8xf32>
      %51 = arith.addf %48, %50 : vector<32x8xf32>
      %cst_30 = arith.constant 0.000000e+00 : f32
      %52 = vector.broadcast %cst_30 : f32 to vector<32x8xf32>
      %53 = arith.maximumf %51, %52 : vector<32x8xf32>
      %c0_31 = arith.constant 0 : index
      %c0_32 = arith.constant 0 : index
      %54 = vector.load %arg39[%c0_31, %c0_32] : memref<32x8xf32, #tpu.memory_space<vmem>>, vector<32x8xf32>
      tpu.vector_store %arg39[%c0_31, %c0_32], %53 {strides = array<i32>} : memref<32x8xf32, #tpu.memory_space<vmem>>, vector<32x8xf32>,
      %c0_33 = arith.constant 0 : index
      %c0_34 = arith.constant 0 : index
      %55 = vector.load %arg24[%c0_33, %c0_34] : memref<8x32xf32, #tpu.memory_space<vmem>>, vector<8x32xf32>
      %cst_35 = arith.constant dense<0.000000e+00> : vector<32x32xf32>
      %56 = tpu.matmul %53, %55, %cst_35 {dimension_numbers = #tpu.dot_dimension_numbers<[1], [0], [0], [1], [0, 0, 1, 1], [], []>} : vector<32x8xf32>, vector<8x32xf32>, vector<32x32xf32> -> vector<32x32xf32>
      %c0_36 = arith.constant 0 : index
      %c0_37 = arith.constant 0 : index
      %57 = vector.load %arg38[%c0_36, %c0_37] : memref<32x32xf32, #tpu.memory_space<vmem>>, vector<32x32xf32>
      tpu.vector_store %arg38[%c0_36, %c0_37], %56 {strides = array<i32>} : memref<32x32xf32, #tpu.memory_space<vmem>>, vector<32x32xf32>,
      %cst_38 = arith.constant 0.000000e+00 : f32
      %58 = vector.broadcast %cst_38 : f32 to vector<32x4xf32>
      %c0_39 = arith.constant 0 : index
      %c0_40 = arith.constant 0 : index
      %59 = vector.load %arg40[%c0_39, %c0_40] : memref<32x4xf32, #tpu.memory_space<vmem>>, vector<32x4xf32>
      tpu.vector_store %arg40[%c0_39, %c0_40], %58 {strides = array<i32>} : memref<32x4xf32, #tpu.memory_space<vmem>>, vector<32x4xf32>,
    } else {
    }
    %c0 = arith.constant 0 : index
    %c0_4 = arith.constant 0 : index
    %10 = vector.load %arg4[%c0, %c0_4] : memref<128x6xf32, #tpu.memory_space<vmem>>, vector<128x6xf32>
    %c0_5 = arith.constant 0 : index
    %c0_6 = arith.constant 0 : index
    %11 = vector.load %arg11[%c0_5, %c0_6] : memref<6x16xf32, #tpu.memory_space<vmem>>, vector<6x16xf32>
    %cst = arith.constant dense<0.000000e+00> : vector<128x16xf32>
    %12 = tpu.matmul %10, %11, %cst {dimension_numbers = #tpu.dot_dimension_numbers<[1], [0], [0], [1], [0, 0, 1, 1], [], []>} : vector<128x6xf32>, vector<6x16xf32>, vector<128x16xf32> -> vector<128x16xf32>
    %c0_7 = arith.constant 0 : index
    %c0_8 = arith.constant 0 : index
    %13 = vector.load %arg12[%c0_7, %c0_8] : memref<1x16xf32, #tpu.memory_space<vmem>>, vector<1x16xf32>
    %14 = vector.broadcast %13 : vector<1x16xf32> to vector<128x16xf32>
    %15 = arith.addf %12, %14 : vector<128x16xf32>
    %cst_9 = arith.constant 0.000000e+00 : f32
    %16 = vector.broadcast %cst_9 : f32 to vector<128x16xf32>
    %17 = arith.cmpf oge, %15, %16 : vector<128x16xf32>
    %cst_10 = arith.constant 0.00999999977 : f32
    %18 = vector.broadcast %cst_10 : f32 to vector<128x16xf32>
    %19 = arith.mulf %18, %15 : vector<128x16xf32>
    %20 = arith.select %17, %15, %19 : vector<128x16xi1>, vector<128x16xf32>
    %c0_11 = arith.constant 0 : index
    %c0_12 = arith.constant 0 : index
    %21 = vector.load %arg2[%c0_11, %c0_12] : memref<128x1xi32, #tpu.memory_space<vmem>>, vector<128x1xi32>
    %c0_13 = arith.constant 0 : index
    %c0_14 = arith.constant 0 : index
    %22 = vector.load %arg3[%c0_13, %c0_14] : memref<1x128xi32, #tpu.memory_space<vmem>>, vector<1x128xi32>
    %23 = tpu.iota {dimensions = array<i32: 1>} : vector<128x32xi32>
    %24 = vector.broadcast %21 : vector<128x1xi32> to vector<128x32xi32>
    %25 = arith.cmpi eq, %23, %24 : vector<128x32xi32>
    %26 = arith.extui %25 : vector<128x32xi1> to vector<128x32xi32>
    %27 = arith.sitofp %26 : vector<128x32xi32> to vector<128x32xf32>
    %28 = tpu.iota {dimensions = array<i32: 0>} : vector<32x128xi32>
    %29 = vector.broadcast %22 : vector<1x128xi32> to vector<32x128xi32>
    %30 = arith.cmpi eq, %28, %29 : vector<32x128xi32>
    %31 = arith.extui %30 : vector<32x128xi1> to vector<32x128xi32>
    %32 = arith.sitofp %31 : vector<32x128xi32> to vector<32x128xf32>
    %c0_i32_15 = arith.constant 0 : i32
    %33 = arith.cmpi eq, %arg0, %c0_i32_15 : i32
    %34 = arith.extui %33 : i1 to i32
    %c0_i32_16 = arith.constant 0 : i32
    %35 = arith.cmpi ne, %34, %c0_i32_16 : i32
    scf.if %35 {
      %c0_21 = arith.constant 0 : index
      %c0_22 = arith.constant 0 : index
      %44 = vector.load %arg38[%c0_21, %c0_22] : memref<32x32xf32, #tpu.memory_space<vmem>>, vector<32x32xf32>
      %cst_23 = arith.constant dense<0.000000e+00> : vector<128x32xf32>
      %45 = tpu.matmul %27, %44, %cst_23 {dimension_numbers = #tpu.dot_dimension_numbers<[1], [0], [0], [1], [0, 0, 1, 1], [], []>} : vector<128x32xf32>, vector<32x32xf32>, vector<128x32xf32> -> vector<128x32xf32>
      %c0_24 = arith.constant 0 : index
      %c0_25 = arith.constant 0 : index
      %46 = vector.load %arg16[%c0_24, %c0_25] : memref<16x32xf32, #tpu.memory_space<vmem>>, vector<16x32xf32>
      %cst_26 = arith.constant dense<0.000000e+00> : vector<128x32xf32>
      %47 = tpu.matmul %20, %46, %cst_26 {dimension_numbers = #tpu.dot_dimension_numbers<[1], [0], [0], [1], [0, 0, 1, 1], [], []>} : vector<128x16xf32>, vector<16x32xf32>, vector<128x32xf32> -> vector<128x32xf32>
      %48 = arith.addf %45, %47 : vector<128x32xf32>
      %c0_27 = arith.constant 0 : index
      %c0_28 = arith.constant 0 : index
      %49 = vector.load %arg17[%c0_27, %c0_28] : memref<1x32xf32, #tpu.memory_space<vmem>>, vector<1x32xf32>
      %50 = vector.broadcast %49 : vector<1x32xf32> to vector<128x32xf32>
      %51 = arith.addf %48, %50 : vector<128x32xf32>
      %cst_29 = arith.constant 0.000000e+00 : f32
      %52 = vector.broadcast %cst_29 : f32 to vector<128x32xf32>
      %53 = arith.cmpf oge, %51, %52 : vector<128x32xf32>
      %cst_30 = arith.constant 0.00999999977 : f32
      %54 = vector.broadcast %cst_30 : f32 to vector<128x32xf32>
      %55 = arith.mulf %54, %51 : vector<128x32xf32>
      %56 = arith.select %53, %51, %55 : vector<128x32xi1>, vector<128x32xf32>
      %c0_31 = arith.constant 0 : index
      %c0_32 = arith.constant 0 : index
      %57 = vector.load %arg18[%c0_31, %c0_32] : memref<32x32xf32, #tpu.memory_space<vmem>>, vector<32x32xf32>
      %cst_33 = arith.constant dense<0.000000e+00> : vector<128x32xf32>
      %58 = tpu.matmul %56, %57, %cst_33 {dimension_numbers = #tpu.dot_dimension_numbers<[1], [0], [0], [1], [0, 0, 1, 1], [], []>} : vector<128x32xf32>, vector<32x32xf32>, vector<128x32xf32> -> vector<128x32xf32>
      %c0_34 = arith.constant 0 : index
      %c0_35 = arith.constant 0 : index
      %59 = vector.load %arg19[%c0_34, %c0_35] : memref<1x32xf32, #tpu.memory_space<vmem>>, vector<1x32xf32>
      %60 = vector.broadcast %59 : vector<1x32xf32> to vector<128x32xf32>
      %61 = arith.addf %58, %60 : vector<128x32xf32>
      %cst_36 = arith.constant 0.000000e+00 : f32
      %62 = vector.broadcast %cst_36 : f32 to vector<128x32xf32>
      %63 = arith.cmpf oge, %61, %62 : vector<128x32xf32>
      %cst_37 = arith.constant 0.00999999977 : f32
      %64 = vector.broadcast %cst_37 : f32 to vector<128x32xf32>
      %65 = arith.mulf %64, %61 : vector<128x32xf32>
      %66 = arith.select %63, %61, %65 : vector<128x32xi1>, vector<128x32xf32>
      %c0_38 = arith.constant 0 : index
      %c0_39 = arith.constant 0 : index
      %67 = vector.load %arg20[%c0_38, %c0_39] : memref<32x8xf32, #tpu.memory_space<vmem>>, vector<32x8xf32>
      %cst_40 = arith.constant dense<0.000000e+00> : vector<128x8xf32>
      %68 = tpu.matmul %66, %67, %cst_40 {dimension_numbers = #tpu.dot_dimension_numbers<[1], [0], [0], [1], [0, 0, 1, 1], [], []>} : vector<128x32xf32>, vector<32x8xf32>, vector<128x8xf32> -> vector<128x8xf32>
      %c0_41 = arith.constant 0 : index
      %c0_42 = arith.constant 0 : index
      %69 = vector.load %arg21[%c0_41, %c0_42] : memref<1x8xf32, #tpu.memory_space<vmem>>, vector<1x8xf32>
      %70 = vector.broadcast %69 : vector<1x8xf32> to vector<128x8xf32>
      %71 = arith.addf %68, %70 : vector<128x8xf32>
      %c0_43 = arith.constant 0 : index
      %c0_44 = arith.constant 0 : index
      %72 = vector.load %arg39[%c0_43, %c0_44] : memref<32x8xf32, #tpu.memory_space<vmem>>, vector<32x8xf32>
      %cst_45 = arith.constant dense<0.000000e+00> : vector<32x8xf32>
      %73 = tpu.matmul %32, %71, %cst_45 {dimension_numbers = #tpu.dot_dimension_numbers<[1], [0], [0], [1], [0, 0, 1, 1], [], []>} : vector<32x128xf32>, vector<128x8xf32>, vector<32x8xf32> -> vector<32x8xf32>
      %74 = arith.addf %72, %73 : vector<32x8xf32>
      %c0_46 = arith.constant 0 : index
      %c0_47 = arith.constant 0 : index
      %75 = vector.load %arg39[%c0_46, %c0_47] : memref<32x8xf32, #tpu.memory_space<vmem>>, vector<32x8xf32>
      tpu.vector_store %arg39[%c0_46, %c0_47], %74 {strides = array<i32>} : memref<32x8xf32, #tpu.memory_space<vmem>>, vector<32x8xf32>,
    } else {
    }
    %c1_i32_17 = arith.constant 1 : i32
    %36 = arith.cmpi eq, %arg0, %c1_i32_17 : i32
    %37 = arith.extui %36 : i1 to i32
    %c0_i32_18 = arith.constant 0 : i32
    %38 = arith.cmpi ne, %37, %c0_i32_18 : i32
    scf.if %38 {
      %c0_21 = arith.constant 0 : index
      %c0_22 = arith.constant 0 : index
      %44 = vector.load %arg38[%c0_21, %c0_22] : memref<32x32xf32, #tpu.memory_space<vmem>>, vector<32x32xf32>
      %cst_23 = arith.constant dense<0.000000e+00> : vector<128x32xf32>
      %45 = tpu.matmul %27, %44, %cst_23 {dimension_numbers = #tpu.dot_dimension_numbers<[1], [0], [0], [1], [0, 0, 1, 1], [], []>} : vector<128x32xf32>, vector<32x32xf32>, vector<128x32xf32> -> vector<128x32xf32>
      %c0_24 = arith.constant 0 : index
      %c0_25 = arith.constant 0 : index
      %46 = vector.load %arg25[%c0_24, %c0_25] : memref<16x32xf32, #tpu.memory_space<vmem>>, vector<16x32xf32>
      %cst_26 = arith.constant dense<0.000000e+00> : vector<128x32xf32>
      %47 = tpu.matmul %20, %46, %cst_26 {dimension_numbers = #tpu.dot_dimension_numbers<[1], [0], [0], [1], [0, 0, 1, 1], [], []>} : vector<128x16xf32>, vector<16x32xf32>, vector<128x32xf32> -> vector<128x32xf32>
      %48 = arith.addf %45, %47 : vector<128x32xf32>
      %c0_27 = arith.constant 0 : index
      %c0_28 = arith.constant 0 : index
      %49 = vector.load %arg26[%c0_27, %c0_28] : memref<1x32xf32, #tpu.memory_space<vmem>>, vector<1x32xf32>
      %50 = vector.broadcast %49 : vector<1x32xf32> to vector<128x32xf32>
      %51 = arith.addf %48, %50 : vector<128x32xf32>
      %cst_29 = arith.constant 0.000000e+00 : f32
      %52 = vector.broadcast %cst_29 : f32 to vector<128x32xf32>
      %53 = arith.cmpf oge, %51, %52 : vector<128x32xf32>
      %cst_30 = arith.constant 0.00999999977 : f32
      %54 = vector.broadcast %cst_30 : f32 to vector<128x32xf32>
      %55 = arith.mulf %54, %51 : vector<128x32xf32>
      %56 = arith.select %53, %51, %55 : vector<128x32xi1>, vector<128x32xf32>
      %c0_31 = arith.constant 0 : index
      %c0_32 = arith.constant 0 : index
      %57 = vector.load %arg27[%c0_31, %c0_32] : memref<32x24xf32, #tpu.memory_space<vmem>>, vector<32x24xf32>
      %cst_33 = arith.constant dense<0.000000e+00> : vector<128x24xf32>
      %58 = tpu.matmul %56, %57, %cst_33 {dimension_numbers = #tpu.dot_dimension_numbers<[1], [0], [0], [1], [0, 0, 1, 1], [], []>} : vector<128x32xf32>, vector<32x24xf32>, vector<128x24xf32> -> vector<128x24xf32>
      %c0_34 = arith.constant 0 : index
      %c0_35 = arith.constant 0 : index
      %59 = vector.load %arg28[%c0_34, %c0_35] : memref<1x24xf32, #tpu.memory_space<vmem>>, vector<1x24xf32>
      %60 = vector.broadcast %59 : vector<1x24xf32> to vector<128x24xf32>
      %61 = arith.addf %58, %60 : vector<128x24xf32>
      %cst_36 = arith.constant 0.000000e+00 : f32
      %62 = vector.broadcast %cst_36 : f32 to vector<128x24xf32>
      %63 = arith.cmpf oge, %61, %62 : vector<128x24xf32>
      %cst_37 = arith.constant 0.00999999977 : f32
      %64 = vector.broadcast %cst_37 : f32 to vector<128x24xf32>
      %65 = arith.mulf %64, %61 : vector<128x24xf32>
      %66 = arith.select %63, %61, %65 : vector<128x24xi1>, vector<128x24xf32>
      %c0_38 = arith.constant 0 : index
      %c0_39 = arith.constant 0 : index
      %67 = vector.load %arg29[%c0_38, %c0_39] : memref<24x4xf32, #tpu.memory_space<vmem>>, vector<24x4xf32>
      %cst_40 = arith.constant dense<0.000000e+00> : vector<128x4xf32>
      %68 = tpu.matmul %66, %67, %cst_40 {dimension_numbers = #tpu.dot_dimension_numbers<[1], [0], [0], [1], [0, 0, 1, 1], [], []>} : vector<128x24xf32>, vector<24x4xf32>, vector<128x4xf32> -> vector<128x4xf32>
      %c0_41 = arith.constant 0 : index
      %c0_42 = arith.constant 0 : index
      %69 = vector.load %arg30[%c0_41, %c0_42] : memref<1x4xf32, #tpu.memory_space<vmem>>, vector<1x4xf32>
      %70 = vector.broadcast %69 : vector<1x4xf32> to vector<128x4xf32>
      %71 = arith.addf %68, %70 : vector<128x4xf32>
      %c0_43 = arith.constant 0 : index
      %c0_44 = arith.constant 0 : index
      %72 = vector.load %arg40[%c0_43, %c0_44] : memref<32x4xf32, #tpu.memory_space<vmem>>, vector<32x4xf32>
      %cst_45 = arith.constant dense<0.000000e+00> : vector<32x4xf32>
      %73 = tpu.matmul %32, %71, %cst_45 {dimension_numbers = #tpu.dot_dimension_numbers<[1], [0], [0], [1], [0, 0, 1, 1], [], []>} : vector<32x128xf32>, vector<128x4xf32>, vector<32x4xf32> -> vector<32x4xf32>
      %74 = arith.addf %72, %73 : vector<32x4xf32>
      %c0_46 = arith.constant 0 : index
      %c0_47 = arith.constant 0 : index
      %75 = vector.load %arg40[%c0_46, %c0_47] : memref<32x4xf32, #tpu.memory_space<vmem>>, vector<32x4xf32>
      tpu.vector_store %arg40[%c0_46, %c0_47], %74 {strides = array<i32>} : memref<32x4xf32, #tpu.memory_space<vmem>>, vector<32x4xf32>,
    } else {
    }
    %c1_i32_19 = arith.constant 1 : i32
    %39 = arith.cmpi eq, %arg0, %c1_i32_19 : i32
    %c3_i32 = arith.constant 3 : i32
    %40 = arith.cmpi eq, %arg1, %c3_i32 : i32
    %41 = arith.andi %39, %40 : i1
    %42 = arith.extui %41 : i1 to i32
    %c0_i32_20 = arith.constant 0 : i32
    %43 = arith.cmpi ne, %42, %c0_i32_20 : i32
    scf.if %43 {
      %c0_21 = arith.constant 0 : index
      %c0_22 = arith.constant 0 : index
      %44 = vector.load %arg39[%c0_21, %c0_22] : memref<32x8xf32, #tpu.memory_space<vmem>>, vector<32x8xf32>
      %c0_23 = arith.constant 0 : index
      %c0_24 = arith.constant 0 : index
      %45 = vector.load %arg40[%c0_23, %c0_24] : memref<32x4xf32, #tpu.memory_space<vmem>>, vector<32x4xf32>
      %c0_25 = arith.constant 0 : index
      %c0_26 = arith.constant 0 : index
      %46 = vector.load %arg31[%c0_25, %c0_26] : memref<8x4xf32, #tpu.memory_space<vmem>>, vector<8x4xf32>
      %cst_27 = arith.constant dense<0.000000e+00> : vector<32x4xf32>
      %47 = tpu.matmul %44, %46, %cst_27 {dimension_numbers = #tpu.dot_dimension_numbers<[1], [0], [0], [1], [0, 0, 1, 1], [], []>} : vector<32x8xf32>, vector<8x4xf32>, vector<32x4xf32> -> vector<32x4xf32>
      %48 = arith.addf %45, %47 : vector<32x4xf32>
      %c0_28 = arith.constant 0 : index
      %c0_29 = arith.constant 0 : index
      %49 = vector.load %arg32[%c0_28, %c0_29] : memref<1x4xf32, #tpu.memory_space<vmem>>, vector<1x4xf32>
      %50 = vector.broadcast %49 : vector<1x4xf32> to vector<32x4xf32>
      %51 = arith.addf %48, %50 : vector<32x4xf32>
      %cst_30 = arith.constant 0.000000e+00 : f32
      %52 = vector.broadcast %cst_30 : f32 to vector<32x4xf32>
      %53 = arith.maximumf %51, %52 : vector<32x4xf32>
      %c0_31 = arith.constant 0 : index
      %c0_32 = arith.constant 0 : index
      %54 = vector.load %arg33[%c0_31, %c0_32] : memref<8x4xf32, #tpu.memory_space<vmem>>, vector<8x4xf32>
      %cst_33 = arith.constant dense<0.000000e+00> : vector<32x4xf32>
      %55 = tpu.matmul %44, %54, %cst_33 {dimension_numbers = #tpu.dot_dimension_numbers<[1], [0], [0], [1], [0, 0, 1, 1], [], []>} : vector<32x8xf32>, vector<8x4xf32>, vector<32x4xf32> -> vector<32x4xf32>
      %c0_34 = arith.constant 0 : index
      %c0_35 = arith.constant 0 : index
      %56 = vector.load %arg34[%c0_34, %c0_35] : memref<4x4xf32, #tpu.memory_space<vmem>>, vector<4x4xf32>
      %cst_36 = arith.constant dense<0.000000e+00> : vector<32x4xf32>
      %57 = tpu.matmul %53, %56, %cst_36 {dimension_numbers = #tpu.dot_dimension_numbers<[1], [0], [0], [1], [0, 0, 1, 1], [], []>} : vector<32x4xf32>, vector<4x4xf32>, vector<32x4xf32> -> vector<32x4xf32>
      %58 = arith.addf %55, %57 : vector<32x4xf32>
      %c0_37 = arith.constant 0 : index
      %c0_38 = arith.constant 0 : index
      %59 = vector.load %arg35[%c0_37, %c0_38] : memref<1x4xf32, #tpu.memory_space<vmem>>, vector<1x4xf32>
      %60 = vector.broadcast %59 : vector<1x4xf32> to vector<32x4xf32>
      %61 = arith.addf %58, %60 : vector<32x4xf32>
      %cst_39 = arith.constant dense<0xFF800000> : vector<32xf32>
      %62 = vector.multi_reduction <maximumf>, %61, %cst_39 [1] : vector<32x4xf32> to vector<32xf32>
      %63 = vector.shape_cast %62 : vector<32xf32> to vector<32x1xf32>
      %64 = vector.broadcast %63 : vector<32x1xf32> to vector<32x4xf32>
      %65 = arith.subf %61, %64 : vector<32x4xf32>
      %66 = math.exp %65 : vector<32x4xf32>
      %cst_40 = arith.constant dense<0.000000e+00> : vector<32xf32>
      %67 = vector.multi_reduction <add>, %66, %cst_40 [1] : vector<32x4xf32> to vector<32xf32>
      %68 = vector.shape_cast %67 : vector<32xf32> to vector<32x1xf32>
      %69 = math.log %68 : vector<32x1xf32>
      %70 = arith.addf %69, %63 : vector<32x1xf32>
      %71 = vector.broadcast %70 : vector<32x1xf32> to vector<32x4xf32>
      %72 = arith.subf %61, %71 : vector<32x4xf32>
      %c0_41 = arith.constant 0 : index
      %c0_42 = arith.constant 0 : index
      %73 = vector.load %arg36[%c0_41, %c0_42] : memref<32x4xf32, #tpu.memory_space<vmem>>, vector<32x4xf32>
      tpu.vector_store %arg36[%c0_41, %c0_42], %72 {strides = array<i32>} : memref<32x4xf32, #tpu.memory_space<vmem>>, vector<32x4xf32>,
    } else {
    }
    return
  }
  func.func @transform_0(%arg0: i32, %arg1: i32) -> (i32, i32) {
    %c0_i32 = arith.constant 0 : i32
    %c0_i32_0 = arith.constant 0 : i32
    return %arg1, %c0_i32 : i32, i32
  }
  func.func @transform_1(%arg0: i32, %arg1: i32) -> (i32, i32) {
    %c0_i32 = arith.constant 0 : i32
    %c0_i32_0 = arith.constant 0 : i32
    return %c0_i32, %arg1 : i32, i32
  }
  func.func @transform_2(%arg0: i32, %arg1: i32) -> (i32, i32) {
    %c0_i32 = arith.constant 0 : i32
    %c0_i32_0 = arith.constant 0 : i32
    return %arg1, %c0_i32 : i32, i32
  }
  func.func @transform_3(%arg0: i32, %arg1: i32) -> (i32, i32) {
    %c0_i32 = arith.constant 0 : i32
    %c0_i32_0 = arith.constant 0 : i32
    %c0_i32_1 = arith.constant 0 : i32
    return %c0_i32, %c0_i32_0 : i32, i32
  }
  func.func @transform_4(%arg0: i32, %arg1: i32) -> (i32, i32) {
    %c0_i32 = arith.constant 0 : i32
    %c0_i32_0 = arith.constant 0 : i32
    %c0_i32_1 = arith.constant 0 : i32
    return %c0_i32, %c0_i32_0 : i32, i32
  }
  func.func @transform_5(%arg0: i32, %arg1: i32) -> (i32, i32) {
    %c0_i32 = arith.constant 0 : i32
    %c0_i32_0 = arith.constant 0 : i32
    %c0_i32_1 = arith.constant 0 : i32
    return %c0_i32, %c0_i32_0 : i32, i32
  }
  func.func @transform_6(%arg0: i32, %arg1: i32) -> (i32, i32) {
    %c0_i32 = arith.constant 0 : i32
    %c0_i32_0 = arith.constant 0 : i32
    %c0_i32_1 = arith.constant 0 : i32
    return %c0_i32, %c0_i32_0 : i32, i32
  }
  func.func @transform_7(%arg0: i32, %arg1: i32) -> (i32, i32) {
    %c0_i32 = arith.constant 0 : i32
    %c0_i32_0 = arith.constant 0 : i32
    %c0_i32_1 = arith.constant 0 : i32
    return %c0_i32, %c0_i32_0 : i32, i32
  }
  func.func @transform_8(%arg0: i32, %arg1: i32) -> (i32, i32) {
    %c0_i32 = arith.constant 0 : i32
    %c0_i32_0 = arith.constant 0 : i32
    %c0_i32_1 = arith.constant 0 : i32
    return %c0_i32, %c0_i32_0 : i32, i32
  }
  func.func @transform_9(%arg0: i32, %arg1: i32) -> (i32, i32) {
    %c0_i32 = arith.constant 0 : i32
    %c0_i32_0 = arith.constant 0 : i32
    %c0_i32_1 = arith.constant 0 : i32
    return %c0_i32, %c0_i32_0 : i32, i32
  }
  func.func @transform_10(%arg0: i32, %arg1: i32) -> (i32, i32) {
    %c0_i32 = arith.constant 0 : i32
    %c0_i32_0 = arith.constant 0 : i32
    %c0_i32_1 = arith.constant 0 : i32
    return %c0_i32, %c0_i32_0 : i32, i32
  }
  func.func @transform_11(%arg0: i32, %arg1: i32) -> (i32, i32) {
    %c0_i32 = arith.constant 0 : i32
    %c0_i32_0 = arith.constant 0 : i32
    %c0_i32_1 = arith.constant 0 : i32
    return %c0_i32, %c0_i32_0 : i32, i32
  }
  func.func @transform_12(%arg0: i32, %arg1: i32) -> (i32, i32) {
    %c0_i32 = arith.constant 0 : i32
    %c0_i32_0 = arith.constant 0 : i32
    %c0_i32_1 = arith.constant 0 : i32
    return %c0_i32, %c0_i32_0 : i32, i32
  }
  func.func @transform_13(%arg0: i32, %arg1: i32) -> (i32, i32) {
    %c0_i32 = arith.constant 0 : i32
    %c0_i32_0 = arith.constant 0 : i32
    %c0_i32_1 = arith.constant 0 : i32
    return %c0_i32, %c0_i32_0 : i32, i32
  }
  func.func @transform_14(%arg0: i32, %arg1: i32) -> (i32, i32) {
    %c0_i32 = arith.constant 0 : i32
    %c0_i32_0 = arith.constant 0 : i32
    %c0_i32_1 = arith.constant 0 : i32
    return %c0_i32, %c0_i32_0 : i32, i32
  }
  func.func @transform_15(%arg0: i32, %arg1: i32) -> (i32, i32) {
    %c0_i32 = arith.constant 0 : i32
    %c0_i32_0 = arith.constant 0 : i32
    %c0_i32_1 = arith.constant 0 : i32
    return %c0_i32, %c0_i32_0 : i32, i32
  }
  func.func @transform_16(%arg0: i32, %arg1: i32) -> (i32, i32) {
    %c0_i32 = arith.constant 0 : i32
    %c0_i32_0 = arith.constant 0 : i32
    %c0_i32_1 = arith.constant 0 : i32
    return %c0_i32, %c0_i32_0 : i32, i32
  }
  func.func @transform_17(%arg0: i32, %arg1: i32) -> (i32, i32) {
    %c0_i32 = arith.constant 0 : i32
    %c0_i32_0 = arith.constant 0 : i32
    %c0_i32_1 = arith.constant 0 : i32
    return %c0_i32, %c0_i32_0 : i32, i32
  }
  func.func @transform_18(%arg0: i32, %arg1: i32) -> (i32, i32) {
    %c0_i32 = arith.constant 0 : i32
    %c0_i32_0 = arith.constant 0 : i32
    %c0_i32_1 = arith.constant 0 : i32
    return %c0_i32, %c0_i32_0 : i32, i32
  }
  func.func @transform_19(%arg0: i32, %arg1: i32) -> (i32, i32) {
    %c0_i32 = arith.constant 0 : i32
    %c0_i32_0 = arith.constant 0 : i32
    %c0_i32_1 = arith.constant 0 : i32
    return %c0_i32, %c0_i32_0 : i32, i32
  }
  func.func @transform_20(%arg0: i32, %arg1: i32) -> (i32, i32) {
    %c0_i32 = arith.constant 0 : i32
    %c0_i32_0 = arith.constant 0 : i32
    %c0_i32_1 = arith.constant 0 : i32
    return %c0_i32, %c0_i32_0 : i32, i32
  }
  func.func @transform_21(%arg0: i32, %arg1: i32) -> (i32, i32) {
    %c0_i32 = arith.constant 0 : i32
    %c0_i32_0 = arith.constant 0 : i32
    %c0_i32_1 = arith.constant 0 : i32
    return %c0_i32, %c0_i32_0 : i32, i32
  }
  func.func @transform_22(%arg0: i32, %arg1: i32) -> (i32, i32) {
    %c0_i32 = arith.constant 0 : i32
    %c0_i32_0 = arith.constant 0 : i32
    %c0_i32_1 = arith.constant 0 : i32
    return %c0_i32, %c0_i32_0 : i32, i32
  }
  func.func @transform_23(%arg0: i32, %arg1: i32) -> (i32, i32) {
    %c0_i32 = arith.constant 0 : i32
    %c0_i32_0 = arith.constant 0 : i32
    %c0_i32_1 = arith.constant 0 : i32
    return %c0_i32, %c0_i32_0 : i32, i32
  }
  func.func @transform_24(%arg0: i32, %arg1: i32) -> (i32, i32) {
    %c0_i32 = arith.constant 0 : i32
    %c0_i32_0 = arith.constant 0 : i32
    %c0_i32_1 = arith.constant 0 : i32
    return %c0_i32, %c0_i32_0 : i32, i32
  }
  func.func @transform_25(%arg0: i32, %arg1: i32) -> (i32, i32) {
    %c0_i32 = arith.constant 0 : i32
    %c0_i32_0 = arith.constant 0 : i32
    %c0_i32_1 = arith.constant 0 : i32
    return %c0_i32, %c0_i32_0 : i32, i32
  }
  func.func @transform_26(%arg0: i32, %arg1: i32) -> (i32, i32) {
    %c0_i32 = arith.constant 0 : i32
    %c0_i32_0 = arith.constant 0 : i32
    %c0_i32_1 = arith.constant 0 : i32
    return %c0_i32, %c0_i32_0 : i32, i32
  }
  func.func @transform_27(%arg0: i32, %arg1: i32) -> (i32, i32) {
    %c0_i32 = arith.constant 0 : i32
    %c0_i32_0 = arith.constant 0 : i32
    %c0_i32_1 = arith.constant 0 : i32
    return %c0_i32, %c0_i32_0 : i32, i32
  }
  func.func @transform_28(%arg0: i32, %arg1: i32) -> (i32, i32) {
    %c0_i32 = arith.constant 0 : i32
    %c0_i32_0 = arith.constant 0 : i32
    %c0_i32_1 = arith.constant 0 : i32
    return %c0_i32, %c0_i32_0 : i32, i32
  }
  func.func @transform_29(%arg0: i32, %arg1: i32) -> (i32, i32) {
    %c0_i32 = arith.constant 0 : i32
    %c0_i32_0 = arith.constant 0 : i32
    %c0_i32_1 = arith.constant 0 : i32
    return %c0_i32, %c0_i32_0 : i32, i32
  }
  func.func @transform_30(%arg0: i32, %arg1: i32) -> (i32, i32) {
    %c0_i32 = arith.constant 0 : i32
    %c0_i32_0 = arith.constant 0 : i32
    %c0_i32_1 = arith.constant 0 : i32
    return %c0_i32, %c0_i32_0 : i32, i32
  }
  func.func @transform_31(%arg0: i32, %arg1: i32) -> (i32, i32) {
    %c0_i32 = arith.constant 0 : i32
    %c0_i32_0 = arith.constant 0 : i32
    %c0_i32_1 = arith.constant 0 : i32
    return %c0_i32, %c0_i32_0 : i32, i32
  }
  func.func @transform_32(%arg0: i32, %arg1: i32) -> (i32, i32) {
    %c0_i32 = arith.constant 0 : i32
    %c0_i32_0 = arith.constant 0 : i32
    %c0_i32_1 = arith.constant 0 : i32
    return %c0_i32, %c0_i32_0 : i32, i32
  }
  func.func @transform_33(%arg0: i32, %arg1: i32) -> (i32, i32) {
    %c0_i32 = arith.constant 0 : i32
    %c0_i32_0 = arith.constant 0 : i32
    %c0_i32_1 = arith.constant 0 : i32
    return %c0_i32, %c0_i32_0 : i32, i32
  }
  func.func @transform_34(%arg0: i32, %arg1: i32) -> (i32, i32) {
    %c0_i32 = arith.constant 0 : i32
    %c0_i32_0 = arith.constant 0 : i32
    %c0_i32_1 = arith.constant 0 : i32
    return %c0_i32, %c0_i32_0 : i32, i32
  }
}

</mosaic_0001>

<bundles_post_ra>
// kernel: stgen_forward.1
= control target key start
LH: loop header
LB: loop body
LE: loop exit
PB: predicated region body
PF: predicated region fallthrough
CT: control target
= control target key end

     0   :  { %s5885_s6 = smov 1   ;;  %s5886_s10 = smov 2   ;;  %s6744_s0 = inlined_call_operand.smem [shape: u32[35], index: -1, kind: input, shape index: {}] }
   0x1   :  { %s5935_s5 = sld [smem:[%s6744_s0]]   ;;  %s5887_s14 = smov 3  }
   0x2   :  { %s5940_s9 = sld [smem:[%s6744_s0 + %s5885_s6]]   ;;  %s5888_s18 = smov 4  }
   0x3   :  { %s5945_s13 = sld [smem:[%s6744_s0 + %s5886_s10]]   ;;  %s5889_s22 = smov 5  }
   0x4   :  { %s5950_s17 = sld [smem:[%s6744_s0 + %s5887_s14]]   ;;  %s5890_s26 = smov 6  }
   0x5   :  { %s5955_s21 = sld [smem:[%s6744_s0 + %s5888_s18]]   ;;  %s5891_s30 = smov 7  }
   0x6   :  { %s5960_s25 = sld [smem:[%s6744_s0 + %s5889_s22]]   ;;  %s5892_s4 = smov 8  }
   0x7   :  { %s5965_s29 = sld [smem:[%s6744_s0 + %s5890_s26]]   ;;  %s5893_s10 = smov 9  }
   0x8   :  { %s5970_s3 = sld [smem:[%s6744_s0 + %s5891_s30]]   ;;  %s5894_s15 = smov 10  }
   0x9   :  { %s5975_s8 = sld [smem:[%s6744_s0 + %s5892_s4]]   ;;  %s5895_s20 = smov 11  }
   0xa   :  { %s5980_s14 = sld [smem:[%s6744_s0 + %s5893_s10]]   ;;  %s5896_s26 = smov 12  }
   0xb   :  { %s5985_s19 = sld [smem:[%s6744_s0 + %s5894_s15]]   ;;  %s5897_s1 = smov 13  }
   0xc   :  { %s5990_s24 = sld [smem:[%s6744_s0 + %s5895_s20]]   ;;  %s5898_s7 = smov 14  }
   0xd   :  { %s5995_s30 = sld [smem:[%s6744_s0 + %s5896_s26]]   ;;  %s5899_s15 = smov 15  }
   0xe   :  { %s6000_s6 = sld [smem:[%s6744_s0 + %s5897_s1]]   ;;  %s5900_s22 = smov 16  }
   0xf   :  { %s6005_s12 = sld [smem:[%s6744_s0 + %s5898_s7]]   ;;  %s5901_s28 = smov 17  }
  0x10   :  { %6753 = sst [smem:[#allocation6_spill]] %s5980_s14  ;;  %s5902_s7 = smov 18  }
  0x11   :  { %6754 = sst [smem:[#allocation7_spill]] %s5985_s19  ;;  %s6109_s16 = smov 0  }
  0x12   :  { %s6010_s20 = sld [smem:[%s6744_s0 + %s5899_s15]]   ;;  %s5903_s15 = smov 19  }
  0x13   :  { %s6015_s27 = sld [smem:[%s6744_s0 + %s5900_s22]]   ;;  %s5904_s22 = smov 20  }
  0x14   :  { %s6020_s4 = sld [smem:[%s6744_s0 + %s5901_s28]]   ;;  %s5905_s28 = smov 21  }
  0x15   :  { %6755 = sst [smem:[#allocation8_spill]] %s6005_s12  ;;  %s6111_s18 = smov 0  }
  0x16   :  { %s6025_s12 = sld [smem:[%s6744_s0 + %s5902_s7]]   ;;  %s5906_s7 = smov 22  }
  0x17   :  { %s6115_s23 = smov 0  }
  0x18   :  { %6756 = sst [smem:[#allocation9_spill]] %s6010_s20 }
  0x19   :  { %6757 = sst [smem:[#allocation10_spill]] %s6015_s27 }
  0x1a   :  { %6758 = sst [smem:[#allocation11_spill]] %s6020_s4 }
  0x1b   :  { %s6030_s20 = sld [smem:[%s6744_s0 + %s5903_s15]]   ;;  %s5907_s15 = smov 23  }
  0x1c   :  { %6759 = sst [smem:[#allocation12_spill]] %s6025_s12 }
  0x1d   :  { %s6035_s27 = sld [smem:[%s6744_s0 + %s5904_s22]]   ;;  %s5908_s22 = smov 24  }
  0x1e   :  { %s6040_s4 = sld [smem:[%s6744_s0 + %s5905_s28]]   ;;  %s5909_s28 = smov 25  }
  0x1f   :  { %s6045_s12 = sld [smem:[%s6744_s0 + %s5906_s7]]   ;;  %s5910_s7 = smov 26  }
  0x20   :  { %s6055_s19 = sld [smem:[%s6744_s0 + %s5908_s22]]   ;;  %s5912_s22 = smov 28  }
  0x21   :  { %6760 = sst [smem:[#allocation13_spill]] %s6030_s20 }
  0x22   :  { %s6050_s20 = sld [smem:[%s6744_s0 + %s5907_s15]]   ;;  %s5911_s15 = smov 27  }
  0x23   :  { %s6060_s14 = sld [smem:[%s6744_s0 + %s5909_s28]]   ;;  %s5913_s28 = smov 29  }
  0x24   :  { %6761 = sst [smem:[#allocation14_spill]] %s6040_s4 }
  0x25   :  { %s6065_s4 = sld [smem:[%s6744_s0 + %s5910_s7]]   ;;  %s5914_s7 = smov 30  }
  0x26   :  { %6763 = sst [smem:[#allocation16_spill]] %s6055_s19 }
  0x27   :  { %s6075_s19 = sld [smem:[%s6744_s0 + %s5912_s22]]   ;;  %s5916_s22 = smov 32  }
  0x28   :  { %6762 = sst [smem:[#allocation15_spill]] %s6050_s20 }
  0x29   :  { %6764 = sst [smem:[#allocation17_spill]] %s6060_s14 }
  0x2a   :  { %s6070_s20 = sld [smem:[%s6744_s0 + %s5911_s15]]   ;;  %s5915_s15 = smov 31  }
  0x2b   :  { %6765 = sst [smem:[#allocation18_spill]] %s6065_s4 }
  0x2c   :  { %s6080_s14 = sld [smem:[%s6744_s0 + %s5913_s28]]   ;;  %s5917_s28 = smov 33  }
  0x2d   :  { %6767 = sst [smem:[#allocation20_spill]] %s6075_s19 }
  0x2e   :  { %s6085_s4 = sld [smem:[%s6744_s0 + %s5914_s7]]   ;;  %s5918_s7 = smov 34  }
  0x2f   :  { %s6095_s19 = sld [smem:[%s6744_s0 + %s5916_s22]]   ;;  %s6113_s22 = smov 0  }
  0x30   :  { %6766 = sst [smem:[#allocation19_spill]] %s6070_s20 }
  0x31   :  { %s6090_s20 = sld [smem:[%s6744_s0 + %s5915_s15]]   ;;  %s6107_s15 = smov 0  }
  0x32   :  { %6768 = sst [smem:[#allocation21_spill]] %s6080_s14 }
  0x33   :  { %s6100_s14 = sld [smem:[%s6744_s0 + %s5917_s28]]  }
  0x34   :  { %6769 = sst [smem:[#allocation22_spill]] %s6085_s4 }
  0x35   :  { %s6105_s4 = sld [smem:[%s6744_s0 + %s5918_s7]]  }
  0x36 LB: > { %s88_s0 = sadd.s32 1, %s5875_s18  ;;  %s91_s26 = sadd.s32 1, %s5879_s22  ;;  %s5883_s23 = sphi %s6115_s23, %s79_s23   ;;  %s5879_s22 = sphi %s6113_s22, %s6790_s22   ;;  %s5875_s18 = sphi %s6111_s18, %s6789_s18   ;;  %s5871_s16 = sphi %s6109_s16, %s6788_s16   ;;  %s5867_s15 = sphi %s6107_s15, %s6787_s15  }
  0x37   : > { %p89_p0 = scmp.ge.s32.totalorder %s88_s0, 4  ;;  %p4660_p1 = scmp.ge.s32.totalorder %s5883_s23, 1 }
  0x38   : > { %p974_p2 = scmp.lt.s32.totalorder %s5883_s23, 9 }
  0x39   : > { %s6792_s0 = smov (%p89_p0, %s88_s0), 0  ;;  %s6794_s26 = smov (!%p89_p0, %s91_s26), %s5879_s22 }
  0x3a   : > { %p975_p3 = pnand %p4660_p1, %p974_p2  ;;  %p93_p4 = scmp.ge.s32.totalorder %s6794_s26, 2 }
  0x3b   : > { %s4661_s28 = sshll.u32 (!%p975_p3), %s5867_s15, 4  ;;  %p1069_p5 = scmp.lt.s32.totalorder (!%p975_p3), %s5867_s15, 3 }
  0x3c   : > { %s6796_s26 = smov (%p93_p4, %s6794_s26), 0  ;;  %978 = sbr.rel (%p975_p3) target bundleno = 4100 (0x1004), region = 156 }
  0x3d   : > { %p1064_p6 = scmp.lt.s32.totalorder (!%p975_p3), %s4661_s28, 63  ;;  %p1078_p7 = scmp.eq.s32.totalorder (!%p975_p3), %s5871_s16, 0 }
  0x3e   : > { %p1079_p8 = scmp.eq.s32.totalorder (!%p975_p3), %s5867_s15, 0 }
  0x40   : > { %p1080_p9 = pnand (!%p975_p3), %p1079_p8, %p1078_p7 }
  0x43   : > { %s6145_s1 = scalar_select %p1069_p5, %s5867_s15, 3 }
  0x44   : > { %s6798_s28 = smov (!%p1064_p6, %s4661_s28), 63  ;;  %1083 = sbr.rel (%p1080_p9) target bundleno = 731 (0x2db), region = 160 }
  0x45   : > { %s1071_s2 = scalar_lea.vmem %s5940_s9, %s6145_s1  ;;  %s4662_s7 = sshll.u32 %s6798_s28, 3  ;;  %v1088_v0 = vld [vmem:[%s5960_s25] sm:$0xff] (!%p1080_p9)  ;;  %v1089_v1 = vld [vmem:[%s5960_s25 + $0x8] sm:$0xf] (!%p1080_p9)  ;;  %vm1110_vm0 = vcmask (!%p1080_p9), 1043456   ;;  %vm5919_vm1 = vmmov (!%p1080_p9), 1  }
  0x46   : > { %s6151_s10 = scalar_lea.vmem %s5935_s5, %s4662_s7  ;;  %s6154_s11 = scalar_lea.vmem %s5945_s13, %s4662_s7  ;;  %v1084_v2 = vld [vmem:[%s5950_s17] sm:$0xff] (!%p1080_p9)  ;;  %v5567_v3 = vpack.c.bf16 (!%p1080_p9), %v1089_v1, %v1088_v0  ;;  %vm5568_vm2 = vmpackc.low (!%p1080_p9), %vm1110_vm0, %vm5919_vm1  ;;  %vm1097_vm3 = vcmask (!%p1080_p9), 97280   ;;  %v1086_v4 = vld [vmem:[%s5950_s17 + $0x10] sm:$0xff] (!%p1080_p9)  ;;  %v5920_v12 = vmov (!%p1080_p9), 0   ;;  %vm1220_vm5 = vcmask (!%p1080_p9), 130048  }
  0x47   : > { %5151 = vmatprep.mubr.msk.f32.mxu0 (!%p1080_p9), %vm1097_vm3, %v1084_v2  ;;  %5154 = vmatprep.mubr.msk.f32.mxu1 (!%p1080_p9), %vm1097_vm3, %v1086_v4  ;;  %v1085_v5 = vld [vmem:[%s5950_s17 + $0x8] sm:$0xff] (!%p1080_p9)  ;;  %v1087_v6 = vld [vmem:[%s5950_s17 + $0x18] sm:$0xff] (!%p1080_p9)  ;;  %v1211_v7 = vld [vmem:[%s5970_s3] sm:$0xff] (!%p1080_p9)  ;;  %vm1476_vm9 = vcmask (!%p1080_p9), 64512   ;;  %v5921_v62 = vmov (!%p1080_p9), 0.0   ;;  %vm1471_vm10 = vcmask (!%p1080_p9), 261120  }
  0x48   : > { %5569 = vmatprep.subr.msk.bf16.mxu0 (!%p1080_p9), %vm5568_vm2, %v5567_v3  ;;  %5701 = vmatprep.subr.msk.bf16.mxu1 (!%p1080_p9), %vm5568_vm2, %v5567_v3  ;;  %v1212_v8 = vld [vmem:[%s5970_s3 + $0x8] sm:$0xff] (!%p1080_p9)  ;;  %v1318_v10 = vld [vmem:[%s5955_s21] sm:$0xff] (!%p1080_p9)  ;;  %v1320_v11 = vld [vmem:[%s5955_s21 + $0x10] sm:$0xff] (!%p1080_p9)  ;;  %1477 = vst.msk [vmem:[#allocation4] sm:$0xff] (!%p1080_p9), %vm1476_vm9, %v5921_v62 }
  0x49   : > { %5572 = vmatpush3.bf16.msk.msra.mxu0 (!%p1080_p9), %vm5568_vm2, %v5567_v3  ;;  %5702 = vmatpush3.bf16.msk.msra.mxu1 (!%p1080_p9), %vm5568_vm2, %v5567_v3  ;;  %v5573_v9 = vpack.c.bf16 (!%p1080_p9), %v1212_v8, %v1211_v7  ;;  %v1319_v13 = vld [vmem:[%s5955_s21 + $0x8] sm:$0xff] (!%p1080_p9)  ;;  %v1321_v14 = vld [vmem:[%s5955_s21 + $0x18] sm:$0xff] (!%p1080_p9)  ;;  %v4665_v15 = vld [vmem:[%s5965_s29] ss:$0 sm:$0xff] (!%p1080_p9)  ;;  %1478 = vst.msk [vmem:[#allocation4 + $0x8] sm:$0xff] (!%p1080_p9), %vm1476_vm9, %v5921_v62 }
  0x4a   : > { %5825 = vset.pattern.permute.xlu0 (!%p1080_p9), %v5920_v12  ;;  %5826 = vset.pattern.permute.xlu1 (!%p1080_p9), %v5920_v12  ;;  %v1372_v32 = vld [vmem:[%s6000_s6] sm:$0xff] (!%p1080_p9)  ;;  %v1373_v33 = vld [vmem:[%s6000_s6 + $0x8] sm:$0xff] (!%p1080_p9)  ;;  %1479 = vst.msk [vmem:[#allocation4 + $0x10] sm:$0xff] (!%p1080_p9), %vm1476_vm9, %v5921_v62  ;;  %1480 = vst.msk [vmem:[#allocation4 + $0x18] sm:$0xff] (!%p1080_p9), %vm1476_vm9, %v5921_v62 }
  0x4b   : > { %5574 = vmatprep.subr.bf16.mxu1 %v5573_v9  ;;  %1325 = vperm.xlu0 %5825, %v1318_v10   ;;  %v5577_v34 = vpack.c.bf16 %v1373_v33, %v1372_v32  ;;  %v4676_v37 = vld [vmem:[%s5990_s24] ss:$0 sm:$0xff] }
  0x4c   : > { %5152 = vmatmul.mubr.msk.f32.vlgmr.msra.gmra.mrb[0].mxu0 %vm1097_vm3, %v1085_v5  ;;  %5155 = vmatmul.mubr.msk.f32.vlgmr.msra.gmra.mrb[0].mxu1 %vm1097_vm3, %v1087_v6  ;;  %v4677_v40 = vld [vmem:[%s5995_s30] ss:$0 sm:$0xff] }
  0x4d   : > { %5576 = vmatpush3.bf16.msra.mxu1 %v5573_v9  ;;  %1335 = vperm.xlu1 %5826, %v1320_v11   ;;  %v4671_v43 = vld [vmem:[%s5975_s8] ss:$0 sm:$0xff] }
  0x4e   : > { %5578 = vmatprep.subr.bf16.mxu0 %v5577_v34 }
  0x4f   : > { %1330 = vperm.xlu0 %5825, %v1319_v13   ;;  %5580 = vmatpush3.bf16.msra.mxu0 %v5577_v34 }
  0x51   : > { %1340 = vperm.xlu1 %5826, %v1321_v14  }
  0xca   : > { %v1326_v35 = vpop.permute.xlu0 %1325 }
  0xcb   : > { %v1349_v41 = vmul.f32 %v4676_v37, %v1326_v35 }
  0xcc   : > { %v1336_v36 = vpop.permute.xlu1 %1335 }
  0xcd   : > { %v1360_v49 = vadd.f32 %v4677_v40, %v1349_v41  ;;  %v1351_v50 = vmul.f32 %v4676_v37, %v1336_v36 }
  0xce   : > { %v1331_v38 = vpop.permute.xlu0 %1330 }
  0xcf   : > { %v1350_v39 = vmul.f32 %v4676_v37, %v1331_v38  ;;  %v1362_v58 = vadd.f32 %v4677_v40, %v1351_v50 }
  0xd0   : > { %v1341_v42 = vpop.permute.xlu1 %1340 }
  0xd1   : > { %v1361_v45 = vadd.f32 %v4677_v40, %v1350_v39  ;;  %v1352_v46 = vmul.f32 %v4676_v37, %v1341_v42 }
  0xd3   : > { %v1363_v55 = vadd.f32 %v4677_v40, %v1352_v46 }
 0x11f   : > { %v5153_v16 = vpop.f32.mrb[0].mxu0  ;;  %v5156_v17 = vpop.f32.mrb[0].mxu1 }
 0x120   : > { %v1186_v18 = vadd.f32 %v5153_v16, %v4665_v15  ;;  %v1180_v19 = vpop.f32.mrb[1].mxu0  ;;  %v1190_v20 = vpop.f32.mrb[1].mxu1  ;;  %v1196_v24 = vadd.f32 %v5156_v17, %v4665_v15 }
 0x121   : > { %v1181_v21 = vadd.f32 %v4665_v15, %v1180_v19  ;;  %v1191_v22 = vadd.f32 %v4665_v15, %v1190_v20 }
 0x122   : > { %vm1200_vm4 = vcmp.ge.f32.partialorder %v1186_v18, 0.0  ;;  %v1204_v23 = vmul.f32 0.01, %v1186_v18  ;;  %v1206_v30 = vmul.f32 0.01, %v1196_v24  ;;  %vm1202_vm8 = vcmp.ge.f32.partialorder %v1196_v24, 0.0 }
 0x123   : > { %vm1199_vm6 = vcmp.ge.f32.partialorder %v1181_v21, 0.0  ;;  %v1203_v25 = vmul.f32 0.01, %v1181_v21  ;;  %vm1201_vm7 = vcmp.ge.f32.partialorder %v1191_v22, 0.0  ;;  %v1205_v26 = vmul.f32 0.01, %v1191_v22 }
 0x124   : > { %v1208_v29 = vsel %vm1200_vm4, %v1186_v18, %v1204_v23  ;;  %v1210_v31 = vsel %vm1202_vm8, %v1196_v24, %v1206_v30 }
 0x125   : > { %v1207_v27 = vsel %vm1199_vm6, %v1181_v21, %v1203_v25  ;;  %v1209_v28 = vsel %vm1201_vm7, %v1191_v22, %v1205_v26 }
 0x126   : > { %5161 = vmatprep.mubr.msk.f32.mxu1 %vm1220_vm5, %v1207_v27 }
 0x127   : > { %5162 = vmatmul.mubr.msk.f32.vlgmr.msra.gmra.mrb[2].mxu1 %vm1220_vm5, %v1208_v29 }
 0x128   : > { %5164 = vmatprep.mubr.msk.f32.mxu1 %vm1220_vm5, %v1209_v28 }
 0x12b   : > { %5165 = vmatmul.mubr.msk.f32.gmra.mrb[4].mxu1 %vm1220_vm5, %v1210_v31 }
 0x1fa   : > { %v5163_v44 = vpop.f32.mrb[2].mxu1 }
 0x1fb   : > { %v1305_v47 = vadd.f32 %v5163_v44, %v4671_v43  ;;  %v1299_v48 = vpop.f32.mrb[3].mxu1 }
 0x1fc   : > { %v1300_v51 = vadd.f32 %v4671_v43, %v1299_v48 }
 0x1fd   : > { %v1365_v52 = vmul.f32 %v1361_v45, %v1305_v47 }
 0x1fe   : > { %v1364_v53 = vmul.f32 %v1360_v49, %v1300_v51  ;;  %v5166_v54 = vpop.f32.mrb[4].mxu1 }
 0x1ff   : > { %1369 = vst.msk [vmem:[#allocation2 + $0x8] sm:$0xff] %vm1220_vm5, %v1365_v52  ;;  %v1315_v56 = vadd.f32 %v5166_v54, %v4671_v43  ;;  %v1309_v57 = vpop.f32.mrb[5].mxu1 }
 0x200   : > { %1368 = vst.msk [vmem:[#allocation2] sm:$0xff] %vm1220_vm5, %v1364_v53  ;;  %v1310_v59 = vadd.f32 %v4671_v43, %v1309_v57  ;;  %5171 = vmatprep.mubr.msk.f32.mxu0 %vm1220_vm5, %v1364_v53 }
 0x201   : > { %v1367_v60 = vmul.f32 %v1363_v55, %v1315_v56  ;;  %5172 = vmatmul.mubr.msk.f32.vlgmr.msra.gmra.mrb[2].mxu0 %vm1220_vm5, %v1365_v52 }
 0x202   : > { %v1366_v61 = vmul.f32 %v1362_v58, %v1310_v59 }
 0x203   : > { %1371 = vst.msk [vmem:[#allocation2 + $0x18] sm:$0xff] %vm1220_vm5, %v1367_v60 }
 0x204   : > { %1370 = vst.msk [vmem:[#allocation2 + $0x10] sm:$0xff] %vm1220_vm5, %v1366_v61  ;;  %5174 = vmatprep.mubr.msk.f32.mxu0 %vm1220_vm5, %v1366_v61 }
 0x205   : > { %5175 = vmatmul.mubr.msk.f32.gmra.mrb[4].mxu0 %vm1220_vm5, %v1367_v60 }
 0x2d4   : > { %v5173_v63 = vpop.f32.mrb[2].mxu0 }
 0x2d5   : > { %1473 = vst.msk [vmem:[#allocation3 + $0x8] sm:$0xff] %vm1471_vm10, %v5173_v63  ;;  %v1452_v0 = vpop.f32.mrb[3].mxu0 }
 0x2d6   : > { %1472 = vst.msk [vmem:[#allocation3] sm:$0xff] %vm1471_vm10, %v1452_v0 }
 0x2d8   : > { %v5176_v1 = vpop.f32.mrb[4].mxu0 }
 0x2d9   : > { %1475 = vst.msk [vmem:[#allocation3 + $0x18] sm:$0xff] %vm1471_vm10, %v5176_v1  ;;  %v1462_v2 = vpop.f32.mrb[5].mxu0 }
 0x2da   : > { %1474 = vst.msk [vmem:[#allocation3 + $0x10] sm:$0xff] %vm1471_vm10, %v1462_v2 }
 0x2db PF: > { %p1481_p10 = scmp.eq.s32.totalorder %s5871_s16, 1 }
 0x2dd   : > { %p1482_p11 = pnand %p1481_p10, %p1079_p8 }
 0x2de   : > { %v1494_v3 = vld [vmem:[%s6035_s27] sm:$0xff] (!%p1482_p11)  ;;  %v1495_v4 = vld [vmem:[%s6035_s27 + $0x8] sm:$0xff] (!%p1482_p11)  ;;  %vm1496_vm11 = vcmask (!%p1482_p11), 130048   ;;  %s6770_s28 = sld [smem:[#allocation14_spill]] (!%p1482_p11)  ;;  %v1492_v8 = vld [vmem:[#allocation2 + $0x10] sm:$0xff] (!%p1482_p11)  ;;  %vm1613_vm12 = vcmask (!%p1482_p11), 64512  }
 0x2df   : > { %1485 = sbr.rel (%p1482_p11) target bundleno = 1179 (0x49b), region = 164  ;;  %v1490_v5 = vld [vmem:[#allocation2] sm:$0xff] (!%p1482_p11)  ;;  %v5581_v6 = vpack.c.bf16 (!%p1482_p11), %v1495_v4, %v1494_v3  ;;  %v1491_v7 = vld [vmem:[#allocation2 + $0x8] sm:$0xff] (!%p1482_p11)  ;;  %v1493_v9 = vld [vmem:[#allocation2 + $0x18] sm:$0xff] (!%p1482_p11)  ;;  %vm1721_vm13 = vcmask (!%p1482_p11), 31744   ;;  %v5922_v32 = vmov (!%p1482_p11), 0.0  }
 0x2e0   : > { %5181 = vmatprep.mubr.msk.f32.mxu0 (!%p1482_p11), %vm1496_vm11, %v1490_v5  ;;  %v1618_v10 = vld [vmem:[%s6045_s12] sm:$0xff] (!%p1482_p11)  ;;  %v1487_v11 = vld [vmem:[#allocation4 + $0x8] sm:$0xff] (!%p1482_p11)  ;;  %1722 = vst.msk [vmem:[#allocation5] sm:$0xff] (!%p1482_p11), %vm1721_vm13, %v5922_v32  ;;  %1723 = vst.msk [vmem:[#allocation5 + $0x8] sm:$0xff] (!%p1482_p11), %vm1721_vm13, %v5922_v32  ;;  %vm1716_vm14 = vcmask (!%p1482_p11), 261120  }
 0x2e1   : > { %5582 = vmatprep.subr.bf16.mxu0 (!%p1482_p11), %v5581_v6  ;;  %5187 = vmatprep.subr.mxu1 (!%p1482_p11), %v1618_v10  ;;  %v1486_v12 = vld [vmem:[#allocation4] sm:$0xff] (!%p1482_p11)  ;;  %v1489_v18 = vld [vmem:[#allocation4 + $0x18] sm:$0xff] (!%p1482_p11)  ;;  %v1488_v20 = vld [vmem:[#allocation4 + $0x10] sm:$0xff] (!%p1482_p11)  ;;  %1724 = vst.msk [vmem:[#allocation5 + $0x10] sm:$0xff] (!%p1482_p11), %vm1721_vm13, %v5922_v32 }
 0x2e2   : > { %5584 = vmatpush3.bf16.msra.mxu0 (!%p1482_p11), %v5581_v6  ;;  %5188 = vmatpush3.msra.mxu1 (!%p1482_p11), %v1618_v10  ;;  %1725 = vst.msk [vmem:[#allocation5 + $0x18] sm:$0xff] (!%p1482_p11), %vm1721_vm13, %v5922_v32 }
 0x2e4   : > { %v4686_v14 = vld [vmem:[%s6770_s28] ss:$0 sm:$0xff] (!%p1482_p11) }
 0x2e5   : > { %5182 = vmatmul.mubr.msk.f32.vlgmr.msra.gmra.mrb[0].mxu0 (!%p1482_p11), %vm1496_vm11, %v1491_v7 }
 0x2e6   : > { %5184 = vmatprep.mubr.msk.f32.mxu0 %vm1496_vm11, %v1492_v8 }
 0x2e9   : > { %5185 = vmatmul.mubr.msk.f32.gmra.mrb[2].mxu0 %vm1496_vm11, %v1493_v9 }
 0x3b8   : > { %v5183_v13 = vpop.f32.mrb[0].mxu0 }
 0x3b9   : > { %v1595_v15 = vadd.f32 %v5183_v13, %v1487_v11  ;;  %v1575_v16 = vpop.f32.mrb[1].mxu0 }
 0x3ba   : > { %v1594_v17 = vadd.f32 %v1575_v16, %v1486_v12 }
 0x3bb   : > { %v1606_v19 = vadd.f32 %v4686_v14, %v1595_v15 }
 0x3bc   : > { %v5186_v21 = vpop.f32.mrb[2].mxu0  ;;  %v1605_v22 = vadd.f32 %v4686_v14, %v1594_v17 }
 0x3bd   : > { %v1610_v23 = vmax.f32 %v1606_v19, 0.0  ;;  %v1597_v24 = vadd.f32 %v5186_v21, %v1489_v18  ;;  %v1585_v25 = vpop.f32.mrb[3].mxu0 }
 0x3be   : > { %v1596_v26 = vadd.f32 %v1585_v25, %v1488_v20  ;;  %v1609_v27 = vmax.f32 %v1605_v22, 0.0 }
 0x3bf   : > { %1615 = vst.msk [vmem:[#allocation4 + $0x8] sm:$0xff] %vm1613_vm12, %v1610_v23  ;;  %v1608_v28 = vadd.f32 %v4686_v14, %v1597_v24 }
 0x3c0   : > { %v1607_v29 = vadd.f32 %v4686_v14, %v1596_v26  ;;  %1614 = vst.msk [vmem:[#allocation4] sm:$0xff] %vm1613_vm12, %v1609_v27  ;;  %5189 = vmatprep.mubr.msk.f32.mxu1 %vm1613_vm12, %v1609_v27 }
 0x3c1   : > { %v1612_v30 = vmax.f32 %v1608_v28, 0.0  ;;  %5190 = vmatmul.mubr.msk.f32.vlgmr.msra.gmra.mrb[0].mxu1 %vm1613_vm12, %v1610_v23 }
 0x3c2   : > { %v1611_v31 = vmax.f32 %v1607_v29, 0.0 }
 0x3c3   : > { %1617 = vst.msk [vmem:[#allocation4 + $0x18] sm:$0xff] %vm1613_vm12, %v1612_v30 }
 0x3c4   : > { %1616 = vst.msk [vmem:[#allocation4 + $0x10] sm:$0xff] %vm1613_vm12, %v1611_v31  ;;  %5192 = vmatprep.mubr.msk.f32.mxu1 %vm1613_vm12, %v1611_v31 }
 0x3c5   : > { %5193 = vmatmul.mubr.msk.f32.gmra.mrb[2].mxu1 %vm1613_vm12, %v1612_v30 }
 0x494   : > { %v5191_v33 = vpop.f32.mrb[0].mxu1 }
 0x495   : > { %1718 = vst.msk [vmem:[#allocation3 + $0x8] sm:$0xff] %vm1716_vm14, %v5191_v33  ;;  %v1697_v34 = vpop.f32.mrb[1].mxu1 }
 0x496   : > { %1717 = vst.msk [vmem:[#allocation3] sm:$0xff] %vm1716_vm14, %v1697_v34 }
 0x498   : > { %v5194_v35 = vpop.f32.mrb[2].mxu1 }
 0x499   : > { %1720 = vst.msk [vmem:[#allocation3 + $0x18] sm:$0xff] %vm1716_vm14, %v5194_v35  ;;  %v1707_v36 = vpop.f32.mrb[3].mxu1 }
 0x49a   : > { %1719 = vst.msk [vmem:[#allocation3 + $0x10] sm:$0xff] %vm1716_vm14, %v1707_v36 }
 0x49b PF: > { %s6771_s7 = sld [smem:[#allocation6_spill]]  ;;  %vm1799_vm15 = vcmask 1045504   ;;  %v1726_v38 = vld [vmem:[%s6154_s11] sm:$0xff]  ;;  %vm1750_vm0 = vcmask 48128   ;;  %v1727_v40 = vld [vmem:[%s6154_s11 + $0x8] sm:$0xff]  ;;  %v1728_v42 = vld [vmem:[%s6154_s11 + $0x10] sm:$0xff]  ;;  %v2013_v44 = vlaneseq }
 0x49c   : > { %v1734_v39 = vld [vmem:[%s6154_s11 + $0x40] sm:$0xff]  ;;  %v1735_v41 = vld [vmem:[%s6154_s11 + $0x48] sm:$0xff]  ;;  %v1736_v43 = vld [vmem:[%s6154_s11 + $0x50] sm:$0xff]  ;;  %5197 = vmatprep.mubr.msk.f32.mxu0 %vm1750_vm0, %v1726_v38  ;;  %v5923_v51 = vmov 0   ;;  %v5924_v16 = vmov 0.0   ;;  %s6772_s1 = sld [smem:[#allocation7_spill]] }
 0x49d   : > { %5209 = vmatprep.mubr.msk.f32.mxu1 %vm1750_vm0, %v1734_v39  ;;  %v6217_v45 = vshrl.u32 %v2013_v44, 7  ;;  %v1729_v46 = vld [vmem:[%s6154_s11 + $0x18] sm:$0xff]  ;;  %v1998_v48 = vld [vmem:[%s6151_s10 + $0x10] sm:$0xff]  ;;  %v1730_v49 = vld [vmem:[%s6154_s11 + $0x20] sm:$0xff]  ;;  %5828 = vset.pattern.permute.xlu1 %v5923_v51  ;;  %v2014_v13 = vand.u32 127, %v2013_v44  ;;  %p4730_p12 = scmp.ne.s32.totalorder %s5871_s16, 0 }
 0x49e   : > { %v1737_v47 = vld [vmem:[%s6154_s11 + $0x58] sm:$0xff]  ;;  %v1738_v50 = vld [vmem:[%s6154_s11 + $0x60] sm:$0xff]  ;;  %5827 = vset.pattern.permute.xlu0 %v5923_v51  ;;  %2022 = vperm.xlu1 %5828, %v1998_v48   ;;  %v1997_v54 = vld [vmem:[%s6151_s10 + $0x8] sm:$0xff]  ;;  %s6776_s28 = sld [smem:[#allocation9_spill]] (!%p4730_p12) }
 0x49f   : > { %v1996_v52 = vld [vmem:[%s6151_s10] sm:$0xff]  ;;  %v1999_v53 = vld [vmem:[%s6151_s10 + $0x18] sm:$0xff]  ;;  %v6232_v55 = vadd.s32 8, %v6217_v45  ;;  %v6235_v56 = vadd.s32 16, %v6217_v45  ;;  %v1731_v57 = vld [vmem:[%s6154_s11 + $0x28] sm:$0xff]  ;;  %v6242_v59 = vadd.s32 24, %v6217_v45 }
 0x4a0   : > { %2016 = vperm.xlu0 %5827, %v1996_v52   ;;  %v1739_v58 = vld [vmem:[%s6154_s11 + $0x68] sm:$0xff]  ;;  %v1732_v60 = vld [vmem:[%s6154_s11 + $0x30] sm:$0xff]  ;;  %v6249_v62 = vld [vmem:[%s1071_s2] ss:$0 sm:$0xff]  ;;  %s6773_s2 = sld [smem:[#allocation8_spill]] (!%p4730_p12) }
 0x4a1   : > { %v1742_v37 = vld [vmem:[%s6771_s7] sm:$0x3f]  ;;  %v1740_v61 = vld [vmem:[%s6154_s11 + $0x70] sm:$0xff]  ;;  %v2001_v63 = vld [vmem:[%s6151_s10 + $0x28] sm:$0xff]  ;;  %vm2120_vm1 = vcmp.eq.s32.totalorder %v6217_v45, %v6249_v62  ;;  %vm2121_vm2 = vcmp.eq.s32.totalorder %v6232_v55, %v6249_v62  ;;  %vm2122_vm3 = vcmp.eq.s32.totalorder %v6235_v56, %v6249_v62  ;;  %vm2123_vm4 = vcmp.eq.s32.totalorder %v6242_v59, %v6249_v62  ;;  %s6777_s7 = sld [smem:[#allocation11_spill]] (!%p4730_p12) }
 0x4a2   : > { %5195 = vmatprep.subr.msk.mxu0 %vm1799_vm15, %v1742_v37  ;;  %5703 = vmatprep.subr.msk.mxu1 %vm1799_vm15, %v1742_v37  ;;  %v2000_v0 = vld [vmem:[%s6151_s10 + $0x20] sm:$0xff]  ;;  %v1733_v1 = vld [vmem:[%s6154_s11 + $0x38] sm:$0xff]  ;;  %v2002_v4 = vld [vmem:[%s6151_s10 + $0x30] sm:$0xff] }
 0x4a3   : > { %5196 = vmatpush3.msk.msra.mxu0 %vm1799_vm15, %v1742_v37  ;;  %5704 = vmatpush3.msk.msra.mxu1 %vm1799_vm15, %v1742_v37  ;;  %v1741_v2 = vld [vmem:[%s6154_s11 + $0x78] sm:$0xff]  ;;  %v2005_v5 = vld [vmem:[%s6151_s10 + $0x48] sm:$0xff]  ;;  %v2004_v6 = vld [vmem:[%s6151_s10 + $0x40] sm:$0xff]  ;;  %s6775_s11 = sld [smem:[#allocation12_spill]] (!%p4730_p12) }
 0x4a4   : > { %5198 = vmatmul.mubr.msk.f32.vlgmr.msra.gmra.mrb[0].mxu0 %vm1750_vm0, %v1727_v40  ;;  %5210 = vmatmul.mubr.msk.f32.vlgmr.msra.gmra.mrb[0].mxu1 %vm1750_vm0, %v1735_v41  ;;  %v2003_v3 = vld [vmem:[%s6151_s10 + $0x38] sm:$0xff]  ;;  %v2006_v8 = vld [vmem:[%s6151_s10 + $0x50] sm:$0xff]  ;;  %v2009_v9 = vld [vmem:[%s6151_s10 + $0x68] sm:$0xff] }
 0x4a5   : > { %5200 = vmatprep.mubr.msk.f32.mxu0 %vm1750_vm0, %v1728_v42  ;;  %5212 = vmatprep.mubr.msk.f32.mxu1 %vm1750_vm0, %v1736_v43  ;;  %v2007_v7 = vld [vmem:[%s6151_s10 + $0x58] sm:$0xff]  ;;  %v2008_v10 = vld [vmem:[%s6151_s10 + $0x60] sm:$0xff]  ;;  %v2010_v12 = vld [vmem:[%s6151_s10 + $0x70] sm:$0xff] }
 0x4a6   : > { %2025 = vperm.xlu1 %5828, %v1999_v53   ;;  %2019 = vperm.xlu0 %5827, %v1997_v54   ;;  %v2011_v11 = vld [vmem:[%s6151_s10 + $0x78] sm:$0xff]  ;;  %v6313_v48 = vld [vmem:[%s6772_s1] ss:$0 sm:$0xff]  ;;  %s6774_s10 = sld [smem:[#allocation10_spill]] (!%p4730_p12)  ;;  %s6778_s1 = sld [smem:[#allocation13_spill]] (!%p4730_p12) }
 0x4a8   : > { %5201 = vmatmul.mubr.msk.f32.gmra.mrb[2].mxu0 %vm1750_vm0, %v1729_v46  ;;  %5213 = vmatmul.mubr.msk.f32.gmra.mrb[2].mxu1 %vm1750_vm0, %v1737_v47 }
 0x4a9   : > { %5203 = vmatprep.mubr.msk.f32.mxu0 %vm1750_vm0, %v1730_v49  ;;  %5215 = vmatprep.mubr.msk.f32.mxu1 %vm1750_vm0, %v1738_v50 }
 0x4aa   : > { %2031 = vperm.xlu1 %5828, %v2001_v63   ;;  %2028 = vperm.xlu0 %5827, %v2000_v0  }
 0x4ac   : > { %5204 = vmatmul.mubr.msk.f32.gmra.mrb[4].mxu0 %vm1750_vm0, %v1731_v57  ;;  %5216 = vmatmul.mubr.msk.f32.gmra.mrb[4].mxu1 %vm1750_vm0, %v1739_v58 }
 0x4ad   : > { %5206 = vmatprep.mubr.msk.f32.mxu0 %vm1750_vm0, %v1732_v60  ;;  %5218 = vmatprep.mubr.msk.f32.mxu1 %vm1750_vm0, %v1740_v61 }
 0x4ae   : > { %2037 = vperm.xlu1 %5828, %v2003_v3   ;;  %2034 = vperm.xlu0 %5827, %v2002_v4  }
 0x4b0   : > { %5207 = vmatmul.mubr.msk.f32.gmra.mrb[6].mxu0 %vm1750_vm0, %v1733_v1  ;;  %5219 = vmatmul.mubr.msk.f32.gmra.mrb[6].mxu1 %vm1750_vm0, %v1741_v2 }
 0x4b2   : > { %2043 = vperm.xlu1 %5828, %v2005_v5   ;;  %2040 = vperm.xlu0 %5827, %v2004_v6  }
 0x4b6   : > { %2049 = vperm.xlu1 %5828, %v2007_v7   ;;  %2046 = vperm.xlu0 %5827, %v2006_v8  }
 0x4ba   : > { %2055 = vperm.xlu1 %5828, %v2009_v9   ;;  %2052 = vperm.xlu0 %5827, %v2008_v10  }
 0x4be   : > { %2061 = vperm.xlu1 %5828, %v2011_v11   ;;  %2058 = vperm.xlu0 %5827, %v2010_v12  }
 0x51d   : > { %v2023_v14 = vpop.permute.xlu1 %2022 }
 0x51e   : > { %vm2065_vm5 = vcmp.eq.s32.totalorder %v2014_v13, %v2023_v14 }
 0x51f   : > { %v2017_v15 = vpop.permute.xlu0 %2016  ;;  %v6280_v17 = vsel %vm2065_vm5, 1.0, %v5924_v16 }
 0x520   : > { %vm2063_vm6 = vcmp.eq.s32.totalorder %v2014_v13, %v2017_v15 }
 0x521   : > { %v6282_v18 = vsel %vm2063_vm6, 1.0, %v5924_v16 }
 0x525   : > { %v2026_v19 = vpop.permute.xlu1 %2025  ;;  %v2020_v20 = vpop.permute.xlu0 %2019 }
 0x526   : > { %vm2066_vm7 = vcmp.eq.s32.totalorder %v2014_v13, %v2026_v19  ;;  %vm2064_vm8 = vcmp.eq.s32.totalorder %v2014_v13, %v2020_v20 }
 0x527   : > { %v6284_v21 = vsel %vm2066_vm7, 1.0, %v5924_v16  ;;  %v6286_v22 = vsel %vm2064_vm8, 1.0, %v5924_v16 }
 0x529   : > { %v2032_v23 = vpop.permute.xlu1 %2031  ;;  %v2029_v24 = vpop.permute.xlu0 %2028 }
 0x52a   : > { %vm2068_vm9 = vcmp.eq.s32.totalorder %v2014_v13, %v2032_v23  ;;  %vm2067_vm10 = vcmp.eq.s32.totalorder %v2014_v13, %v2029_v24 }
 0x52b   : > { %v6288_v25 = vsel %vm2068_vm9, 1.0, %v5924_v16  ;;  %v6290_v26 = vsel %vm2067_vm10, 1.0, %v5924_v16 }
 0x52d   : > { %v2038_v27 = vpop.permute.xlu1 %2037  ;;  %v2035_v28 = vpop.permute.xlu0 %2034 }
 0x52e   : > { %vm2070_vm11 = vcmp.eq.s32.totalorder %v2014_v13, %v2038_v27  ;;  %vm2069_vm12 = vcmp.eq.s32.totalorder %v2014_v13, %v2035_v28 }
 0x52f   : > { %v6292_v29 = vsel %vm2070_vm11, 1.0, %v5924_v16  ;;  %v6294_v30 = vsel %vm2069_vm12, 1.0, %v5924_v16 }
 0x531   : > { %v2044_v31 = vpop.permute.xlu1 %2043  ;;  %v2041_v32 = vpop.permute.xlu0 %2040 }
 0x532   : > { %vm2072_vm13 = vcmp.eq.s32.totalorder %v2014_v13, %v2044_v31  ;;  %vm2071_vm14 = vcmp.eq.s32.totalorder %v2014_v13, %v2041_v32 }
 0x533   : > { %v6296_v33 = vsel %vm2072_vm13, 1.0, %v5924_v16  ;;  %v6298_v34 = vsel %vm2071_vm14, 1.0, %v5924_v16 }
 0x535   : > { %v2050_v35 = vpop.permute.xlu1 %2049  ;;  %v2047_v36 = vpop.permute.xlu0 %2046 }
 0x536   : > { %vm2074_vm15 = vcmp.eq.s32.totalorder %v2014_v13, %v2050_v35  ;;  %vm2073_vm0 = vcmp.eq.s32.totalorder %v2014_v13, %v2047_v36 }
 0x537   : > { %v6300_v37 = vsel %vm2074_vm15, 1.0, %v5924_v16  ;;  %v6302_v38 = vsel %vm2073_vm0, 1.0, %v5924_v16 }
 0x539   : > { %v2056_v39 = vpop.permute.xlu1 %2055  ;;  %v2053_v40 = vpop.permute.xlu0 %2052 }
 0x53a   : > { %vm2076_vm5 = vcmp.eq.s32.totalorder %v2014_v13, %v2056_v39  ;;  %vm2075_vm6 = vcmp.eq.s32.totalorder %v2014_v13, %v2053_v40 }
 0x53b   : > { %v6304_v41 = vsel %vm2076_vm5, 1.0, %v5924_v16  ;;  %v6306_v42 = vsel %vm2075_vm6, 1.0, %v5924_v16 }
 0x53d   : > { %v2062_v43 = vpop.permute.xlu1 %2061  ;;  %v2059_v44 = vpop.permute.xlu0 %2058 }
 0x53e   : > { %vm2078_vm7 = vcmp.eq.s32.totalorder %v2014_v13, %v2062_v43  ;;  %vm2077_vm8 = vcmp.eq.s32.totalorder %v2014_v13, %v2059_v44 }
 0x53f   : > { %v6308_v46 = vsel %vm2078_vm7, 1.0, %v5924_v16  ;;  %v6310_v47 = vsel %vm2077_vm8, 1.0, %v5924_v16 }
 0x577   : > { %v5199_v49 = vpop.f32.mrb[0].mxu0  ;;  %v5211_v50 = vpop.f32.mrb[0].mxu1 }
 0x578   : > { %v1875_v51 = vadd.f32 %v5199_v49, %v6313_v48  ;;  %v1915_v52 = vadd.f32 %v5211_v50, %v6313_v48  ;;  %v1869_v53 = vpop.f32.mrb[1].mxu0  ;;  %v1909_v54 = vpop.f32.mrb[1].mxu1 }
 0x579   : > { %v1870_v57 = vadd.f32 %v6313_v48, %v1869_v53  ;;  %v1910_v58 = vadd.f32 %v6313_v48, %v1909_v54 }
 0x57a   : > { %vm1949_vm9 = vcmp.ge.f32.partialorder %v1875_v51, 0.0  ;;  %v1965_v60 = vmul.f32 0.01, %v1875_v51  ;;  %vm1957_vm10 = vcmp.ge.f32.partialorder %v1915_v52, 0.0  ;;  %v1973_v61 = vmul.f32 0.01, %v1915_v52 }
 0x57b   : > { %vm1948_vm11 = vcmp.ge.f32.partialorder %v1870_v57, 0.0  ;;  %v1964_v63 = vmul.f32 0.01, %v1870_v57  ;;  %vm1956_vm12 = vcmp.ge.f32.partialorder %v1910_v58, 0.0  ;;  %v1972_v0 = vmul.f32 0.01, %v1910_v58 }
 0x57c   : > { %v6319_v1 = vsel %vm1949_vm9, %v1875_v51, %v1965_v60  ;;  %v6321_v2 = vsel %vm1957_vm10, %v1915_v52, %v1973_v61  ;;  %v5202_v3 = vpop.f32.mrb[2].mxu0  ;;  %v5214_v4 = vpop.f32.mrb[2].mxu1 }
 0x57d   : > { %v6323_v5 = vsel %vm1948_vm11, %v1870_v57, %v1964_v63  ;;  %v6325_v6 = vsel %vm1956_vm12, %v1910_v58, %v1972_v0  ;;  %v1885_v7 = vadd.f32 %v5202_v3, %v6313_v48  ;;  %v1925_v8 = vadd.f32 %v5214_v4, %v6313_v48  ;;  %v1879_v9 = vpop.f32.mrb[3].mxu0  ;;  %v1919_v10 = vpop.f32.mrb[3].mxu1 }
 0x57e   : > { %v1880_v11 = vadd.f32 %v6313_v48, %v1879_v9  ;;  %v1920_v12 = vadd.f32 %v6313_v48, %v1919_v10 }
 0x57f   : > { %vm1951_vm13 = vcmp.ge.f32.partialorder %v1885_v7, 0.0  ;;  %v1967_v13 = vmul.f32 0.01, %v1885_v7  ;;  %vm1959_vm14 = vcmp.ge.f32.partialorder %v1925_v8, 0.0  ;;  %v1975_v14 = vmul.f32 0.01, %v1925_v8 }
 0x580   : > { %vm1950_vm15 = vcmp.ge.f32.partialorder %v1880_v11, 0.0  ;;  %v1966_v15 = vmul.f32 0.01, %v1880_v11  ;;  %vm1958_vm0 = vcmp.ge.f32.partialorder %v1920_v12, 0.0  ;;  %v1974_v16 = vmul.f32 0.01, %v1920_v12 }
 0x581   : > { %v6331_v19 = vsel %vm1951_vm13, %v1885_v7, %v1967_v13  ;;  %v6333_v20 = vsel %vm1959_vm14, %v1925_v8, %v1975_v14  ;;  %v5205_v23 = vpop.f32.mrb[4].mxu0  ;;  %v5217_v24 = vpop.f32.mrb[4].mxu1  ;;  %vm2141_vm13 = vcmask (!%p4730_p12), 130048   ;;  %vm2335_vm14 = vcmask (!%p4730_p12), 261120  }
 0x582   : > { %v6335_v27 = vsel %vm1950_vm15, %v1880_v11, %v1966_v15  ;;  %v6337_v28 = vsel %vm1958_vm0, %v1920_v12, %v1974_v16  ;;  %v1895_v31 = vadd.f32 %v5205_v23, %v6313_v48  ;;  %v1935_v32 = vadd.f32 %v5217_v24, %v6313_v48  ;;  %v1889_v35 = vpop.f32.mrb[5].mxu0  ;;  %v1929_v36 = vpop.f32.mrb[5].mxu1  ;;  %v2140_v15 = vld [vmem:[%s6773_s2 + $0x8] sm:$0xff] (!%p4730_p12)  ;;  %v2135_v16 = vld [vmem:[#allocation3] sm:$0xff] (!%p4730_p12)  ;;  %5225 = vmatprep.mubr.msk.f32.mxu0 (!%p4730_p12), %vm2141_vm13, %v6323_v5 }
 0x583   : > { %v1890_v39 = vadd.f32 %v6313_v48, %v1889_v35  ;;  %v1930_v40 = vadd.f32 %v6313_v48, %v1929_v36  ;;  %v5208_v43 = vpop.f32.mrb[6].mxu0  ;;  %v5220_v44 = vpop.f32.mrb[6].mxu1  ;;  %v2136_v24 = vld [vmem:[#allocation3 + $0x8] sm:$0xff] (!%p4730_p12)  ;;  %v2138_v35 = vld [vmem:[#allocation3 + $0x18] sm:$0xff] (!%p4730_p12) }
 0x584   : > { %vm1953_vm5 = vcmp.ge.f32.partialorder %v1895_v31, 0.0  ;;  %v1969_v49 = vmul.f32 0.01, %v1895_v31  ;;  %vm1961_vm6 = vcmp.ge.f32.partialorder %v1935_v32, 0.0  ;;  %v1977_v50 = vmul.f32 0.01, %v1935_v32 }
 0x585   : > { %vm1952_vm7 = vcmp.ge.f32.partialorder %v1890_v39, 0.0  ;;  %v1968_v51 = vmul.f32 0.01, %v1890_v39  ;;  %vm1960_vm8 = vcmp.ge.f32.partialorder %v1930_v40, 0.0  ;;  %v1976_v52 = vmul.f32 0.01, %v1930_v40 }
 0x586   : > { %v6343_v53 = vsel %vm1953_vm5, %v1895_v31, %v1969_v49  ;;  %v6345_v54 = vsel %vm1961_vm6, %v1935_v32, %v1977_v50  ;;  %v1905_v57 = vadd.f32 %v5208_v43, %v6313_v48  ;;  %v1945_v58 = vadd.f32 %v5220_v44, %v6313_v48  ;;  %v1899_v60 = vpop.f32.mrb[7].mxu0  ;;  %v1939_v61 = vpop.f32.mrb[7].mxu1  ;;  %2134 = sbr.rel (%p4730_p12) target bundleno = 2363 (0x93b), region = 168  ;;  %v2137_v32 = vld [vmem:[#allocation3 + $0x10] sm:$0xff] (!%p4730_p12)  ;;  %v2603_v49 = vld [vmem:[%s6774_s10 + $0x18] sm:$0xff] (!%p4730_p12) }
 0x587   : > { %v6349_v63 = vsel %vm1952_vm7, %v1890_v39, %v1968_v51  ;;  %v6351_v0 = vsel %vm1960_vm8, %v1930_v40, %v1976_v52  ;;  %v1900_v3 = vadd.f32 %v6313_v48, %v1899_v60  ;;  %v1940_v4 = vadd.f32 %v6313_v48, %v1939_v61  ;;  %v2139_v48 = vld [vmem:[%s6773_s2] sm:$0xff] (!%p4730_p12)  ;;  %v2601_v40 = vld [vmem:[%s6774_s10 + $0x8] sm:$0xff] (!%p4730_p12)  ;;  %v2602_v44 = vld [vmem:[%s6774_s10 + $0x10] sm:$0xff] (!%p4730_p12) }
 0x588   : > { %vm1955_vm9 = vcmp.ge.f32.partialorder %v1905_v57, 0.0  ;;  %v1971_v7 = vmul.f32 0.01, %v1905_v57  ;;  %vm1963_vm10 = vcmp.ge.f32.partialorder %v1945_v58, 0.0  ;;  %v1979_v8 = vmul.f32 0.01, %v1945_v58 }
 0x589   : > { %vm1954_vm11 = vcmp.ge.f32.partialorder %v1900_v3, 0.0  ;;  %v1970_v9 = vmul.f32 0.01, %v1900_v3  ;;  %vm1962_vm12 = vcmp.ge.f32.partialorder %v1940_v4, 0.0  ;;  %v1978_v10 = vmul.f32 0.01, %v1940_v4 }
 0x58a   : > { %v6355_v11 = vsel %vm1955_vm9, %v1905_v57, %v1971_v7  ;;  %v6357_v12 = vsel %vm1963_vm10, %v1945_v58, %v1979_v8  ;;  %v5585_v23 = vpack.c.bf16 (!%p4730_p12), %v2140_v15, %v2139_v48  ;;  %v5589_v31 = vpack.c.bf16 (!%p4730_p12), %v2136_v24, %v2135_v16  ;;  %v2600_v39 = vld [vmem:[%s6774_s10] sm:$0xff] (!%p4730_p12)  ;;  %v2853_v52 = vld [vmem:[%s6775_s11 + $0x8] sm:$0xff] (!%p4730_p12)  ;;  %v2854_v8 = vld [vmem:[%s6775_s11 + $0x10] sm:$0xff] (!%p4730_p12) }
 0x58b   : > { %v6359_v13 = vsel %vm1954_vm11, %v1900_v3, %v1970_v9  ;;  %v6361_v14 = vsel %vm1962_vm12, %v1940_v4, %v1978_v10  ;;  %v5593_v36 = vpack.c.bf16 (!%p4730_p12), %v2138_v35, %v2137_v32  ;;  %v5597_v43 = vpack.c.bf16 (!%p4730_p12), %v2601_v40, %v2600_v39  ;;  %v2852_v51 = vld [vmem:[%s6775_s11] sm:$0xff] (!%p4730_p12)  ;;  %v2855_v9 = vld [vmem:[%s6775_s11 + $0x18] sm:$0xff] (!%p4730_p12) }
 0x58c   : > { %5586 = vmatprep.subr.bf16.mxu0 (!%p4730_p12), %v5585_v23  ;;  %v5601_v50 = vpack.c.bf16 (!%p4730_p12), %v2603_v49, %v2602_v44  ;;  %v5605_v57 = vpack.c.bf16 (!%p4730_p12), %v2853_v52, %v2852_v51  ;;  %v6437_v58 = vld [vmem:[%s6776_s28] ss:$0 sm:$0xff] (!%p4730_p12) }
 0x58d   : > { %5588 = vmatpush3.bf16.msra.mxu0 %v5585_v23  ;;  %5598 = vmatprep.subr.bf16.mxu1 %v5597_v43 }
 0x58e   : > { %5590 = vmatprep.subr.bf16.mxu0 %v5589_v31  ;;  %5600 = vmatpush3.bf16.msra.mxu1 %v5597_v43 }
 0x58f   : > { %5602 = vmatprep.subr.bf16.mxu1 %v5601_v50 }
 0x590   : > { %5226 = vmatmul.mubr.msk.f32.vlgmr.msra.gmra.mrb[0].mxu0 %vm2141_vm13, %v6319_v1 }
 0x591   : > { %5592 = vmatpush3.bf16.msra.mxu0 %v5589_v31  ;;  %5228 = vmatprep.mubr.msk.f32.mxu0 %vm2141_vm13, %v6335_v27  ;;  %v5609_v31 = vpack.c.bf16 %v2855_v9, %v2854_v8 }
 0x592   : > { %5594 = vmatprep.subr.bf16.mxu0 %v5593_v36  ;;  %5604 = vmatpush3.bf16.msra.mxu1 %v5601_v50 }
 0x593   : > { %5606 = vmatprep.subr.bf16.mxu1 %v5605_v57 }
 0x594   : > { %5229 = vmatmul.mubr.msk.f32.gmra.mrb[2].mxu0 %vm2141_vm13, %v6331_v19 }
 0x595   : > { %5231 = vmatprep.mubr.msk.f32.mxu0 %vm2141_vm13, %v6349_v63  ;;  %5596 = vmatpush3.bf16.msra.mxu0 %v5593_v36 }
 0x598   : > { %5232 = vmatmul.mubr.msk.f32.gmra.mrb[4].mxu0 %vm2141_vm13, %v6343_v53 }
 0x599   : > { %5234 = vmatprep.mubr.msk.f32.mxu0 %vm2141_vm13, %v6359_v13 }
 0x59c   : > { %5235 = vmatmul.mubr.msk.f32.gmra.mrb[6].mxu0 %vm2141_vm13, %v6355_v11 }
 0x59d   : > { %5237 = vmatprep.mubr.msk.f32.mxu0 %vm2141_vm13, %v6325_v6 }
 0x5a0   : > { %5238 = vmatmul.mubr.msk.f32.gmra.mrb[8].mxu0 %vm2141_vm13, %v6321_v2 }
 0x5a1   : > { %5240 = vmatprep.mubr.msk.f32.mxu0 %vm2141_vm13, %v6337_v28 }
 0x5a4   : > { %5241 = vmatmul.mubr.msk.f32.gmra.mrb[10].mxu0 %vm2141_vm13, %v6333_v20 }
 0x5a5   : > { %5243 = vmatprep.mubr.msk.f32.mxu0 %vm2141_vm13, %v6351_v0 }
 0x5a8   : > { %5244 = vmatmul.mubr.msk.f32.gmra.mrb[12].mxu0 %vm2141_vm13, %v6345_v54 }
 0x5a9   : > { %5246 = vmatprep.mubr.msk.f32.mxu0 %vm2141_vm13, %v6361_v14 }
 0x5ac   : > { %5247 = vmatmul.mubr.msk.f32.gmra.mrb[14].mxu0 %vm2141_vm13, %v6357_v12 }
 0x5ad   : > { %5257 = vmatprep.mubr.msk.f32.mxu0 %vm2335_vm14, %v6282_v18 }
 0x5b0   : > { %5258 = vmatmul.mubr.msk.f32.vlgmr.msra.gmra.mrb[0].mxu0 %vm2335_vm14, %v6286_v22 }
 0x5b1   : > { %5260 = vmatprep.mubr.msk.f32.mxu0 %vm2335_vm14, %v6280_v17 }
 0x5b4   : > { %5261 = vmatmul.mubr.msk.f32.gmra.mrb[2].mxu0 %vm2335_vm14, %v6284_v21 }
 0x5b5   : > { %5263 = vmatprep.mubr.msk.f32.mxu0 %vm2335_vm14, %v6290_v26 }
 0x5b8   : > { %5264 = vmatmul.mubr.msk.f32.gmra.mrb[4].mxu0 %vm2335_vm14, %v6288_v25 }
 0x5b9   : > { %5266 = vmatprep.mubr.msk.f32.mxu0 %vm2335_vm14, %v6294_v30 }
 0x5bc   : > { %5267 = vmatmul.mubr.msk.f32.gmra.mrb[6].mxu0 %vm2335_vm14, %v6292_v29 }
 0x5bd   : > { %5269 = vmatprep.mubr.msk.f32.mxu0 %vm2335_vm14, %v6298_v34 }
 0x5c0   : > { %5270 = vmatmul.mubr.msk.f32.gmra.mrb[8].mxu0 %vm2335_vm14, %v6296_v33 }
 0x5c1   : > { %5272 = vmatprep.mubr.msk.f32.mxu0 %vm2335_vm14, %v6302_v38 }
 0x5c4   : > { %5273 = vmatmul.mubr.msk.f32.gmra.mrb[10].mxu0 %vm2335_vm14, %v6300_v37 }
 0x5c5   : > { %5275 = vmatprep.mubr.msk.f32.mxu0 %vm2335_vm14, %v6306_v42 }
 0x5c8   : > { %5276 = vmatmul.mubr.msk.f32.gmra.mrb[12].mxu0 %vm2335_vm14, %v6304_v41 }
 0x5c9   : > { %5278 = vmatprep.mubr.msk.f32.mxu0 %vm2335_vm14, %v6310_v47 }
 0x5cc   : > { %5279 = vmatmul.mubr.msk.f32.gmra.mrb[14].mxu0 %vm2335_vm14, %v6308_v46 }
 0x683   : > { %v5259_v60 = vpop.f32.mrb[0].mxu0 }
 0x684   : > { %v2537_v61 = vadd.f32 %v5259_v60, %v6437_v58  ;;  %v2450_v3 = vpop.f32.mrb[1].mxu0 }
 0x685   : > { %v2536_v4 = vadd.f32 %v6437_v58, %v2450_v3 }
 0x686   : > { %v2569_v7 = vmul.f32 0.01, %v2537_v61  ;;  %vm2553_vm15 = vcmp.ge.f32.partialorder %v2537_v61, 0.0 }
 0x687   : > { %v5262_v10 = vpop.f32.mrb[2].mxu0  ;;  %vm2552_vm0 = vcmp.ge.f32.partialorder %v2536_v4, 0.0  ;;  %v2568_v48 = vmul.f32 0.01, %v2536_v4 }
 0x688   : > { %v2539_v15 = vadd.f32 %v5262_v10, %v6437_v58  ;;  %v2460_v16 = vpop.f32.mrb[3].mxu0  ;;  %v2585_v35 = vsel %vm2553_vm15, %v2537_v61, %v2569_v7 }
 0x689   : > { %v2538_v23 = vadd.f32 %v6437_v58, %v2460_v16  ;;  %v2584_v24 = vsel %vm2552_vm0, %v2536_v4, %v2568_v48 }
 0x68a   : > { %v2571_v32 = vmul.f32 0.01, %v2539_v15  ;;  %5289 = vmatprep.mubr.msk.f32.mxu1 %vm2335_vm14, %v2584_v24  ;;  %vm2555_vm5 = vcmp.ge.f32.partialorder %v2539_v15, 0.0 }
 0x68b   : > { %vm2554_vm6 = vcmp.ge.f32.partialorder %v2538_v23, 0.0  ;;  %v2570_v36 = vmul.f32 0.01, %v2538_v23  ;;  %v5265_v39 = vpop.f32.mrb[4].mxu0  ;;  %5290 = vmatmul.mubr.msk.f32.vlgmr.msra.gmra.mrb[0].mxu1 %vm2335_vm14, %v2585_v35 }
 0x68c   : > { %v2541_v40 = vadd.f32 %v5265_v39, %v6437_v58  ;;  %v2470_v43 = vpop.f32.mrb[5].mxu0  ;;  %5608 = vmatpush3.bf16.msra.mxu1 %v5605_v57  ;;  %v2587_v51 = vsel %vm2555_vm5, %v2539_v15, %v2571_v32 }
 0x68d   : > { %v2540_v44 = vadd.f32 %v6437_v58, %v2470_v43  ;;  %v2586_v49 = vsel %vm2554_vm6, %v2538_v23, %v2570_v36  ;;  %5610 = vmatprep.subr.bf16.mxu1 %v5609_v31 }
 0x68e   : > { %v2573_v50 = vmul.f32 0.01, %v2541_v40  ;;  %5292 = vmatprep.mubr.msk.f32.mxu1 %vm2335_vm14, %v2586_v49  ;;  %vm2557_vm7 = vcmp.ge.f32.partialorder %v2541_v40, 0.0 }
 0x68f   : > { %vm2556_vm8 = vcmp.ge.f32.partialorder %v2540_v44, 0.0  ;;  %v2572_v52 = vmul.f32 0.01, %v2540_v44  ;;  %v5268_v60 = vpop.f32.mrb[6].mxu0  ;;  %5293 = vmatmul.mubr.msk.f32.gmra.mrb[2].mxu1 %vm2335_vm14, %v2587_v51 }
 0x690   : > { %v2543_v61 = vadd.f32 %v5268_v60, %v6437_v58  ;;  %v2480_v3 = vpop.f32.mrb[7].mxu0  ;;  %5612 = vmatpush3.bf16.msra.mxu1 %v5609_v31  ;;  %v2589_v8 = vsel %vm2557_vm7, %v2541_v40, %v2573_v50 }
 0x691   : > { %v2542_v57 = vadd.f32 %v6437_v58, %v2480_v3  ;;  %v2588_v4 = vsel %vm2556_vm8, %v2540_v44, %v2572_v52 }
 0x692   : > { %v2575_v7 = vmul.f32 0.01, %v2543_v61  ;;  %5295 = vmatprep.mubr.msk.f32.mxu1 %vm2335_vm14, %v2588_v4  ;;  %vm2559_vm9 = vcmp.ge.f32.partialorder %v2543_v61, 0.0 }
 0x693   : > { %vm2558_vm10 = vcmp.ge.f32.partialorder %v2542_v57, 0.0  ;;  %v2574_v9 = vmul.f32 0.01, %v2542_v57  ;;  %v5271_v10 = vpop.f32.mrb[8].mxu0  ;;  %5296 = vmatmul.mubr.msk.f32.gmra.mrb[4].mxu1 %vm2335_vm14, %v2589_v8 }
 0x694   : > { %v2545_v48 = vadd.f32 %v5271_v10, %v6437_v58  ;;  %v2490_v15 = vpop.f32.mrb[9].mxu0  ;;  %v2591_v31 = vsel %vm2559_vm9, %v2543_v61, %v2575_v7 }
 0x695   : > { %v2544_v16 = vadd.f32 %v6437_v58, %v2490_v15  ;;  %v2590_v23 = vsel %vm2558_vm10, %v2542_v57, %v2574_v9 }
 0x696   : > { %v2577_v24 = vmul.f32 0.01, %v2545_v48  ;;  %5298 = vmatprep.mubr.msk.f32.mxu1 %vm2335_vm14, %v2590_v23  ;;  %vm2561_vm11 = vcmp.ge.f32.partialorder %v2545_v48, 0.0 }
 0x697   : > { %vm2560_vm12 = vcmp.ge.f32.partialorder %v2544_v16, 0.0  ;;  %v2576_v32 = vmul.f32 0.01, %v2544_v16  ;;  %v5274_v35 = vpop.f32.mrb[10].mxu0  ;;  %5299 = vmatmul.mubr.msk.f32.gmra.mrb[6].mxu1 %vm2335_vm14, %v2591_v31 }
 0x698   : > { %v2547_v36 = vadd.f32 %v5274_v35, %v6437_v58  ;;  %v2500_v39 = vpop.f32.mrb[11].mxu0  ;;  %v2593_v49 = vsel %vm2561_vm11, %v2545_v48, %v2577_v24  ;;  %v6474_v35 = vld [vmem:[%s6777_s7] ss:$0 sm:$0xff] }
 0x699   : > { %v2546_v40 = vadd.f32 %v6437_v58, %v2500_v39  ;;  %v2592_v43 = vsel %vm2560_vm12, %v2544_v16, %v2576_v32 }
 0x69a   : > { %v2579_v44 = vmul.f32 0.01, %v2547_v36  ;;  %5301 = vmatprep.mubr.msk.f32.mxu1 %vm2335_vm14, %v2592_v43  ;;  %vm2563_vm13 = vcmp.ge.f32.partialorder %v2547_v36, 0.0 }
 0x69b   : > { %vm2562_vm15 = vcmp.ge.f32.partialorder %v2546_v40, 0.0  ;;  %v2578_v50 = vmul.f32 0.01, %v2546_v40  ;;  %v5277_v51 = vpop.f32.mrb[12].mxu0  ;;  %5302 = vmatmul.mubr.msk.f32.gmra.mrb[8].mxu1 %vm2335_vm14, %v2593_v49 }
 0x69c   : > { %v2549_v52 = vadd.f32 %v5277_v51, %v6437_v58  ;;  %v2510_v60 = vpop.f32.mrb[13].mxu0  ;;  %v2595_v4 = vsel %vm2563_vm13, %v2547_v36, %v2579_v44 }
 0x69d   : > { %v2548_v61 = vadd.f32 %v6437_v58, %v2510_v60  ;;  %v2594_v3 = vsel %vm2562_vm15, %v2546_v40, %v2578_v50 }
 0x69e   : > { %v2581_v57 = vmul.f32 0.01, %v2549_v52  ;;  %5304 = vmatprep.mubr.msk.f32.mxu1 %vm2335_vm14, %v2594_v3  ;;  %vm2565_vm0 = vcmp.ge.f32.partialorder %v2549_v52, 0.0 }
 0x69f   : > { %vm2564_vm5 = vcmp.ge.f32.partialorder %v2548_v61, 0.0  ;;  %v2580_v7 = vmul.f32 0.01, %v2548_v61  ;;  %v5280_v8 = vpop.f32.mrb[14].mxu0  ;;  %5305 = vmatmul.mubr.msk.f32.gmra.mrb[10].mxu1 %vm2335_vm14, %v2595_v4 }
 0x6a0   : > { %v2551_v9 = vadd.f32 %v5280_v8, %v6437_v58  ;;  %v2520_v10 = vpop.f32.mrb[15].mxu0  ;;  %v2597_v23 = vsel %vm2565_vm0, %v2549_v52, %v2581_v57 }
 0x6a1   : > { %v2550_v48 = vadd.f32 %v6437_v58, %v2520_v10  ;;  %v2596_v15 = vsel %vm2564_vm5, %v2548_v61, %v2580_v7 }
 0x6a2   : > { %v2583_v16 = vmul.f32 0.01, %v2551_v9  ;;  %5307 = vmatprep.mubr.msk.f32.mxu1 %vm2335_vm14, %v2596_v15  ;;  %vm2567_vm6 = vcmp.ge.f32.partialorder %v2551_v9, 0.0 }
 0x6a3   : > { %vm2566_vm7 = vcmp.ge.f32.partialorder %v2550_v48, 0.0  ;;  %v2582_v24 = vmul.f32 0.01, %v2550_v48  ;;  %5308 = vmatmul.mubr.msk.f32.gmra.mrb[12].mxu1 %vm2335_vm14, %v2597_v23 }
 0x6a4   : > { %v2599_v32 = vsel %vm2567_vm6, %v2551_v9, %v2583_v16 }
 0x6a5   : > { %v2598_v31 = vsel %vm2566_vm7, %v2550_v48, %v2582_v24 }
 0x6a6   : > { %5310 = vmatprep.mubr.msk.f32.mxu1 %vm2335_vm14, %v2598_v31 }
 0x6a7   : > { %5311 = vmatmul.mubr.msk.f32.gmra.mrb[14].mxu1 %vm2335_vm14, %v2599_v32 }
 0x75e   : > { %v5291_v36 = vpop.f32.mrb[0].mxu1 }
 0x75f   : > { %v2731_v58 = vadd.f32 %v5291_v36, %v6474_v35  ;;  %v2725_v39 = vpop.f32.mrb[1].mxu1 }
 0x760   : > { %v2726_v40 = vadd.f32 %v6474_v35, %v2725_v39 }
 0x761   : > { %v2821_v43 = vmul.f32 0.01, %v2731_v58  ;;  %vm2805_vm8 = vcmp.ge.f32.partialorder %v2731_v58, 0.0 }
 0x762   : > { %vm2804_vm9 = vcmp.ge.f32.partialorder %v2726_v40, 0.0  ;;  %v2820_v44 = vmul.f32 0.01, %v2726_v40  ;;  %v5294_v49 = vpop.f32.mrb[2].mxu1 }
 0x763   : > { %v2741_v50 = vadd.f32 %v5294_v49, %v6474_v35  ;;  %v2735_v51 = vpop.f32.mrb[3].mxu1  ;;  %v2837_v61 = vsel %vm2805_vm8, %v2731_v58, %v2821_v43 }
 0x764   : > { %v2736_v52 = vadd.f32 %v6474_v35, %v2735_v51  ;;  %v2836_v60 = vsel %vm2804_vm9, %v2726_v40, %v2820_v44 }
 0x765   : > { %v2823_v3 = vmul.f32 0.01, %v2741_v50  ;;  %5321 = vmatprep.mubr.msk.f32.mxu1 %vm2335_vm14, %v2836_v60  ;;  %vm2807_vm10 = vcmp.ge.f32.partialorder %v2741_v50, 0.0 }
 0x766   : > { %vm2806_vm11 = vcmp.ge.f32.partialorder %v2736_v52, 0.0  ;;  %v2822_v57 = vmul.f32 0.01, %v2736_v52  ;;  %v5297_v4 = vpop.f32.mrb[4].mxu1  ;;  %5322 = vmatmul.mubr.msk.f32.vlgmr.msra.gmra.mrb[16].mxu1 %vm2335_vm14, %v2837_v61 }
 0x767   : > { %v2751_v7 = vadd.f32 %v5297_v4, %v6474_v35  ;;  %v2745_v8 = vpop.f32.mrb[5].mxu1  ;;  %v2839_v15 = vsel %vm2807_vm10, %v2741_v50, %v2823_v3 }
 0x768   : > { %v2746_v9 = vadd.f32 %v6474_v35, %v2745_v8  ;;  %v2838_v10 = vsel %vm2806_vm11, %v2736_v52, %v2822_v57 }
 0x769   : > { %v2825_v48 = vmul.f32 0.01, %v2751_v7  ;;  %5324 = vmatprep.mubr.msk.f32.mxu1 %vm2335_vm14, %v2838_v10  ;;  %vm2809_vm12 = vcmp.ge.f32.partialorder %v2751_v7, 0.0 }
 0x76a   : > { %vm2808_vm13 = vcmp.ge.f32.partialorder %v2746_v9, 0.0  ;;  %v2824_v16 = vmul.f32 0.01, %v2746_v9  ;;  %v5300_v23 = vpop.f32.mrb[6].mxu1  ;;  %5325 = vmatmul.mubr.msk.f32.gmra.mrb[18].mxu1 %vm2335_vm14, %v2839_v15 }
 0x76b   : > { %v2761_v24 = vadd.f32 %v5300_v23, %v6474_v35  ;;  %v2755_v31 = vpop.f32.mrb[7].mxu1  ;;  %v2841_v39 = vsel %vm2809_vm12, %v2751_v7, %v2825_v48 }
 0x76c   : > { %v2756_v32 = vadd.f32 %v6474_v35, %v2755_v31  ;;  %v2840_v36 = vsel %vm2808_vm13, %v2746_v9, %v2824_v16 }
 0x76d   : > { %v2827_v58 = vmul.f32 0.01, %v2761_v24  ;;  %5327 = vmatprep.mubr.msk.f32.mxu1 %vm2335_vm14, %v2840_v36  ;;  %vm2811_vm15 = vcmp.ge.f32.partialorder %v2761_v24, 0.0 }
 0x76e   : > { %vm2810_vm0 = vcmp.ge.f32.partialorder %v2756_v32, 0.0  ;;  %v2826_v40 = vmul.f32 0.01, %v2756_v32  ;;  %v5303_v43 = vpop.f32.mrb[8].mxu1  ;;  %5328 = vmatmul.mubr.msk.f32.gmra.mrb[20].mxu1 %vm2335_vm14, %v2841_v39 }
 0x76f   : > { %v2771_v44 = vadd.f32 %v5303_v43, %v6474_v35  ;;  %v2765_v49 = vpop.f32.mrb[9].mxu1  ;;  %v2843_v60 = vsel %vm2811_vm15, %v2761_v24, %v2827_v58 }
 0x770   : > { %v2766_v50 = vadd.f32 %v6474_v35, %v2765_v49  ;;  %v2842_v51 = vsel %vm2810_vm0, %v2756_v32, %v2826_v40 }
 0x771   : > { %v2829_v52 = vmul.f32 0.01, %v2771_v44  ;;  %5330 = vmatprep.mubr.msk.f32.mxu1 %vm2335_vm14, %v2842_v51  ;;  %vm2813_vm5 = vcmp.ge.f32.partialorder %v2771_v44, 0.0 }
 0x772   : > { %vm2812_vm6 = vcmp.ge.f32.partialorder %v2766_v50, 0.0  ;;  %v2828_v61 = vmul.f32 0.01, %v2766_v50  ;;  %v5306_v3 = vpop.f32.mrb[10].mxu1  ;;  %5331 = vmatmul.mubr.msk.f32.gmra.mrb[22].mxu1 %vm2335_vm14, %v2843_v60 }
 0x773   : > { %v2781_v57 = vadd.f32 %v5306_v3, %v6474_v35  ;;  %v2775_v4 = vpop.f32.mrb[11].mxu1  ;;  %v2845_v10 = vsel %vm2813_vm5, %v2771_v44, %v2829_v52  ;;  %v5925_v3 = vmov 1.0  }
 0x774   : > { %v2776_v7 = vadd.f32 %v6474_v35, %v2775_v4  ;;  %v2844_v8 = vsel %vm2812_vm6, %v2766_v50, %v2828_v61  ;;  %5377 = vmatprep.mubr.msk.f32.mxu0 %vm2120_vm1, %v5925_v3 }
 0x775   : > { %v2831_v9 = vmul.f32 0.01, %v2781_v57  ;;  %5333 = vmatprep.mubr.msk.f32.mxu1 %vm2335_vm14, %v2844_v8  ;;  %vm2815_vm7 = vcmp.ge.f32.partialorder %v2781_v57, 0.0 }
 0x776   : > { %vm2814_vm8 = vcmp.ge.f32.partialorder %v2776_v7, 0.0  ;;  %v2830_v48 = vmul.f32 0.01, %v2776_v7  ;;  %v5309_v15 = vpop.f32.mrb[12].mxu1  ;;  %5334 = vmatmul.mubr.msk.f32.gmra.mrb[24].mxu1 %vm2335_vm14, %v2845_v10 }
 0x777   : > { %v2791_v16 = vadd.f32 %v5309_v15, %v6474_v35  ;;  %v2785_v23 = vpop.f32.mrb[13].mxu1  ;;  %v2847_v36 = vsel %vm2815_vm7, %v2781_v57, %v2831_v9 }
 0x778   : > { %v2786_v24 = vadd.f32 %v6474_v35, %v2785_v23  ;;  %v2846_v31 = vsel %vm2814_vm8, %v2776_v7, %v2830_v48 }
 0x779   : > { %v2833_v32 = vmul.f32 0.01, %v2791_v16  ;;  %5336 = vmatprep.mubr.msk.f32.mxu1 %vm2335_vm14, %v2846_v31  ;;  %vm2817_vm9 = vcmp.ge.f32.partialorder %v2791_v16, 0.0 }
 0x77a   : > { %vm2816_vm10 = vcmp.ge.f32.partialorder %v2786_v24, 0.0  ;;  %v2832_v58 = vmul.f32 0.01, %v2786_v24  ;;  %v5312_v39 = vpop.f32.mrb[14].mxu1  ;;  %5337 = vmatmul.mubr.msk.f32.gmra.mrb[26].mxu1 %vm2335_vm14, %v2847_v36 }
 0x77b   : > { %v2801_v40 = vadd.f32 %v5312_v39, %v6474_v35  ;;  %v2795_v43 = vpop.f32.mrb[15].mxu1  ;;  %v2849_v51 = vsel %vm2817_vm9, %v2791_v16, %v2833_v32 }
 0x77c   : > { %v2796_v44 = vadd.f32 %v6474_v35, %v2795_v43  ;;  %v2848_v49 = vsel %vm2816_vm10, %v2786_v24, %v2832_v58  ;;  %v4781_v35 = vld [vmem:[%s6778_s1] ss:$0 sm:$0xff] }
 0x77d   : > { %v2835_v50 = vmul.f32 0.01, %v2801_v40  ;;  %5339 = vmatprep.mubr.msk.f32.mxu1 %vm2335_vm14, %v2848_v49  ;;  %vm2819_vm11 = vcmp.ge.f32.partialorder %v2801_v40, 0.0 }
 0x77e   : > { %vm2818_vm12 = vcmp.ge.f32.partialorder %v2796_v44, 0.0  ;;  %v2834_v52 = vmul.f32 0.01, %v2796_v44  ;;  %5340 = vmatmul.mubr.msk.f32.gmra.mrb[28].mxu1 %vm2335_vm14, %v2849_v51 }
 0x77f   : > { %v2851_v61 = vsel %vm2819_vm11, %v2801_v40, %v2835_v50 }
 0x780   : > { %v2850_v60 = vsel %vm2818_vm12, %v2796_v44, %v2834_v52 }
 0x781   : > { %5342 = vmatprep.mubr.msk.f32.mxu1 %vm2335_vm14, %v2850_v60 }
 0x782   : > { %5343 = vmatmul.mubr.msk.f32.gmra.mrb[30].mxu1 %vm2335_vm14, %v2851_v61  ;;  %vm3149_vm14 = vcmask 64512  }
 0x839   : > { %v5323_v57 = vpop.f32.mrb[16].mxu1 }
 0x83a   : > { %v2983_v4 = vadd.f32 %v5323_v57, %v4781_v35  ;;  %v2977_v7 = vpop.f32.mrb[17].mxu1 }
 0x83b   : > { %v2978_v8 = vadd.f32 %v4781_v35, %v2977_v7 }
 0x83d   : > { %v5613_v9 = vpack.c.bf16 %v2983_v4, %v2978_v8  ;;  %v5326_v10 = vpop.f32.mrb[18].mxu1 }
 0x83e   : > { %v2993_v48 = vadd.f32 %v5326_v10, %v4781_v35  ;;  %v2987_v15 = vpop.f32.mrb[19].mxu1 }
 0x83f   : > { %v2988_v16 = vadd.f32 %v4781_v35, %v2987_v15  ;;  %5614 = vmatprep.subr.bf16.mxu0 %v5613_v9 }
 0x840   : > { %5616 = vmatpush3.bf16.msra.mxu0 %v5613_v9 }
 0x841   : > { %v5617_v23 = vpack.c.bf16 %v2993_v48, %v2988_v16  ;;  %v5329_v24 = vpop.f32.mrb[20].mxu1 }
 0x842   : > { %v3003_v31 = vadd.f32 %v5329_v24, %v4781_v35  ;;  %v2997_v32 = vpop.f32.mrb[21].mxu1 }
 0x843   : > { %v2998_v36 = vadd.f32 %v4781_v35, %v2997_v32  ;;  %5618 = vmatprep.subr.bf16.mxu0 %v5617_v23 }
 0x844   : > { %5620 = vmatpush3.bf16.msra.mxu0 %v5617_v23 }
 0x845   : > { %v5621_v58 = vpack.c.bf16 %v3003_v31, %v2998_v36  ;;  %v5332_v39 = vpop.f32.mrb[22].mxu1 }
 0x846   : > { %v3013_v40 = vadd.f32 %v5332_v39, %v4781_v35  ;;  %v3007_v43 = vpop.f32.mrb[23].mxu1  ;;  %v3057_v39 = vld [vmem:[#allocation4 + $0x8] sm:$0xff] }
 0x847   : > { %v3008_v44 = vadd.f32 %v4781_v35, %v3007_v43  ;;  %5622 = vmatprep.subr.bf16.mxu0 %v5621_v58 }
 0x848   : > { %5624 = vmatpush3.bf16.msra.mxu0 %v5621_v58 }
 0x849   : > { %v5625_v49 = vpack.c.bf16 %v3013_v40, %v3008_v44  ;;  %v5335_v50 = vpop.f32.mrb[24].mxu1  ;;  %v3056_v40 = vld [vmem:[#allocation4] sm:$0xff] }
 0x84a   : > { %v3023_v51 = vadd.f32 %v5335_v50, %v4781_v35  ;;  %v3017_v52 = vpop.f32.mrb[25].mxu1  ;;  %v3059_v50 = vld [vmem:[#allocation4 + $0x18] sm:$0xff] }
 0x84b   : > { %v3018_v60 = vadd.f32 %v4781_v35, %v3017_v52  ;;  %5626 = vmatprep.subr.bf16.mxu0 %v5625_v49 }
 0x84c   : > { %5628 = vmatpush3.bf16.msra.mxu0 %v5625_v49 }
 0x84d   : > { %v5629_v61 = vpack.c.bf16 %v3023_v51, %v3018_v60  ;;  %v5338_v57 = vpop.f32.mrb[26].mxu1  ;;  %v3058_v51 = vld [vmem:[#allocation4 + $0x10] sm:$0xff] }
 0x84e   : > { %v3033_v4 = vadd.f32 %v5338_v57, %v4781_v35  ;;  %v3027_v7 = vpop.f32.mrb[27].mxu1 }
 0x84f   : > { %v3028_v8 = vadd.f32 %v4781_v35, %v3027_v7  ;;  %5630 = vmatprep.subr.bf16.mxu0 %v5629_v61 }
 0x850   : > { %5632 = vmatpush3.bf16.msra.mxu0 %v5629_v61 }
 0x851   : > { %v5633_v9 = vpack.c.bf16 %v3033_v4, %v3028_v8  ;;  %v5341_v10 = vpop.f32.mrb[28].mxu1 }
 0x852   : > { %v3043_v48 = vadd.f32 %v5341_v10, %v4781_v35  ;;  %v3037_v15 = vpop.f32.mrb[29].mxu1 }
 0x853   : > { %v3038_v16 = vadd.f32 %v4781_v35, %v3037_v15  ;;  %5634 = vmatprep.subr.bf16.mxu0 %v5633_v9 }
 0x854   : > { %5636 = vmatpush3.bf16.msra.mxu0 %v5633_v9 }
 0x855   : > { %v5637_v23 = vpack.c.bf16 %v3043_v48, %v3038_v16  ;;  %v5344_v24 = vpop.f32.mrb[30].mxu1 }
 0x856   : > { %v3053_v31 = vadd.f32 %v5344_v24, %v4781_v35  ;;  %v3047_v32 = vpop.f32.mrb[31].mxu1 }
 0x857   : > { %v3048_v36 = vadd.f32 %v4781_v35, %v3047_v32  ;;  %5638 = vmatprep.subr.bf16.mxu0 %v5637_v23 }
 0x858   : > { %5640 = vmatpush3.bf16.msra.mxu0 %v5637_v23 }
 0x859   : > { %v5641_v58 = vpack.c.bf16 %v3053_v31, %v3048_v36 }
 0x85b   : > { %5642 = vmatprep.subr.bf16.mxu0 %v5641_v58 }
 0x85c   : > { %5644 = vmatpush3.bf16.msra.mxu0 %v5641_v58 }
 0x85f   : > { %5378 = vmatmul.mubr.msk.f32.vlgmr.msra.gmra.mrb[16].mxu0 %vm2121_vm2, %v5925_v3 }
 0x860   : > { %5380 = vmatprep.mubr.msk.f32.mxu0 %vm2122_vm3, %v5925_v3 }
 0x863   : > { %5381 = vmatmul.mubr.msk.f32.gmra.mrb[18].mxu0 %vm2123_vm4, %v5925_v3 }
 0x932   : > { %v5379_v35 = vpop.f32.mrb[16].mxu0 }
 0x933   : > { %v3146_v43 = vadd.f32 %v5379_v35, %v3057_v39  ;;  %v3126_v44 = vpop.f32.mrb[17].mxu0 }
 0x934   : > { %v3145_v49 = vadd.f32 %v3126_v44, %v3056_v40 }
 0x935   : > { %3151 = vst.msk [vmem:[#allocation4 + $0x8] sm:$0xff] %vm3149_vm14, %v3146_v43 }
 0x936   : > { %3150 = vst.msk [vmem:[#allocation4] sm:$0xff] %vm3149_vm14, %v3145_v49  ;;  %v5382_v52 = vpop.f32.mrb[18].mxu0 }
 0x937   : > { %v3148_v60 = vadd.f32 %v5382_v52, %v3059_v50  ;;  %v3136_v61 = vpop.f32.mrb[19].mxu0 }
 0x938   : > { %v3147_v57 = vadd.f32 %v3136_v61, %v3058_v51 }
 0x939   : > { %3153 = vst.msk [vmem:[#allocation4 + $0x18] sm:$0xff] %vm3149_vm14, %v3148_v60 }
 0x93a   : > { %3152 = vst.msk [vmem:[#allocation4 + $0x10] sm:$0xff] %vm3149_vm14, %v3147_v57 }
 0x93b PF: > { %p4802_p13 = scmp.ne.s32.totalorder %s5871_s16, 1 }
 0x93c   : > { %s6779_s28 = sld [smem:[#allocation15_spill]] (!%p4802_p13)  ;;  %vm3163_vm13 = vcmask (!%p4802_p13), 130048   ;;  %v3157_v7 = vld [vmem:[#allocation3] sm:$0xff] (!%p4802_p13)  ;;  %v3158_v9 = vld [vmem:[#allocation3 + $0x8] sm:$0xff] (!%p4802_p13)  ;;  %v3159_v48 = vld [vmem:[#allocation3 + $0x10] sm:$0xff] (!%p4802_p13)  ;;  %vm3357_vm15 = vcmask (!%p4802_p13), 261120  }
 0x93d   : > { %3156 = sbr.rel (%p4802_p13) target bundleno = 3316 (0xcf4), region = 172  ;;  %5387 = vmatprep.mubr.msk.f32.mxu0 (!%p4802_p13), %vm3163_vm13, %v6323_v5  ;;  %v5649_v10 = vpack.c.bf16 (!%p4802_p13), %v3158_v9, %v3157_v7  ;;  %v3160_v15 = vld [vmem:[#allocation3 + $0x18] sm:$0xff] (!%p4802_p13)  ;;  %s6780_s7 = sld [smem:[#allocation17_spill]] (!%p4802_p13) }
 0x93e   : > { %v5653_v16 = vpack.c.bf16 (!%p4802_p13), %v3160_v15, %v3159_v48  ;;  %s6781_s1 = sld [smem:[#allocation19_spill]] (!%p4802_p13)  ;;  %s6782_s2 = sld [smem:[#allocation16_spill]] (!%p4802_p13) }
 0x942   : > { %v3161_v3 = vld [vmem:[%s6779_s28] sm:$0xff] (!%p4802_p13)  ;;  %v3162_v4 = vld [vmem:[%s6779_s28 + $0x8] sm:$0xff] (!%p4802_p13) }
 0x943   : > { %v5645_v8 = vpack.c.bf16 (!%p4802_p13), %v3162_v4, %v3161_v3 }
 0x945   : > { %5646 = vmatprep.subr.bf16.mxu0 %v5645_v8 }
 0x946   : > { %5648 = vmatpush3.bf16.msra.mxu0 %v5645_v8 }
 0x947   : > { %5650 = vmatprep.subr.bf16.mxu0 %v5649_v10 }
 0x949   : > { %5388 = vmatmul.mubr.msk.f32.vlgmr.msra.gmra.mrb[0].mxu0 %vm3163_vm13, %v6319_v1 }
 0x94a   : > { %5652 = vmatpush3.bf16.msra.mxu0 %v5649_v10  ;;  %5390 = vmatprep.mubr.msk.f32.mxu0 %vm3163_vm13, %v6335_v27 }
 0x94b   : > { %5654 = vmatprep.subr.bf16.mxu0 %v5653_v16 }
 0x94d   : > { %5391 = vmatmul.mubr.msk.f32.gmra.mrb[2].mxu0 %vm3163_vm13, %v6331_v19 }
 0x94e   : > { %5393 = vmatprep.mubr.msk.f32.mxu0 %vm3163_vm13, %v6349_v63  ;;  %5656 = vmatpush3.bf16.msra.mxu0 %v5653_v16 }
 0x951   : > { %5394 = vmatmul.mubr.msk.f32.gmra.mrb[4].mxu0 %vm3163_vm13, %v6343_v53 }
 0x952   : > { %5396 = vmatprep.mubr.msk.f32.mxu0 %vm3163_vm13, %v6359_v13 }
 0x955   : > { %5397 = vmatmul.mubr.msk.f32.gmra.mrb[6].mxu0 %vm3163_vm13, %v6355_v11 }
 0x956   : > { %5399 = vmatprep.mubr.msk.f32.mxu0 %vm3163_vm13, %v6325_v6 }
 0x959   : > { %5400 = vmatmul.mubr.msk.f32.gmra.mrb[8].mxu0 %vm3163_vm13, %v6321_v2 }
 0x95a   : > { %5402 = vmatprep.mubr.msk.f32.mxu0 %vm3163_vm13, %v6337_v28  ;;  %v3876_v28 = vld [vmem:[%s6781_s1 + $0x10] sm:$0xff] }
 0x95d   : > { %5403 = vmatmul.mubr.msk.f32.gmra.mrb[10].mxu0 %vm3163_vm13, %v6333_v20 }
 0x95e   : > { %5405 = vmatprep.mubr.msk.f32.mxu0 %vm3163_vm13, %v6351_v0 }
 0x961   : > { %5406 = vmatmul.mubr.msk.f32.gmra.mrb[12].mxu0 %vm3163_vm13, %v6345_v54 }
 0x962   : > { %5408 = vmatprep.mubr.msk.f32.mxu0 %vm3163_vm13, %v6361_v14 }
 0x965   : > { %5409 = vmatmul.mubr.msk.f32.gmra.mrb[14].mxu0 %vm3163_vm13, %v6357_v12 }
 0x966   : > { %5419 = vmatprep.mubr.msk.f32.mxu0 %vm3357_vm15, %v6282_v18  ;;  %v3623_v18 = vld [vmem:[%s6780_s7 + $0x8] sm:$0xff] }
 0x969   : > { %5420 = vmatmul.mubr.msk.f32.vlgmr.msra.gmra.mrb[0].mxu0 %vm3357_vm15, %v6286_v22  ;;  %v3624_v22 = vld [vmem:[%s6780_s7 + $0x10] sm:$0xff] }
 0x96a   : > { %5422 = vmatprep.mubr.msk.f32.mxu0 %vm3357_vm15, %v6280_v17  ;;  %v3622_v17 = vld [vmem:[%s6780_s7] sm:$0xff] }
 0x96d   : > { %5423 = vmatmul.mubr.msk.f32.gmra.mrb[2].mxu0 %vm3357_vm15, %v6284_v21  ;;  %v5657_v21 = vpack.c.bf16 %v3623_v18, %v3622_v17 }
 0x96e   : > { %5425 = vmatprep.mubr.msk.f32.mxu0 %vm3357_vm15, %v6290_v26 }
 0x96f   : > { %5658 = vmatprep.subr.bf16.mxu1 %v5657_v21 }
 0x970   : > { %5660 = vmatpush3.bf16.msra.mxu1 %v5657_v21 }
 0x971   : > { %5426 = vmatmul.mubr.msk.f32.gmra.mrb[4].mxu0 %vm3357_vm15, %v6288_v25  ;;  %v3625_v25 = vld [vmem:[%s6780_s7 + $0x18] sm:$0xff] }
 0x972   : > { %5428 = vmatprep.mubr.msk.f32.mxu0 %vm3357_vm15, %v6294_v30  ;;  %v5661_v26 = vpack.c.bf16 %v3625_v25, %v3624_v22  ;;  %v3875_v30 = vld [vmem:[%s6781_s1 + $0x8] sm:$0xff] }
 0x974   : > { %5662 = vmatprep.subr.bf16.mxu1 %v5661_v26 }
 0x975   : > { %5429 = vmatmul.mubr.msk.f32.gmra.mrb[6].mxu0 %vm3357_vm15, %v6292_v29  ;;  %5664 = vmatpush3.bf16.msra.mxu1 %v5661_v26  ;;  %v3874_v29 = vld [vmem:[%s6781_s1] sm:$0xff] }
 0x976   : > { %5431 = vmatprep.mubr.msk.f32.mxu0 %vm3357_vm15, %v6298_v34  ;;  %v6595_v34 = vld [vmem:[%s6782_s2] ss:$0 sm:$0xff]  ;;  %s6783_s2 = sld [smem:[#allocation18_spill]] }
 0x979   : > { %5432 = vmatmul.mubr.msk.f32.gmra.mrb[8].mxu0 %vm3357_vm15, %v6296_v33  ;;  %v5665_v33 = vpack.c.bf16 %v3875_v30, %v3874_v29 }
 0x97a   : > { %5434 = vmatprep.mubr.msk.f32.mxu0 %vm3357_vm15, %v6302_v38 }
 0x97b   : > { %5666 = vmatprep.subr.bf16.mxu1 %v5665_v33 }
 0x97d   : > { %5435 = vmatmul.mubr.msk.f32.gmra.mrb[10].mxu0 %vm3357_vm15, %v6300_v37 }
 0x97e   : > { %5437 = vmatprep.mubr.msk.f32.mxu0 %vm3357_vm15, %v6306_v42 }
 0x981   : > { %5438 = vmatmul.mubr.msk.f32.gmra.mrb[12].mxu0 %vm3357_vm15, %v6304_v41 }
 0x982   : > { %5440 = vmatprep.mubr.msk.f32.mxu0 %vm3357_vm15, %v6310_v47 }
 0x985   : > { %5441 = vmatmul.mubr.msk.f32.gmra.mrb[14].mxu0 %vm3357_vm15, %v6308_v46 }
 0xa3c   : > { %v5421_v37 = vpop.f32.mrb[0].mxu0 }
 0xa3d   : > { %v3559_v38 = vadd.f32 %v5421_v37, %v6595_v34  ;;  %v3472_v41 = vpop.f32.mrb[1].mxu0 }
 0xa3e   : > { %v3558_v42 = vadd.f32 %v6595_v34, %v3472_v41 }
 0xa3f   : > { %v3591_v46 = vmul.f32 0.01, %v3559_v38  ;;  %vm3575_vm0 = vcmp.ge.f32.partialorder %v3559_v38, 0.0 }
 0xa40   : > { %v5424_v47 = vpop.f32.mrb[2].mxu0  ;;  %vm3574_vm5 = vcmp.ge.f32.partialorder %v3558_v42, 0.0  ;;  %v3590_v1 = vmul.f32 0.01, %v3558_v42 }
 0xa41   : > { %v3561_v2 = vadd.f32 %v5424_v47, %v6595_v34  ;;  %v3482_v5 = vpop.f32.mrb[3].mxu0  ;;  %v3607_v27 = vsel %vm3575_vm0, %v3559_v38, %v3591_v46 }
 0xa42   : > { %v3560_v6 = vadd.f32 %v6595_v34, %v3482_v5  ;;  %v3606_v19 = vsel %vm3574_vm5, %v3558_v42, %v3590_v1 }
 0xa43   : > { %v3593_v20 = vmul.f32 0.01, %v3561_v2  ;;  %5451 = vmatprep.mubr.msk.f32.mxu1 %vm3357_vm15, %v3606_v19  ;;  %vm3577_vm6 = vcmp.ge.f32.partialorder %v3561_v2, 0.0 }
 0xa44   : > { %vm3576_vm7 = vcmp.ge.f32.partialorder %v3560_v6, 0.0  ;;  %v3592_v53 = vmul.f32 0.01, %v3560_v6  ;;  %v5427_v54 = vpop.f32.mrb[4].mxu0  ;;  %5452 = vmatmul.mubr.msk.f32.vlgmr.msra.gmra.mrb[0].mxu1 %vm3357_vm15, %v3607_v27 }
 0xa45   : > { %v3563_v63 = vadd.f32 %v5427_v54, %v6595_v34  ;;  %v3492_v0 = vpop.f32.mrb[5].mxu0  ;;  %5668 = vmatpush3.bf16.msra.mxu1 %v5665_v33  ;;  %v3609_v14 = vsel %vm3577_vm6, %v3561_v2, %v3593_v20  ;;  %v6631_v2 = vld [vmem:[%s6783_s2] ss:$0 sm:$0xff]  ;;  %s6784_s2 = sld [smem:[#allocation20_spill]] }
 0xa46   : > { %v3562_v11 = vadd.f32 %v6595_v34, %v3492_v0  ;;  %v3608_v12 = vsel %vm3576_vm7, %v3560_v6, %v3592_v53  ;;  %5479 = vmatprep.subr.mxu1 %v3876_v28 }
 0xa47   : > { %v3595_v13 = vmul.f32 0.01, %v3563_v63  ;;  %5454 = vmatprep.mubr.msk.f32.mxu1 %vm3357_vm15, %v3608_v12  ;;  %vm3579_vm8 = vcmp.ge.f32.partialorder %v3563_v63, 0.0 }
 0xa48   : > { %vm3578_vm9 = vcmp.ge.f32.partialorder %v3562_v11, 0.0  ;;  %v3594_v23 = vmul.f32 0.01, %v3562_v11  ;;  %v5430_v24 = vpop.f32.mrb[6].mxu0  ;;  %5455 = vmatmul.mubr.msk.f32.gmra.mrb[2].mxu1 %vm3357_vm15, %v3609_v14 }
 0xa49   : > { %v3565_v31 = vadd.f32 %v5430_v24, %v6595_v34  ;;  %v3502_v32 = vpop.f32.mrb[7].mxu0  ;;  %5480 = vmatpush3.msra.mxu1 %v3876_v28  ;;  %v3611_v40 = vsel %vm3579_vm8, %v3563_v63, %v3595_v13 }
 0xa4a   : > { %v3564_v36 = vadd.f32 %v6595_v34, %v3502_v32  ;;  %v3610_v58 = vsel %vm3578_vm9, %v3562_v11, %v3594_v23 }
 0xa4b   : > { %v3597_v39 = vmul.f32 0.01, %v3565_v31  ;;  %5457 = vmatprep.mubr.msk.f32.mxu1 %vm3357_vm15, %v3610_v58  ;;  %vm3581_vm10 = vcmp.ge.f32.partialorder %v3565_v31, 0.0 }
 0xa4c   : > { %vm3580_vm11 = vcmp.ge.f32.partialorder %v3564_v36, 0.0  ;;  %v3596_v35 = vmul.f32 0.01, %v3564_v36  ;;  %v5433_v43 = vpop.f32.mrb[8].mxu0  ;;  %5458 = vmatmul.mubr.msk.f32.gmra.mrb[4].mxu1 %vm3357_vm15, %v3611_v40 }
 0xa4d   : > { %v3567_v44 = vadd.f32 %v5433_v43, %v6595_v34  ;;  %v3512_v49 = vpop.f32.mrb[9].mxu0  ;;  %v3613_v60 = vsel %vm3581_vm10, %v3565_v31, %v3597_v39 }
 0xa4e   : > { %v3566_v50 = vadd.f32 %v6595_v34, %v3512_v49  ;;  %v3612_v51 = vsel %vm3580_vm11, %v3564_v36, %v3596_v35  ;;  %vm3884_vm11 = vcmask 195584  }
 0xa4f   : > { %v3599_v52 = vmul.f32 0.01, %v3567_v44  ;;  %5460 = vmatprep.mubr.msk.f32.mxu1 %vm3357_vm15, %v3612_v51  ;;  %vm3583_vm12 = vcmp.ge.f32.partialorder %v3567_v44, 0.0 }
 0xa50   : > { %vm3582_vm14 = vcmp.ge.f32.partialorder %v3566_v50, 0.0  ;;  %v3598_v61 = vmul.f32 0.01, %v3566_v50  ;;  %v5436_v57 = vpop.f32.mrb[10].mxu0  ;;  %5461 = vmatmul.mubr.msk.f32.gmra.mrb[6].mxu1 %vm3357_vm15, %v3613_v60 }
 0xa51   : > { %v3569_v3 = vadd.f32 %v5436_v57, %v6595_v34  ;;  %v3522_v4 = vpop.f32.mrb[11].mxu0  ;;  %v3615_v10 = vsel %vm3583_vm12, %v3567_v44, %v3599_v52 }
 0xa52   : > { %v3568_v7 = vadd.f32 %v6595_v34, %v3522_v4  ;;  %v3614_v8 = vsel %vm3582_vm14, %v3566_v50, %v3598_v61 }
 0xa53   : > { %v3601_v9 = vmul.f32 0.01, %v3569_v3  ;;  %5463 = vmatprep.mubr.msk.f32.mxu1 %vm3357_vm15, %v3614_v8  ;;  %vm3585_vm13 = vcmp.ge.f32.partialorder %v3569_v3, 0.0 }
 0xa54   : > { %vm3584_vm0 = vcmp.ge.f32.partialorder %v3568_v7, 0.0  ;;  %v3600_v48 = vmul.f32 0.01, %v3568_v7  ;;  %v5439_v15 = vpop.f32.mrb[12].mxu0  ;;  %5464 = vmatmul.mubr.msk.f32.gmra.mrb[8].mxu1 %vm3357_vm15, %v3615_v10 }
 0xa55   : > { %v3571_v16 = vadd.f32 %v5439_v15, %v6595_v34  ;;  %v3532_v17 = vpop.f32.mrb[13].mxu0  ;;  %v3617_v25 = vsel %vm3585_vm13, %v3569_v3, %v3601_v9 }
 0xa56   : > { %v3570_v18 = vadd.f32 %v6595_v34, %v3532_v17  ;;  %v3616_v21 = vsel %vm3584_vm0, %v3568_v7, %v3600_v48 }
 0xa57   : > { %v3603_v22 = vmul.f32 0.01, %v3571_v16  ;;  %5466 = vmatprep.mubr.msk.f32.mxu1 %vm3357_vm15, %v3616_v21  ;;  %vm3587_vm5 = vcmp.ge.f32.partialorder %v3571_v16, 0.0 }
 0xa58   : > { %vm3586_vm6 = vcmp.ge.f32.partialorder %v3570_v18, 0.0  ;;  %v3602_v26 = vmul.f32 0.01, %v3570_v18  ;;  %v5442_v29 = vpop.f32.mrb[14].mxu0  ;;  %5467 = vmatmul.mubr.msk.f32.gmra.mrb[10].mxu1 %vm3357_vm15, %v3617_v25 }
 0xa59   : > { %v3573_v30 = vadd.f32 %v5442_v29, %v6595_v34  ;;  %v3542_v33 = vpop.f32.mrb[15].mxu0  ;;  %v3619_v42 = vsel %vm3587_vm5, %v3571_v16, %v3603_v22 }
 0xa5a   : > { %v3572_v37 = vadd.f32 %v6595_v34, %v3542_v33  ;;  %v3618_v38 = vsel %vm3586_vm6, %v3570_v18, %v3602_v26 }
 0xa5b   : > { %v3605_v41 = vmul.f32 0.01, %v3573_v30  ;;  %5469 = vmatprep.mubr.msk.f32.mxu1 %vm3357_vm15, %v3618_v38  ;;  %vm3589_vm7 = vcmp.ge.f32.partialorder %v3573_v30, 0.0 }
 0xa5c   : > { %vm3588_vm8 = vcmp.ge.f32.partialorder %v3572_v37, 0.0  ;;  %v3604_v46 = vmul.f32 0.01, %v3572_v37  ;;  %5470 = vmatmul.mubr.msk.f32.gmra.mrb[12].mxu1 %vm3357_vm15, %v3619_v42 }
 0xa5d   : > { %v3621_v1 = vsel %vm3589_vm7, %v3573_v30, %v3605_v41 }
 0xa5e   : > { %v3620_v47 = vsel %vm3588_vm8, %v3572_v37, %v3604_v46 }
 0xa5f   : > { %5472 = vmatprep.mubr.msk.f32.mxu1 %vm3357_vm15, %v3620_v47 }
 0xa60   : > { %5473 = vmatmul.mubr.msk.f32.gmra.mrb[14].mxu1 %vm3357_vm15, %v3621_v1 }
 0xb17   : > { %v5453_v5 = vpop.f32.mrb[0].mxu1 }
 0xb18   : > { %v3753_v34 = vadd.f32 %v5453_v5, %v6631_v2  ;;  %v3747_v6 = vpop.f32.mrb[1].mxu1 }
 0xb19   : > { %v3748_v19 = vadd.f32 %v6631_v2, %v3747_v6 }
 0xb1a   : > { %v3843_v20 = vmul.f32 0.01, %v3753_v34  ;;  %vm3827_vm9 = vcmp.ge.f32.partialorder %v3753_v34, 0.0 }
 0xb1b   : > { %vm3826_vm10 = vcmp.ge.f32.partialorder %v3748_v19, 0.0  ;;  %v3842_v27 = vmul.f32 0.01, %v3748_v19  ;;  %v5456_v28 = vpop.f32.mrb[2].mxu1 }
 0xb1c   : > { %v3763_v53 = vadd.f32 %v5456_v28, %v6631_v2  ;;  %v3757_v54 = vpop.f32.mrb[3].mxu1  ;;  %v3859_v11 = vsel %vm3827_vm9, %v3753_v34, %v3843_v20  ;;  %v5926_v28 = vmov 1.0  }
 0xb1d   : > { %v3758_v63 = vadd.f32 %v6631_v2, %v3757_v54  ;;  %v3858_v0 = vsel %vm3826_vm10, %v3748_v19, %v3842_v27  ;;  %5537 = vmatprep.mubr.msk.f32.mxu0 %vm2120_vm1, %v5926_v28  ;;  %vm4171_vm1 = vcmask 31744  }
 0xb1e   : > { %v3845_v12 = vmul.f32 0.01, %v3763_v53  ;;  %5481 = vmatprep.mubr.msk.f32.mxu1 %vm3884_vm11, %v3858_v0  ;;  %vm3829_vm15 = vcmp.ge.f32.partialorder %v3763_v53, 0.0 }
 0xb1f   : > { %vm3828_vm12 = vcmp.ge.f32.partialorder %v3758_v63, 0.0  ;;  %v3844_v13 = vmul.f32 0.01, %v3758_v63  ;;  %v5459_v14 = vpop.f32.mrb[4].mxu1  ;;  %5482 = vmatmul.mubr.msk.f32.vlgmr.msra.gmra.mrb[16].mxu1 %vm3884_vm11, %v3859_v11 }
 0xb20   : > { %v3773_v23 = vadd.f32 %v5459_v14, %v6631_v2  ;;  %v3767_v24 = vpop.f32.mrb[5].mxu1  ;;  %v3861_v58 = vsel %vm3829_vm15, %v3763_v53, %v3845_v12 }
 0xb21   : > { %v3768_v31 = vadd.f32 %v6631_v2, %v3767_v24  ;;  %v3860_v32 = vsel %vm3828_vm12, %v3758_v63, %v3844_v13 }
 0xb22   : > { %v3847_v36 = vmul.f32 0.01, %v3773_v23  ;;  %5484 = vmatprep.mubr.msk.f32.mxu1 %vm3884_vm11, %v3860_v32  ;;  %vm3831_vm14 = vcmp.ge.f32.partialorder %v3773_v23, 0.0 }
 0xb23   : > { %vm3830_vm13 = vcmp.ge.f32.partialorder %v3768_v31, 0.0  ;;  %v3846_v39 = vmul.f32 0.01, %v3768_v31  ;;  %v5462_v40 = vpop.f32.mrb[6].mxu1  ;;  %5485 = vmatmul.mubr.msk.f32.gmra.mrb[18].mxu1 %vm3884_vm11, %v3861_v58 }
 0xb24   : > { %v3783_v35 = vadd.f32 %v5462_v40, %v6631_v2  ;;  %v3777_v43 = vpop.f32.mrb[7].mxu1  ;;  %v3863_v51 = vsel %vm3831_vm14, %v3773_v23, %v3847_v36 }
 0xb25   : > { %v3778_v44 = vadd.f32 %v6631_v2, %v3777_v43  ;;  %v3862_v49 = vsel %vm3830_vm13, %v3768_v31, %v3846_v39 }
 0xb26   : > { %v3849_v50 = vmul.f32 0.01, %v3783_v35  ;;  %5487 = vmatprep.mubr.msk.f32.mxu1 %vm3884_vm11, %v3862_v49  ;;  %vm3833_vm0 = vcmp.ge.f32.partialorder %v3783_v35, 0.0 }
 0xb27   : > { %vm3832_vm5 = vcmp.ge.f32.partialorder %v3778_v44, 0.0  ;;  %v3848_v52 = vmul.f32 0.01, %v3778_v44  ;;  %v5465_v60 = vpop.f32.mrb[8].mxu1  ;;  %5488 = vmatmul.mubr.msk.f32.gmra.mrb[20].mxu1 %vm3884_vm11, %v3863_v51 }
 0xb28   : > { %v3793_v61 = vadd.f32 %v5465_v60, %v6631_v2  ;;  %v3787_v57 = vpop.f32.mrb[9].mxu1  ;;  %v3865_v8 = vsel %vm3833_vm0, %v3783_v35, %v3849_v50 }
 0xb29   : > { %v3788_v3 = vadd.f32 %v6631_v2, %v3787_v57  ;;  %v3864_v4 = vsel %vm3832_vm5, %v3778_v44, %v3848_v52 }
 0xb2a   : > { %v3851_v7 = vmul.f32 0.01, %v3793_v61  ;;  %5490 = vmatprep.mubr.msk.f32.mxu1 %vm3884_vm11, %v3864_v4  ;;  %vm3835_vm6 = vcmp.ge.f32.partialorder %v3793_v61, 0.0 }
 0xb2b   : > { %vm3834_vm7 = vcmp.ge.f32.partialorder %v3788_v3, 0.0  ;;  %v3850_v9 = vmul.f32 0.01, %v3788_v3  ;;  %v5468_v10 = vpop.f32.mrb[10].mxu1  ;;  %5491 = vmatmul.mubr.msk.f32.gmra.mrb[22].mxu1 %vm3884_vm11, %v3865_v8 }
 0xb2c   : > { %v3803_v48 = vadd.f32 %v5468_v10, %v6631_v2  ;;  %v3797_v15 = vpop.f32.mrb[11].mxu1  ;;  %v3867_v21 = vsel %vm3835_vm6, %v3793_v61, %v3851_v7 }
 0xb2d   : > { %v3798_v16 = vadd.f32 %v6631_v2, %v3797_v15  ;;  %v3866_v17 = vsel %vm3834_vm7, %v3788_v3, %v3850_v9 }
 0xb2e   : > { %v3853_v18 = vmul.f32 0.01, %v3803_v48  ;;  %5493 = vmatprep.mubr.msk.f32.mxu1 %vm3884_vm11, %v3866_v17  ;;  %vm3837_vm8 = vcmp.ge.f32.partialorder %v3803_v48, 0.0 }
 0xb2f   : > { %vm3836_vm9 = vcmp.ge.f32.partialorder %v3798_v16, 0.0  ;;  %v3852_v22 = vmul.f32 0.01, %v3798_v16  ;;  %v5471_v25 = vpop.f32.mrb[12].mxu1  ;;  %5494 = vmatmul.mubr.msk.f32.gmra.mrb[24].mxu1 %vm3884_vm11, %v3867_v21 }
 0xb30   : > { %v3813_v26 = vadd.f32 %v5471_v25, %v6631_v2  ;;  %v3807_v29 = vpop.f32.mrb[13].mxu1  ;;  %v3869_v38 = vsel %vm3837_vm8, %v3803_v48, %v3853_v18  ;;  %v4079_v25 = vld [vmem:[#allocation5 + $0x8] sm:$0xff] }
 0xb31   : > { %v3808_v30 = vadd.f32 %v6631_v2, %v3807_v29  ;;  %v3868_v33 = vsel %vm3836_vm9, %v3798_v16, %v3852_v22 }
 0xb32   : > { %v3855_v37 = vmul.f32 0.01, %v3813_v26  ;;  %5496 = vmatprep.mubr.msk.f32.mxu1 %vm3884_vm11, %v3868_v33  ;;  %vm3839_vm10 = vcmp.ge.f32.partialorder %v3813_v26, 0.0 }
 0xb33   : > { %vm3838_vm15 = vcmp.ge.f32.partialorder %v3808_v30, 0.0  ;;  %v3854_v41 = vmul.f32 0.01, %v3808_v30  ;;  %v5474_v42 = vpop.f32.mrb[14].mxu1  ;;  %5497 = vmatmul.mubr.msk.f32.gmra.mrb[26].mxu1 %vm3884_vm11, %v3869_v38  ;;  %v4081_v38 = vld [vmem:[#allocation5 + $0x18] sm:$0xff] }
 0xb34   : > { %v3823_v46 = vadd.f32 %v5474_v42, %v6631_v2  ;;  %v3817_v47 = vpop.f32.mrb[15].mxu1  ;;  %v3871_v6 = vsel %vm3839_vm10, %v3813_v26, %v3855_v37  ;;  %v4078_v26 = vld [vmem:[#allocation5] sm:$0xff] }
 0xb35   : > { %v3818_v1 = vadd.f32 %v6631_v2, %v3817_v47  ;;  %v3870_v5 = vsel %vm3838_vm15, %v3808_v30, %v3854_v41  ;;  %v4853_v2 = vld [vmem:[%s6784_s2] ss:$0 sm:$0xff]  ;;  %v4080_v41 = vld [vmem:[#allocation5 + $0x10] sm:$0xff] }
 0xb36   : > { %v3857_v34 = vmul.f32 0.01, %v3823_v46  ;;  %5499 = vmatprep.mubr.msk.f32.mxu1 %vm3884_vm11, %v3870_v5  ;;  %vm3841_vm12 = vcmp.ge.f32.partialorder %v3823_v46, 0.0 }
 0xb37   : > { %vm3840_vm14 = vcmp.ge.f32.partialorder %v3818_v1, 0.0  ;;  %v3856_v19 = vmul.f32 0.01, %v3818_v1  ;;  %5500 = vmatmul.mubr.msk.f32.gmra.mrb[28].mxu1 %vm3884_vm11, %v3871_v6 }
 0xb38   : > { %v3873_v27 = vsel %vm3841_vm12, %v3823_v46, %v3857_v34 }
 0xb39   : > { %v3872_v20 = vsel %vm3840_vm14, %v3818_v1, %v3856_v19 }
 0xb3a   : > { %5502 = vmatprep.mubr.msk.f32.mxu1 %vm3884_vm11, %v3872_v20 }
 0xb3b   : > { %5503 = vmatmul.mubr.msk.f32.gmra.mrb[30].mxu1 %vm3884_vm11, %v3873_v27 }
 0xbf2   : > { %v5483_v53 = vpop.f32.mrb[16].mxu1 }
 0xbf3   : > { %v4005_v54 = vadd.f32 %v5483_v53, %v4853_v2  ;;  %v3999_v63 = vpop.f32.mrb[17].mxu1 }
 0xbf4   : > { %v4000_v0 = vadd.f32 %v4853_v2, %v3999_v63 }
 0xbf6   : > { %v5669_v11 = vpack.c.bf16 %v4005_v54, %v4000_v0  ;;  %v5486_v12 = vpop.f32.mrb[18].mxu1 }
 0xbf7   : > { %v4015_v13 = vadd.f32 %v5486_v12, %v4853_v2  ;;  %v4009_v14 = vpop.f32.mrb[19].mxu1 }
 0xbf8   : > { %v4010_v23 = vadd.f32 %v4853_v2, %v4009_v14  ;;  %5670 = vmatprep.subr.bf16.mxu0 %v5669_v11 }
 0xbf9   : > { %5672 = vmatpush3.bf16.msra.mxu0 %v5669_v11 }
 0xbfa   : > { %v5673_v24 = vpack.c.bf16 %v4015_v13, %v4010_v23  ;;  %v5489_v31 = vpop.f32.mrb[20].mxu1 }
 0xbfb   : > { %v4025_v32 = vadd.f32 %v5489_v31, %v4853_v2  ;;  %v4019_v36 = vpop.f32.mrb[21].mxu1 }
 0xbfc   : > { %v4020_v58 = vadd.f32 %v4853_v2, %v4019_v36  ;;  %5674 = vmatprep.subr.bf16.mxu0 %v5673_v24 }
 0xbfd   : > { %5676 = vmatpush3.bf16.msra.mxu0 %v5673_v24 }
 0xbfe   : > { %v5677_v45 = vpack.c.bf16 %v4025_v32, %v4020_v58  ;;  %v5492_v39 = vpop.f32.mrb[22].mxu1 }
 0xbff   : > { %v4035_v40 = vadd.f32 %v5492_v39, %v4853_v2  ;;  %v4029_v35 = vpop.f32.mrb[23].mxu1 }
 0xc00   : > { %v4030_v43 = vadd.f32 %v4853_v2, %v4029_v35  ;;  %5678 = vmatprep.subr.bf16.mxu0 %v5677_v45 }
 0xc01   : > { %5680 = vmatpush3.bf16.msra.mxu0 %v5677_v45 }
 0xc02   : > { %v5681_v44 = vpack.c.bf16 %v4035_v40, %v4030_v43  ;;  %v5495_v49 = vpop.f32.mrb[24].mxu1 }
 0xc03   : > { %v4045_v50 = vadd.f32 %v5495_v49, %v4853_v2  ;;  %v4039_v51 = vpop.f32.mrb[25].mxu1 }
 0xc04   : > { %v4040_v52 = vadd.f32 %v4853_v2, %v4039_v51  ;;  %5682 = vmatprep.subr.bf16.mxu0 %v5681_v44 }
 0xc05   : > { %5684 = vmatpush3.bf16.msra.mxu0 %v5681_v44 }
 0xc06   : > { %v5685_v60 = vpack.c.bf16 %v4045_v50, %v4040_v52  ;;  %v5498_v61 = vpop.f32.mrb[26].mxu1 }
 0xc07   : > { %v4055_v57 = vadd.f32 %v5498_v61, %v4853_v2  ;;  %v4049_v3 = vpop.f32.mrb[27].mxu1 }
 0xc08   : > { %v4050_v4 = vadd.f32 %v4853_v2, %v4049_v3  ;;  %5686 = vmatprep.subr.bf16.mxu0 %v5685_v60 }
 0xc09   : > { %5688 = vmatpush3.bf16.msra.mxu0 %v5685_v60 }
 0xc0a   : > { %v5689_v7 = vpack.c.bf16 %v4055_v57, %v4050_v4  ;;  %v5501_v8 = vpop.f32.mrb[28].mxu1 }
 0xc0b   : > { %v4065_v9 = vadd.f32 %v5501_v8, %v4853_v2  ;;  %v4059_v10 = vpop.f32.mrb[29].mxu1 }
 0xc0c   : > { %v4060_v48 = vadd.f32 %v4853_v2, %v4059_v10  ;;  %5690 = vmatprep.subr.bf16.mxu0 %v5689_v7 }
 0xc0d   : > { %5692 = vmatpush3.bf16.msra.mxu0 %v5689_v7 }
 0xc0e   : > { %v5693_v15 = vpack.c.bf16 %v4065_v9, %v4060_v48  ;;  %v5504_v16 = vpop.f32.mrb[30].mxu1 }
 0xc0f   : > { %v4075_v17 = vadd.f32 %v5504_v16, %v4853_v2  ;;  %v4069_v18 = vpop.f32.mrb[31].mxu1 }
 0xc10   : > { %v4070_v21 = vadd.f32 %v4853_v2, %v4069_v18  ;;  %5694 = vmatprep.subr.bf16.mxu0 %v5693_v15 }
 0xc11   : > { %5696 = vmatpush3.bf16.msra.mxu0 %v5693_v15 }
 0xc12   : > { %v5697_v22 = vpack.c.bf16 %v4075_v17, %v4070_v21 }
 0xc14   : > { %5698 = vmatprep.subr.bf16.mxu0 %v5697_v22 }
 0xc15   : > { %5700 = vmatpush3.bf16.msra.mxu0 %v5697_v22 }
 0xc18   : > { %5538 = vmatmul.mubr.msk.f32.vlgmr.msra.gmra.mrb[16].mxu0 %vm2121_vm2, %v5926_v28 }
 0xc19   : > { %5540 = vmatprep.mubr.msk.f32.mxu0 %vm2122_vm3, %v5926_v28 }
 0xc1c   : > { %5541 = vmatmul.mubr.msk.f32.gmra.mrb[18].mxu0 %vm2123_vm4, %v5926_v28 }
 0xceb   : > { %v5539_v29 = vpop.f32.mrb[16].mxu0 }
 0xcec   : > { %v4168_v30 = vadd.f32 %v5539_v29, %v4079_v25  ;;  %v4148_v33 = vpop.f32.mrb[17].mxu0 }
 0xced   : > { %v4167_v37 = vadd.f32 %v4148_v33, %v4078_v26 }
 0xcee   : > { %4173 = vst.msk [vmem:[#allocation5 + $0x8] sm:$0xff] %vm4171_vm1, %v4168_v30 }
 0xcef   : > { %4172 = vst.msk [vmem:[#allocation5] sm:$0xff] %vm4171_vm1, %v4167_v37  ;;  %v5542_v55 = vpop.f32.mrb[18].mxu0 }
 0xcf0   : > { %v4170_v42 = vadd.f32 %v5542_v55, %v4081_v38  ;;  %v4158_v46 = vpop.f32.mrb[19].mxu0 }
 0xcf1   : > { %v4169_v56 = vadd.f32 %v4158_v46, %v4080_v41 }
 0xcf2   : > { %4175 = vst.msk [vmem:[#allocation5 + $0x18] sm:$0xff] %vm4171_vm1, %v4170_v42 }
 0xcf3   : > { %4174 = vst.msk [vmem:[#allocation5 + $0x10] sm:$0xff] %vm4171_vm1, %v4169_v56 }
 0xcf4 PF: > { %p4176_p0 = scmp.eq.s32.totalorder %s5867_s15, 3 }
 0xcf6   : > { %p4177_p1 = pnand %p4176_p0, %p1481_p10 }
 0xcf7   : > { %s6785_s2 = sld [smem:[#allocation21_spill]] (!%p4177_p1)  ;;  %v4181_v62 = vld [vmem:[#allocation4] sm:$0xff] (!%p4177_p1)  ;;  %vm4190_vm2 = vcmask (!%p4177_p1), 64512   ;;  %v4182_v47 = vld [vmem:[#allocation4 + $0x8] sm:$0xff] (!%p4177_p1)  ;;  %v4183_v1 = vld [vmem:[#allocation4 + $0x10] sm:$0xff] (!%p4177_p1)  ;;  %s6786_s1 = sld [smem:[#allocation22_spill]] (!%p4177_p1) }
 0xcf8   : > { %4180 = sbr.rel (%p4177_p1) target bundleno = 4100 (0x1004), region = 176  ;;  %5545 = vmatprep.mubr.msk.f32.mxu0 (!%p4177_p1), %vm4190_vm2, %v4181_v62  ;;  %v4184_v5 = vld [vmem:[#allocation4 + $0x18] sm:$0xff] (!%p4177_p1)  ;;  %v4308_v34 = vld [vmem:[%s6095_s19] sm:$0xf] (!%p4177_p1)  ;;  %vm4322_vm3 = vcmask (!%p4177_p1), 1043456   ;;  %v4186_v19 = vld [vmem:[#allocation5 + $0x8] sm:$0xff] (!%p4177_p1) }
 0xcf9   : > { %5737 = vmatprep.subr.msk.mxu1 (!%p4177_p1), %vm4322_vm3, %v4308_v34  ;;  %v4307_v6 = vld [vmem:[%s6090_s20] sm:$0xff] (!%p4177_p1)  ;;  %v4188_v63 = vld [vmem:[#allocation5 + $0x18] sm:$0xff] (!%p4177_p1)  ;;  %vm4309_vm4 = vcmask (!%p4177_p1), 31744  }
 0xcfa   : > { %5738 = vmatpush3.msk.msra.mxu1 (!%p4177_p1), %vm4322_vm3, %v4308_v34  ;;  %v4185_v20 = vld [vmem:[#allocation5] sm:$0xff] (!%p4177_p1)  ;;  %v4187_v11 = vld [vmem:[#allocation5 + $0x10] sm:$0xff] (!%p4177_p1) }
 0xcfb   : > { %5559 = vmatprep.subr.mxu1 (!%p4177_p1), %v4307_v6  ;;  %v4888_v49 = vld [vmem:[%s6100_s14] ss:$0 sm:$0xff] (!%p4177_p1) }
 0xcfd   : > { %v4189_v59 = vld [vmem:[%s6785_s2] sm:$0xff] (!%p4177_p1) }
 0xcfe   : > { %5543 = vmatprep.subr.mxu0 (!%p4177_p1), %v4189_v59  ;;  %v4878_v28 = vld [vmem:[%s6786_s1] ss:$0 sm:$0xff] (!%p4177_p1) }
 0xcff   : > { %5544 = vmatpush3.msra.mxu0 %v4189_v59 }
 0xd00   : > { %5546 = vmatmul.mubr.msk.f32.vlgmr.msra.gmra.mrb[0].mxu0 %vm4190_vm2, %v4182_v47  ;;  %5551 = vmatprep.subr.msk.mxu0 %vm4322_vm3, %v4308_v34 }
 0xd01   : > { %5548 = vmatprep.mubr.msk.f32.mxu0 %vm4190_vm2, %v4183_v1  ;;  %5552 = vmatpush3.msk.msra.mxu0 %vm4322_vm3, %v4308_v34 }
 0xd04   : > { %5549 = vmatmul.mubr.msk.f32.gmra.mrb[2].mxu0 %vm4190_vm2, %v4184_v5 }
 0xdd3   : > { %v5547_v27 = vpop.f32.mrb[0].mxu0 }
 0xdd4   : > { %v4289_v2 = vadd.f32 %v5547_v27, %v4186_v19  ;;  %v4269_v53 = vpop.f32.mrb[1].mxu0 }
 0xdd5   : > { %v4288_v54 = vadd.f32 %v4269_v53, %v4185_v20 }
 0xdd6   : > { %v4300_v0 = vadd.f32 %v4878_v28, %v4289_v2 }
 0xdd7   : > { %v4299_v12 = vadd.f32 %v4878_v28, %v4288_v54  ;;  %v5550_v13 = vpop.f32.mrb[2].mxu0 }
 0xdd8   : > { %v4291_v14 = vadd.f32 %v5550_v13, %v4188_v63  ;;  %v4279_v23 = vpop.f32.mrb[3].mxu0  ;;  %v4304_v32 = vmax.f32 %v4300_v0, 0.0 }
 0xdd9   : > { %v4303_v24 = vmax.f32 %v4299_v12, 0.0  ;;  %v4290_v31 = vadd.f32 %v4279_v23, %v4187_v11 }
 0xdda   : > { %v4302_v36 = vadd.f32 %v4878_v28, %v4291_v14 }
 0xddb   : > { %5553 = vmatprep.mubr.msk.f32.mxu0 %vm4309_vm4, %v4303_v24  ;;  %v4301_v58 = vadd.f32 %v4878_v28, %v4290_v31 }
 0xddc   : > { %5554 = vmatmul.mubr.msk.f32.vlgmr.msra.gmra.mrb[4].mxu0 %vm4309_vm4, %v4304_v32  ;;  %v4306_v39 = vmax.f32 %v4302_v36, 0.0 }
 0xddd   : > { %v4305_v45 = vmax.f32 %v4301_v58, 0.0 }
 0xddf   : > { %5556 = vmatprep.mubr.msk.f32.mxu1 %vm4309_vm4, %v4305_v45 }
 0xde0   : > { %5557 = vmatmul.mubr.msk.f32.vlgmr.msra.gmra.mrb[0].mxu1 %vm4309_vm4, %v4306_v39 }
 0xde1   : > { %5560 = vmatpush3.msra.mxu1 %v4307_v6  ;;  %5561 = vmatprep.mubr.msk.f32.mxu1 %vm4190_vm2, %v4181_v62 }
 0xde4   : > { %5562 = vmatmul.mubr.msk.f32.vlgmr.msra.gmra.mrb[2].mxu1 %vm4190_vm2, %v4182_v47 }
 0xde5   : > { %5564 = vmatprep.mubr.msk.f32.mxu1 %vm4190_vm2, %v4183_v1 }
 0xde8   : > { %5565 = vmatmul.mubr.msk.f32.gmra.mrb[0].mxu1 %vm4190_vm2, %v4184_v5 }
 0xeaf   : > { %v5555_v40 = vpop.f32.mrb[4].mxu0 }
 0xeb0   : > { %v4392_v35 = vpop.f32.mrb[5].mxu0 }
 0xeb7   : > { %v5563_v43 = vpop.f32.mrb[2].mxu1 }
 0xeb8   : > { %v4483_v44 = vadd.f32 %v5563_v43, %v5555_v40  ;;  %v4477_v50 = vpop.f32.mrb[3].mxu1 }
 0xeb9   : > { %v4478_v51 = vadd.f32 %v4477_v50, %v4392_v35 }
 0xeba   : > { %v6698_v57 = vadd.f32 %v4888_v49, %v4483_v44 }
 0xebb   : > { %v4503_v52 = vadd.f32 %v4888_v49, %v4478_v51  ;;  %v5566_v60 = vpop.f32.mrb[0].mxu1 }
 0xebc   : > { %v4487_v61 = vpop.f32.mrb[1].mxu1  ;;  %v6703_v7 = vadd.f32 %v5566_v60, %v4888_v49  ;;  %v4510_v9 = vsel %vm4309_vm4, %v6698_v57, -inf }
 0xebd   : > { %v6700_v3 = vadd.f32 %v4888_v49, %v4487_v61  ;;  %v4507_v4 = vsel %vm4309_vm4, %v4503_v52, -inf }
 0xebe   : > { %4508 = vmax.xlane.f32.xlu0 %v4507_v4  ;;  %v4516_v10 = vsel %vm4309_vm4, %v6703_v7, -inf }
 0xebf   : > { %v4513_v8 = vsel %vm4309_vm4, %v6700_v3, -inf }
 0xec0   : > { %4514 = vmax.xlane.f32.xlu1 %v4513_v8 }
 0xec2   : > { %4511 = vmax.xlane.f32.xlu0 %v4510_v9 }
 0xec4   : > { %4517 = vmax.xlane.f32.xlu1 %v4516_v10 }
 0xf4b   : > { %v4509_v48 = vpop.xlane.xlu0 %4508 }
 0xf4c   : > { %v4519_v15 = vsub.f32 %v4503_v52, %v4509_v48 }
 0xf4d   : > { %v4515_v16 = vpop.xlane.xlu1 %4514 }
 0xf4e   : > { %v4523_v17 = vmul.f32 1.442695, %v4519_v15  ;;  %v4521_v18 = vsub.f32 %v6700_v3, %v4515_v16 }
 0xf4f   : > { %v4512_v21 = vpop.xlane.xlu0 %4511 }
 0xf50   : > { %5829 = vpow2.f32 %v4523_v17  ;;  %v4527_v22 = vmul.f32 1.442695, %v4521_v18  ;;  %v4520_v25 = vsub.f32 %v6698_v57, %v4512_v21 }
 0xf51   : > { %v4518_v26 = vpop.xlane.xlu1 %4517 }
 0xf52   : > { %5831 = vpow2.f32 %v4527_v22  ;;  %v4525_v29 = vmul.f32 1.442695, %v4520_v25  ;;  %v4522_v30 = vsub.f32 %v6703_v7, %v4518_v26 }
 0xf54   : > { %5833 = vpow2.f32 %v4525_v29  ;;  %v4529_v33 = vmul.f32 1.442695, %v4522_v30 }
 0xf56   : > { %5835 = vpow2.f32 %v4529_v33 }
 0xf5a   : > { %v5830_v37 = vpop.eup %5829 }
 0xf5b   : > { %v4531_v38 = vsel %vm4309_vm4, %v5830_v37, 0.0 }
 0xf5c   : > { %v5832_v41 = vpop.eup %5831  ;;  %4532 = vadd.xlane.f32.xlu0 %v4531_v38 }
 0xf5d   : > { %v4537_v42 = vsel %vm4309_vm4, %v5832_v41, 0.0 }
 0xf5e   : > { %v5834_v55 = vpop.eup %5833 }
 0xf5f   : > { %v4534_v46 = vsel %vm4309_vm4, %v5834_v55, 0.0 }
 0xf60   : > { %v5836_v56 = vpop.eup %5835  ;;  %4538 = vadd.xlane.f32.xlu0 %v4537_v42  ;;  %4535 = vadd.xlane.f32.xlu1 %v4534_v46 }
 0xf61   : > { %v4540_v59 = vsel %vm4309_vm4, %v5836_v56, 0.0 }
 0xf64   : > { %4541 = vadd.xlane.f32.xlu1 %v4540_v59 }
 0xfe9   : > { %v4533_v62 = vpop.xlane.xlu0 %4532 }
 0xfea   : > { %5837 = vlog2.f32 %v4533_v62 }
 0xfed   : > { %v4536_v47 = vpop.xlane.xlu1 %4535  ;;  %v4539_v1 = vpop.xlane.xlu0 %4538 }
 0xfee   : > { %5839 = vlog2.f32 %v4536_v47 }
 0xfef   : > { %5841 = vlog2.f32 %v4539_v1 }
 0xff1   : > { %v4542_v5 = vpop.xlane.xlu1 %4541 }
 0xff2   : > { %5843 = vlog2.f32 %v4542_v5 }
 0xff4   : > { %v5838_v34 = vpop.eup %5837 }
 0xff5   : > { %v4544_v6 = vmul.f32 0.6931472, %v5838_v34 }
 0xff7   : > { %v4551_v19 = vadd.f32 %v4544_v6, %v4509_v48 }
 0xff8   : > { %v5840_v20 = vpop.eup %5839 }
 0xff9   : > { %v5842_v27 = vpop.eup %5841  ;;  %v4555_v28 = vsub.f32 %v4503_v52, %v4551_v19  ;;  %v4546_v2 = vmul.f32 0.6931472, %v5840_v20 }
 0xffa   : > { %v4548_v53 = vmul.f32 0.6931472, %v5842_v27 }
 0xffb   : > { %4559 = vst.msk [vmem:[%s6105_s4] sm:$0xff] %vm4309_vm4, %v4555_v28  ;;  %v4552_v54 = vadd.f32 %v4546_v2, %v4512_v21 }
 0xffc   : > { %v5844_v63 = vpop.eup %5843  ;;  %v4553_v0 = vadd.f32 %v4548_v53, %v4515_v16 }
 0xffd   : > { %v4556_v11 = vsub.f32 %v6698_v57, %v4552_v54  ;;  %v4550_v12 = vmul.f32 0.6931472, %v5844_v63 }
 0xffe   : > { %v4557_v13 = vsub.f32 %v6700_v3, %v4553_v0 }
 0xfff   : > { %4560 = vst.msk [vmem:[%s6105_s4 + $0x8] sm:$0xff] %vm4309_vm4, %v4556_v11  ;;  %v4554_v14 = vadd.f32 %v4550_v12, %v4518_v26 }
0x1000   : > { %4561 = vst.msk [vmem:[%s6105_s4 + $0x10] sm:$0xff] %vm4309_vm4, %v4557_v13 }
0x1001   : > { %v4558_v23 = vsub.f32 %v6703_v7, %v4554_v14 }
0x1003   : > { %4562 = vst.msk [vmem:[%s6105_s4 + $0x18] sm:$0xff] %vm4309_vm4, %v4558_v23 }
0x1004 PF: > { %s79_s23 = sadd.s32 1, %s5883_s23   ;;  %s6787_s15 = smov %s5875_s18 }
0x1005   : > { %p76_p2 = scmp.ge.s32.totalorder %s79_s23, 10   ;;  %s6788_s16 = smov %s5879_s22 }
0x1006   : > { %s6789_s18 = smov %s6792_s0  ;;  %s6790_s22 = smov %s6796_s26 }
0x1007   :  { %78 = sbr.rel (!%p76_p2) target bundleno = 54 (0x36), region = 242 }

</bundles_post_ra>
